<compile_context>
chip_gen: v5e
topology: v5e:2x2
jax: 0.10.0
libtpu: 0.0.40
codegen_flags: <defaults>
</compile_context>

<pallas_src>
import jax
import jax.numpy as jnp
from jax import lax
from jax.experimental import pallas as pl
from jax.experimental.pallas import tpu as pltpu

EVAL_PTS = 100     # torch.linspace(0, 0.5, 100)
T_END = 0.5
N_SUB = 8          # fixed Dormand-Prince substeps per eval interval
# TODO(synk): torchdiffeq dopri5 uses *adaptive* step-size control (rtol=1e-7,
# atol=1e-9); here we use fixed-step Dormand-Prince (5th order) with N_SUB
# substeps per output interval, which converges to the same trajectory for the
# default (non-stiff) parameter settings.

# ---- Dormand-Prince 5(4) tableau with the step size h folded in at trace time ----
_H = (T_END / (EVAL_PTS - 1)) / N_SUB
_A21 = _H * (1 / 5)
_A31, _A32 = _H * (3 / 40), _H * (9 / 40)
_A41, _A42, _A43 = _H * (44 / 45), _H * (-56 / 15), _H * (32 / 9)
_A51, _A52, _A53, _A54 = (_H * (19372 / 6561), _H * (-25360 / 2187),
                          _H * (64448 / 6561), _H * (-212 / 729))
_A61, _A62, _A63, _A64, _A65 = (_H * (9017 / 3168), _H * (-355 / 33),
                                _H * (46732 / 5247), _H * (49 / 176),
                                _H * (-5103 / 18656))
_B1, _B3, _B4, _B5, _B6 = (_H * (35 / 384), _H * (500 / 1113), _H * (125 / 192),
                           _H * (-2187 / 6784), _H * (11 / 84))


def _circuit_kernel(x0_ref, nls_ref, m2_ref, out_ref):
    batch, two_m = x0_ref.shape
    modes = two_m // 2

    M2 = m2_ref[...]                                        # (2m, 2m) float32
    # Hoist the (1, 2m) -> (batch, 2m) broadcast out of the ~4750 RHS bodies.
    nls_b = jnp.broadcast_to(nls_ref[...], (batch, two_m))  # [-nl, nl]

    def rhs(x):
        # dA/dt = 1j*(omega + nl*|A|^2)*A + T2 @ A, with 1j*omega folded into M2.
        # xs = [Im(A), Re(A)]  (half-swap; lane concat of the two halves —
        # proven lowering at this tiny lane width).
        # TODO(synk): per the perf review, if a bundle dump shows this concat
        # materializing VMEM round-trips, replace it with
        # pltpu.roll(x, shift=modes, axis=-1) (sign already folded into nls).
        xs = jnp.concatenate([x[:, modes:], x[:, :modes]], axis=1)
        mag2 = x * x + xs * xs                              # |A|^2 in both halves
        lin = jnp.dot(x, M2, preferred_element_type=jnp.float32,
                      precision=jax.lax.Precision.HIGHEST)  # pinned: f32 fidelity
        return nls_b * mag2 * xs + lin

    def dp_step(x):
        # Dormand-Prince 5th-order solution, fixed step (autonomous ODE).
        # Stage combines are running partial sums: after k_i lands, the next RHS
        # argument is one mul + one add away; the remaining partial-sum updates
        # execute in VALU slack under the in-flight stage's MXU latency.
        k1 = rhs(x)
        y2 = x + _A21 * k1
        y3 = x + _A31 * k1
        y4 = x + _A41 * k1
        y5 = x + _A51 * k1
        y6 = x + _A61 * k1
        acc = x + _B1 * k1
        k2 = rhs(y2)
        y3 = y3 + _A32 * k2
        y4 = y4 + _A42 * k2
        y5 = y5 + _A52 * k2
        y6 = y6 + _A62 * k2
        k3 = rhs(y3)                                        # b2 == 0
        y4 = y4 + _A43 * k3
        y5 = y5 + _A53 * k3
        y6 = y6 + _A63 * k3
        acc = acc + _B3 * k3
        k4 = rhs(y4)
        y5 = y5 + _A54 * k4
        y6 = y6 + _A64 * k4
        acc = acc + _B4 * k4
        k5 = rhs(y5)
        y6 = y6 + _A65 * k5
        acc = acc + _B5 * k5
        k6 = rhs(y6)
        return acc + _B6 * k6

    x = x0_ref[...]
    out_ref[0] = x

    def seg_body(t, x):
        # Fully unroll the fixed 8-substep inner loop (live state is ~1 vreg, so
        # vreg pressure stays low); keep the outer EVAL_PTS loop rolled.
        for _ in range(N_SUB):
            x = dp_step(x)
        out_ref[t] = x                                      # single merged store
        return x

    lax.fori_loop(1, EVAL_PTS, seg_body, x)


def _pallas_integrate(x0, nls, M2):
    batch, two_m = x0.shape
    # Single invocation, everything VMEM-resident: inputs + the 100-point
    # trajectory are a few KB, and the time chain is strictly serial, so no
    # grid / tiling / pipelining (pure overhead here on all TPU generations).
    fn = pl.pallas_call(
        _circuit_kernel,
        out_shape=jax.ShapeDtypeStruct((EVAL_PTS, batch, two_m), jnp.float32),
        in_specs=[pl.BlockSpec(memory_space=pltpu.MemorySpace.VMEM)] * 3,
        out_specs=pl.BlockSpec(memory_space=pltpu.MemorySpace.VMEM),
    )
    return fn(x0, nls, M2)


# ----------------------- plain-JAX glue (parameter setup) -----------------------

def complex_inv(C):
    """Inverse of a complex matrix via the real 2n x 2n block form (TPU-safe)."""
    X = jnp.real(C).astype(jnp.float32)
    Y = jnp.imag(C).astype(jnp.float32)
    n = C.shape[0]
    B = jnp.block([[X, -Y], [Y, X]])
    Bi = jnp.linalg.inv(B)
    return (Bi[:n, :n] + 1j * Bi[n:, :n]).astype(jnp.complex64)


def unitary_from_parameters(modes, params):
    # TODO(synk): the original `unitary_from_parameters` source was not provided;
    # using a Reck-style decomposition (n(n-1)/2 beamsplitters with theta/phi +
    # n-1 output phases = modes**2 - 1 real parameters), which is the standard
    # photonic-circuit parameterization of U(n) up to global phase.
    n = modes
    n_bs = n * (n - 1) // 2
    thetas = params[:n_bs]
    phis = params[n_bs:2 * n_bs]
    out_ph = params[2 * n_bs:]            # n - 1 phases
    U = jnp.eye(n, dtype=jnp.complex64)
    k = 0
    for i in range(n):
        for j in range(i + 1, n):
            th = thetas[k]
            ph = phis[k]
            k += 1
            c = jnp.cos(th).astype(jnp.complex64)
            s = jnp.sin(th).astype(jnp.complex64)
            eip = jnp.exp(1j * ph).astype(jnp.complex64)
            T = jnp.eye(n, dtype=jnp.complex64)
            T = T.at[i, i].set(eip * c)
            T = T.at[i, j].set(-s)
            T = T.at[j, i].set(eip * s)
            T = T.at[j, j].set(c)
            U = T @ U
    D = jnp.concatenate([jnp.exp(1j * out_ph).astype(jnp.complex64),
                         jnp.ones((1,), jnp.complex64)])
    return jnp.diag(D) @ U


def circuit_forward(A0, modes, input_modes, omega, kappa, nonlinearity,
                    params, biases=None):
    batch = A0.shape[0]
    # padded_input
    padded = jnp.zeros((batch, modes), dtype=jnp.complex64)
    padded = padded.at[:, :input_modes].set(A0.astype(jnp.complex64))
    if biases is not None and modes > input_modes:
        padded = padded.at[:, input_modes:].set(
            jnp.broadcast_to(biases[None, :], (batch, modes - input_modes)))

    # constant matrix T2 = -kappa * (0.5*I + U^T U (I - U^T U + 1e-8 I)^-1)
    U = unitary_from_parameters(modes, params)
    I = jnp.eye(modes, dtype=jnp.complex64)
    UtU = U.T @ U                          # non-conjugate transpose, as in torch
    mix = UtU @ complex_inv(I - UtU + 1e-8 * I)
    # kappa (modes,) broadcasts over rows -> scales columns, matching torch.
    T2 = -(kappa.astype(jnp.float32) *
           (0.5 * jnp.eye(modes, dtype=jnp.float32) + mix))
    # Fold the linear 1j*omega term of the frequency operator into the constant
    # matrix so the in-kernel RHS is just (cubic Kerr term) + one matmul.
    T2c = T2 + 1j * jnp.diag(omega.astype(jnp.float32))

    MrT = jnp.real(T2c).astype(jnp.float32).T
    MiT = jnp.imag(T2c).astype(jnp.float32).T
    # Block-complex matrix so  [lr, li] = [ar, ai] @ M2  in one MXU dot.
    M2 = jnp.block([[MrT, MiT], [-MiT, MrT]]).astype(jnp.float32)   # (2m, 2m)

    nl = nonlinearity.astype(jnp.float32)
    nls = jnp.concatenate([-nl, nl]).reshape(1, 2 * modes)          # sign folded

    x0 = jnp.concatenate([jnp.real(padded), jnp.imag(padded)],
                         axis=1).astype(jnp.float32)                # (batch, 2m)

    out = _pallas_integrate(x0, nls, M2)            # (eval_pts, batch, 2m) f32
    return (out[..., :modes] + 1j * out[..., modes:]).astype(jnp.complex64)


if __name__ == "__main__":
    modes, input_modes, batch = 4, 2, 2
    key = jax.random.PRNGKey(0)
    k1, k2, k3, k4, k5 = jax.random.split(key, 5)

    # Circuit.default-style deterministic parameters
    omega = jnp.full((modes,), 5.0, jnp.float32)
    kappa = jnp.full((modes,), 5.0, jnp.float32)
    nonlinearity = jnp.full((modes,), 0.2, jnp.float32)
    params = jax.random.uniform(k1, (modes ** 2 - 1,), jnp.float32)
    biases = (jax.random.uniform(k2, (modes - input_modes,), jnp.float32)
              + 1j * jax.random.uniform(k3, (modes - input_modes,), jnp.float32)
              ).astype(jnp.complex64)

    # input A0: (batch, input_modes) complex64
    A0 = (jax.random.uniform(k4, (batch, input_modes), jnp.float32)
          + 1j * jax.random.uniform(k5, (batch, input_modes), jnp.float32)
          ).astype(jnp.complex64)

    out = circuit_forward(A0, modes, input_modes, omega, kappa, nonlinearity,
                          params, biases)
    out = jax.block_until_ready(out)

    assert out.shape == (EVAL_PTS, batch, modes), out.shape
    assert out.dtype == jnp.complex64, out.dtype
    assert bool(jnp.all(jnp.isfinite(jnp.abs(out)))), "non-finite trajectory"
    print("KERNEL_OK")
</pallas_src>

<mosaic_0001>
module attributes {stable_mosaic.version = 11 : i64} {
  func.func @_circuit_kernel(%arg0: memref<2x8xf32, #tpu.memory_space<vmem>>, %arg1: memref<1x8xf32, #tpu.memory_space<vmem>>, %arg2: memref<8x8xf32, #tpu.memory_space<vmem>>, %arg3: memref<100x2x8xf32, #tpu.memory_space<vmem>>) attributes {dimension_semantics = [], scalar_prefetch = 0 : i64, scratch_operands = 0 : i64, tpu.core_type = #tpu.core_type<tc>} {
    %c0 = arith.constant 0 : index
    %c0_0 = arith.constant 0 : index
    %0 = vector.load %arg2[%c0, %c0_0] : memref<8x8xf32, #tpu.memory_space<vmem>>, vector<8x8xf32>
    %c0_1 = arith.constant 0 : index
    %c0_2 = arith.constant 0 : index
    %1 = vector.load %arg1[%c0_1, %c0_2] : memref<1x8xf32, #tpu.memory_space<vmem>>, vector<1x8xf32>
    %2 = vector.shape_cast %1 : vector<1x8xf32> to vector<1x8xf32>
    %3 = vector.broadcast %2 : vector<1x8xf32> to vector<2x8xf32>
    %c0_3 = arith.constant 0 : index
    %c0_4 = arith.constant 0 : index
    %4 = vector.load %arg0[%c0_3, %c0_4] : memref<2x8xf32, #tpu.memory_space<vmem>>, vector<2x8xf32>
    %c0_5 = arith.constant 0 : index
    %c0_6 = arith.constant 0 : index
    %c0_7 = arith.constant 0 : index
    %5 = vector.load %arg3[%c0_5, %c0_6, %c0_7] : memref<100x2x8xf32, #tpu.memory_space<vmem>>, vector<1x2x8xf32>
    %6 = vector.shape_cast %5 : vector<1x2x8xf32> to vector<2x8xf32>
    %7 = vector.shape_cast %4 : vector<2x8xf32> to vector<1x2x8xf32>
    tpu.vector_store %arg3[%c0_5, %c0_6, %c0_7], %7 {strides = array<i32>} : memref<100x2x8xf32, #tpu.memory_space<vmem>>, vector<1x2x8xf32>,
    %c1_i32 = arith.constant 1 : i32
    %c99_i32 = arith.constant 99 : i32
    %8 = arith.addi %c1_i32, %c99_i32 : i32
    %c1_i32_8 = arith.constant 1 : i32
    %9 = scf.for %arg4 = %c1_i32 to %8 step %c1_i32_8 iter_args(%arg5 = %4) -> (vector<2x8xf32>)  : i32 {
      %10 = vector.extract_strided_slice %arg5 {offsets = [0, 4], sizes = [2, 4], strides = [1, 1]} : vector<2x8xf32> to vector<2x4xf32>
      %11 = vector.extract_strided_slice %arg5 {offsets = [0, 0], sizes = [2, 4], strides = [1, 1]} : vector<2x8xf32> to vector<2x4xf32>
      %12 = tpu.concatenate %10, %11 in 1 : vector<2x4xf32>, vector<2x4xf32> -> vector<2x8xf32>
      %13 = arith.mulf %arg5, %arg5 : vector<2x8xf32>
      %14 = arith.mulf %12, %12 : vector<2x8xf32>
      %15 = arith.addf %13, %14 : vector<2x8xf32>
      %cst = arith.constant dense<0.000000e+00> : vector<2x8xf32>
      %16 = tpu.matmul %arg5, %0, %cst {dimension_numbers = #tpu.dot_dimension_numbers<[1], [0], [0], [1], [0, 0, 1, 1], [], []>, precision = #tpu.contract_precision<fp32>} : vector<2x8xf32>, vector<8x8xf32>, vector<2x8xf32> -> vector<2x8xf32>
      %17 = arith.mulf %3, %15 : vector<2x8xf32>
      %18 = arith.mulf %17, %12 : vector<2x8xf32>
      %19 = arith.addf %18, %16 : vector<2x8xf32>
      %cst_10 = arith.constant 1.26262632E-4 : f32
      %20 = vector.broadcast %cst_10 : f32 to vector<2x8xf32>
      %21 = arith.mulf %20, %19 : vector<2x8xf32>
      %22 = arith.addf %arg5, %21 : vector<2x8xf32>
      %cst_11 = arith.constant 4.73484833E-5 : f32
      %23 = vector.broadcast %cst_11 : f32 to vector<2x8xf32>
      %24 = arith.mulf %23, %19 : vector<2x8xf32>
      %25 = arith.addf %arg5, %24 : vector<2x8xf32>
      %cst_12 = arith.constant 6.172840e-04 : f32
      %26 = vector.broadcast %cst_12 : f32 to vector<2x8xf32>
      %27 = arith.mulf %26, %19 : vector<2x8xf32>
      %28 = arith.addf %arg5, %27 : vector<2x8xf32>
      %cst_13 = arith.constant 0.00186401431 : f32
      %29 = vector.broadcast %cst_13 : f32 to vector<2x8xf32>
      %30 = arith.mulf %29, %19 : vector<2x8xf32>
      %31 = arith.addf %arg5, %30 : vector<2x8xf32>
      %cst_14 = arith.constant 0.00179689098 : f32
      %32 = vector.broadcast %cst_14 : f32 to vector<2x8xf32>
      %33 = arith.mulf %32, %19 : vector<2x8xf32>
      %34 = arith.addf %arg5, %33 : vector<2x8xf32>
      %cst_15 = arith.constant 5.75415615E-5 : f32
      %35 = vector.broadcast %cst_15 : f32 to vector<2x8xf32>
      %36 = arith.mulf %35, %19 : vector<2x8xf32>
      %37 = arith.addf %arg5, %36 : vector<2x8xf32>
      %38 = vector.extract_strided_slice %22 {offsets = [0, 4], sizes = [2, 4], strides = [1, 1]} : vector<2x8xf32> to vector<2x4xf32>
      %39 = vector.extract_strided_slice %22 {offsets = [0, 0], sizes = [2, 4], strides = [1, 1]} : vector<2x8xf32> to vector<2x4xf32>
      %40 = tpu.concatenate %38, %39 in 1 : vector<2x4xf32>, vector<2x4xf32> -> vector<2x8xf32>
      %41 = arith.mulf %22, %22 : vector<2x8xf32>
      %42 = arith.mulf %40, %40 : vector<2x8xf32>
      %43 = arith.addf %41, %42 : vector<2x8xf32>
      %cst_16 = arith.constant dense<0.000000e+00> : vector<2x8xf32>
      %44 = tpu.matmul %22, %0, %cst_16 {dimension_numbers = #tpu.dot_dimension_numbers<[1], [0], [0], [1], [0, 0, 1, 1], [], []>, precision = #tpu.contract_precision<fp32>} : vector<2x8xf32>, vector<8x8xf32>, vector<2x8xf32> -> vector<2x8xf32>
      %45 = arith.mulf %3, %43 : vector<2x8xf32>
      %46 = arith.mulf %45, %40 : vector<2x8xf32>
      %47 = arith.addf %46, %44 : vector<2x8xf32>
      %cst_17 = arith.constant 1.4204545E-4 : f32
      %48 = vector.broadcast %cst_17 : f32 to vector<2x8xf32>
      %49 = arith.mulf %48, %47 : vector<2x8xf32>
      %50 = arith.addf %25, %49 : vector<2x8xf32>
      %cst_18 = arith.constant -0.00235690246 : f32
      %51 = vector.broadcast %cst_18 : f32 to vector<2x8xf32>
      %52 = arith.mulf %51, %47 : vector<2x8xf32>
      %53 = arith.addf %28, %52 : vector<2x8xf32>
      %cst_19 = arith.constant -0.00732057681 : f32
      %54 = vector.broadcast %cst_19 : f32 to vector<2x8xf32>
      %55 = arith.mulf %54, %47 : vector<2x8xf32>
      %56 = arith.addf %31, %55 : vector<2x8xf32>
      %cst_20 = arith.constant -0.00679139886 : f32
      %57 = vector.broadcast %cst_20 : f32 to vector<2x8xf32>
      %58 = arith.mulf %57, %47 : vector<2x8xf32>
      %59 = arith.addf %34, %58 : vector<2x8xf32>
      %60 = vector.extract_strided_slice %50 {offsets = [0, 4], sizes = [2, 4], strides = [1, 1]} : vector<2x8xf32> to vector<2x4xf32>
      %61 = vector.extract_strided_slice %50 {offsets = [0, 0], sizes = [2, 4], strides = [1, 1]} : vector<2x8xf32> to vector<2x4xf32>
      %62 = tpu.concatenate %60, %61 in 1 : vector<2x4xf32>, vector<2x4xf32> -> vector<2x8xf32>
      %63 = arith.mulf %50, %50 : vector<2x8xf32>
      %64 = arith.mulf %62, %62 : vector<2x8xf32>
      %65 = arith.addf %63, %64 : vector<2x8xf32>
      %cst_21 = arith.constant dense<0.000000e+00> : vector<2x8xf32>
      %66 = tpu.matmul %50, %0, %cst_21 {dimension_numbers = #tpu.dot_dimension_numbers<[1], [0], [0], [1], [0, 0, 1, 1], [], []>, precision = #tpu.contract_precision<fp32>} : vector<2x8xf32>, vector<8x8xf32>, vector<2x8xf32> -> vector<2x8xf32>
      %67 = arith.mulf %3, %65 : vector<2x8xf32>
      %68 = arith.mulf %67, %62 : vector<2x8xf32>
      %69 = arith.addf %68, %66 : vector<2x8xf32>
      %cst_22 = arith.constant 0.00224466901 : f32
      %70 = vector.broadcast %cst_22 : f32 to vector<2x8xf32>
      %71 = arith.mulf %70, %69 : vector<2x8xf32>
      %72 = arith.addf %53, %71 : vector<2x8xf32>
      %cst_23 = arith.constant 0.00620132125 : f32
      %73 = vector.broadcast %cst_23 : f32 to vector<2x8xf32>
      %74 = arith.mulf %73, %69 : vector<2x8xf32>
      %75 = arith.addf %56, %74 : vector<2x8xf32>
      %cst_24 = arith.constant 0.00562274177 : f32
      %76 = vector.broadcast %cst_24 : f32 to vector<2x8xf32>
      %77 = arith.mulf %76, %69 : vector<2x8xf32>
      %78 = arith.addf %59, %77 : vector<2x8xf32>
      %cst_25 = arith.constant 2.83608766E-4 : f32
      %79 = vector.broadcast %cst_25 : f32 to vector<2x8xf32>
      %80 = arith.mulf %79, %69 : vector<2x8xf32>
      %81 = arith.addf %37, %80 : vector<2x8xf32>
      %82 = vector.extract_strided_slice %72 {offsets = [0, 4], sizes = [2, 4], strides = [1, 1]} : vector<2x8xf32> to vector<2x4xf32>
      %83 = vector.extract_strided_slice %72 {offsets = [0, 0], sizes = [2, 4], strides = [1, 1]} : vector<2x8xf32> to vector<2x4xf32>
      %84 = tpu.concatenate %82, %83 in 1 : vector<2x4xf32>, vector<2x4xf32> -> vector<2x8xf32>
      %85 = arith.mulf %72, %72 : vector<2x8xf32>
      %86 = arith.mulf %84, %84 : vector<2x8xf32>
      %87 = arith.addf %85, %86 : vector<2x8xf32>
      %cst_26 = arith.constant dense<0.000000e+00> : vector<2x8xf32>
      %88 = tpu.matmul %72, %0, %cst_26 {dimension_numbers = #tpu.dot_dimension_numbers<[1], [0], [0], [1], [0, 0, 1, 1], [], []>, precision = #tpu.contract_precision<fp32>} : vector<2x8xf32>, vector<8x8xf32>, vector<2x8xf32> -> vector<2x8xf32>
      %89 = arith.mulf %3, %87 : vector<2x8xf32>
      %90 = arith.mulf %89, %84 : vector<2x8xf32>
      %91 = arith.addf %90, %88 : vector<2x8xf32>
      %cst_27 = arith.constant -1.8359175E-4 : f32
      %92 = vector.broadcast %cst_27 : f32 to vector<2x8xf32>
      %93 = arith.mulf %92, %91 : vector<2x8xf32>
      %94 = arith.addf %75, %93 : vector<2x8xf32>
      %cst_28 = arith.constant 1.75763314E-4 : f32
      %95 = vector.broadcast %cst_28 : f32 to vector<2x8xf32>
      %96 = arith.mulf %95, %91 : vector<2x8xf32>
      %97 = arith.addf %78, %96 : vector<2x8xf32>
      %cst_29 = arith.constant 4.11011162E-4 : f32
      %98 = vector.broadcast %cst_29 : f32 to vector<2x8xf32>
      %99 = arith.mulf %98, %91 : vector<2x8xf32>
      %100 = arith.addf %81, %99 : vector<2x8xf32>
      %101 = vector.extract_strided_slice %94 {offsets = [0, 4], sizes = [2, 4], strides = [1, 1]} : vector<2x8xf32> to vector<2x4xf32>
      %102 = vector.extract_strided_slice %94 {offsets = [0, 0], sizes = [2, 4], strides = [1, 1]} : vector<2x8xf32> to vector<2x4xf32>
      %103 = tpu.concatenate %101, %102 in 1 : vector<2x4xf32>, vector<2x4xf32> -> vector<2x8xf32>
      %104 = arith.mulf %94, %94 : vector<2x8xf32>
      %105 = arith.mulf %103, %103 : vector<2x8xf32>
      %106 = arith.addf %104, %105 : vector<2x8xf32>
      %cst_30 = arith.constant dense<0.000000e+00> : vector<2x8xf32>
      %107 = tpu.matmul %94, %0, %cst_30 {dimension_numbers = #tpu.dot_dimension_numbers<[1], [0], [0], [1], [0, 0, 1, 1], [], []>, precision = #tpu.contract_precision<fp32>} : vector<2x8xf32>, vector<8x8xf32>, vector<2x8xf32> -> vector<2x8xf32>
      %108 = arith.mulf %3, %106 : vector<2x8xf32>
      %109 = arith.mulf %108, %103 : vector<2x8xf32>
      %110 = arith.addf %109, %107 : vector<2x8xf32>
      %cst_31 = arith.constant -1.72683911E-4 : f32
      %111 = vector.broadcast %cst_31 : f32 to vector<2x8xf32>
      %112 = arith.mulf %111, %110 : vector<2x8xf32>
      %113 = arith.addf %97, %112 : vector<2x8xf32>
      %cst_32 = arith.constant -2.03520322E-4 : f32
      %114 = vector.broadcast %cst_32 : f32 to vector<2x8xf32>
      %115 = arith.mulf %114, %110 : vector<2x8xf32>
      %116 = arith.addf %100, %115 : vector<2x8xf32>
      %117 = vector.extract_strided_slice %113 {offsets = [0, 4], sizes = [2, 4], strides = [1, 1]} : vector<2x8xf32> to vector<2x4xf32>
      %118 = vector.extract_strided_slice %113 {offsets = [0, 0], sizes = [2, 4], strides = [1, 1]} : vector<2x8xf32> to vector<2x4xf32>
      %119 = tpu.concatenate %117, %118 in 1 : vector<2x4xf32>, vector<2x4xf32> -> vector<2x8xf32>
      %120 = arith.mulf %113, %113 : vector<2x8xf32>
      %121 = arith.mulf %119, %119 : vector<2x8xf32>
      %122 = arith.addf %120, %121 : vector<2x8xf32>
      %cst_33 = arith.constant dense<0.000000e+00> : vector<2x8xf32>
      %123 = tpu.matmul %113, %0, %cst_33 {dimension_numbers = #tpu.dot_dimension_numbers<[1], [0], [0], [1], [0, 0, 1, 1], [], []>, precision = #tpu.contract_precision<fp32>} : vector<2x8xf32>, vector<8x8xf32>, vector<2x8xf32> -> vector<2x8xf32>
      %124 = arith.mulf %3, %122 : vector<2x8xf32>
      %125 = arith.mulf %124, %119 : vector<2x8xf32>
      %126 = arith.addf %125, %123 : vector<2x8xf32>
      %cst_34 = arith.constant 8.26719551E-5 : f32
      %127 = vector.broadcast %cst_34 : f32 to vector<2x8xf32>
      %128 = arith.mulf %127, %126 : vector<2x8xf32>
      %129 = arith.addf %116, %128 : vector<2x8xf32>
      %130 = vector.extract_strided_slice %129 {offsets = [0, 4], sizes = [2, 4], strides = [1, 1]} : vector<2x8xf32> to vector<2x4xf32>
      %131 = vector.extract_strided_slice %129 {offsets = [0, 0], sizes = [2, 4], strides = [1, 1]} : vector<2x8xf32> to vector<2x4xf32>
      %132 = tpu.concatenate %130, %131 in 1 : vector<2x4xf32>, vector<2x4xf32> -> vector<2x8xf32>
      %133 = arith.mulf %129, %129 : vector<2x8xf32>
      %134 = arith.mulf %132, %132 : vector<2x8xf32>
      %135 = arith.addf %133, %134 : vector<2x8xf32>
      %cst_35 = arith.constant dense<0.000000e+00> : vector<2x8xf32>
      %136 = tpu.matmul %129, %0, %cst_35 {dimension_numbers = #tpu.dot_dimension_numbers<[1], [0], [0], [1], [0, 0, 1, 1], [], []>, precision = #tpu.contract_precision<fp32>} : vector<2x8xf32>, vector<8x8xf32>, vector<2x8xf32> -> vector<2x8xf32>
      %137 = arith.mulf %3, %135 : vector<2x8xf32>
      %138 = arith.mulf %137, %132 : vector<2x8xf32>
      %139 = arith.addf %138, %136 : vector<2x8xf32>
      %cst_36 = arith.constant 1.26262632E-4 : f32
      %140 = vector.broadcast %cst_36 : f32 to vector<2x8xf32>
      %141 = arith.mulf %140, %139 : vector<2x8xf32>
      %142 = arith.addf %129, %141 : vector<2x8xf32>
      %cst_37 = arith.constant 4.73484833E-5 : f32
      %143 = vector.broadcast %cst_37 : f32 to vector<2x8xf32>
      %144 = arith.mulf %143, %139 : vector<2x8xf32>
      %145 = arith.addf %129, %144 : vector<2x8xf32>
      %cst_38 = arith.constant 6.172840e-04 : f32
      %146 = vector.broadcast %cst_38 : f32 to vector<2x8xf32>
      %147 = arith.mulf %146, %139 : vector<2x8xf32>
      %148 = arith.addf %129, %147 : vector<2x8xf32>
      %cst_39 = arith.constant 0.00186401431 : f32
      %149 = vector.broadcast %cst_39 : f32 to vector<2x8xf32>
      %150 = arith.mulf %149, %139 : vector<2x8xf32>
      %151 = arith.addf %129, %150 : vector<2x8xf32>
      %cst_40 = arith.constant 0.00179689098 : f32
      %152 = vector.broadcast %cst_40 : f32 to vector<2x8xf32>
      %153 = arith.mulf %152, %139 : vector<2x8xf32>
      %154 = arith.addf %129, %153 : vector<2x8xf32>
      %cst_41 = arith.constant 5.75415615E-5 : f32
      %155 = vector.broadcast %cst_41 : f32 to vector<2x8xf32>
      %156 = arith.mulf %155, %139 : vector<2x8xf32>
      %157 = arith.addf %129, %156 : vector<2x8xf32>
      %158 = vector.extract_strided_slice %142 {offsets = [0, 4], sizes = [2, 4], strides = [1, 1]} : vector<2x8xf32> to vector<2x4xf32>
      %159 = vector.extract_strided_slice %142 {offsets = [0, 0], sizes = [2, 4], strides = [1, 1]} : vector<2x8xf32> to vector<2x4xf32>
      %160 = tpu.concatenate %158, %159 in 1 : vector<2x4xf32>, vector<2x4xf32> -> vector<2x8xf32>
      %161 = arith.mulf %142, %142 : vector<2x8xf32>
      %162 = arith.mulf %160, %160 : vector<2x8xf32>
      %163 = arith.addf %161, %162 : vector<2x8xf32>
      %cst_42 = arith.constant dense<0.000000e+00> : vector<2x8xf32>
      %164 = tpu.matmul %142, %0, %cst_42 {dimension_numbers = #tpu.dot_dimension_numbers<[1], [0], [0], [1], [0, 0, 1, 1], [], []>, precision = #tpu.contract_precision<fp32>} : vector<2x8xf32>, vector<8x8xf32>, vector<2x8xf32> -> vector<2x8xf32>
      %165 = arith.mulf %3, %163 : vector<2x8xf32>
      %166 = arith.mulf %165, %160 : vector<2x8xf32>
      %167 = arith.addf %166, %164 : vector<2x8xf32>
      %cst_43 = arith.constant 1.4204545E-4 : f32
      %168 = vector.broadcast %cst_43 : f32 to vector<2x8xf32>
      %169 = arith.mulf %168, %167 : vector<2x8xf32>
      %170 = arith.addf %145, %169 : vector<2x8xf32>
      %cst_44 = arith.constant -0.00235690246 : f32
      %171 = vector.broadcast %cst_44 : f32 to vector<2x8xf32>
      %172 = arith.mulf %171, %167 : vector<2x8xf32>
      %173 = arith.addf %148, %172 : vector<2x8xf32>
      %cst_45 = arith.constant -0.00732057681 : f32
      %174 = vector.broadcast %cst_45 : f32 to vector<2x8xf32>
      %175 = arith.mulf %174, %167 : vector<2x8xf32>
      %176 = arith.addf %151, %175 : vector<2x8xf32>
      %cst_46 = arith.constant -0.00679139886 : f32
      %177 = vector.broadcast %cst_46 : f32 to vector<2x8xf32>
      %178 = arith.mulf %177, %167 : vector<2x8xf32>
      %179 = arith.addf %154, %178 : vector<2x8xf32>
      %180 = vector.extract_strided_slice %170 {offsets = [0, 4], sizes = [2, 4], strides = [1, 1]} : vector<2x8xf32> to vector<2x4xf32>
      %181 = vector.extract_strided_slice %170 {offsets = [0, 0], sizes = [2, 4], strides = [1, 1]} : vector<2x8xf32> to vector<2x4xf32>
      %182 = tpu.concatenate %180, %181 in 1 : vector<2x4xf32>, vector<2x4xf32> -> vector<2x8xf32>
      %183 = arith.mulf %170, %170 : vector<2x8xf32>
      %184 = arith.mulf %182, %182 : vector<2x8xf32>
      %185 = arith.addf %183, %184 : vector<2x8xf32>
      %cst_47 = arith.constant dense<0.000000e+00> : vector<2x8xf32>
      %186 = tpu.matmul %170, %0, %cst_47 {dimension_numbers = #tpu.dot_dimension_numbers<[1], [0], [0], [1], [0, 0, 1, 1], [], []>, precision = #tpu.contract_precision<fp32>} : vector<2x8xf32>, vector<8x8xf32>, vector<2x8xf32> -> vector<2x8xf32>
      %187 = arith.mulf %3, %185 : vector<2x8xf32>
      %188 = arith.mulf %187, %182 : vector<2x8xf32>
      %189 = arith.addf %188, %186 : vector<2x8xf32>
      %cst_48 = arith.constant 0.00224466901 : f32
      %190 = vector.broadcast %cst_48 : f32 to vector<2x8xf32>
      %191 = arith.mulf %190, %189 : vector<2x8xf32>
      %192 = arith.addf %173, %191 : vector<2x8xf32>
      %cst_49 = arith.constant 0.00620132125 : f32
      %193 = vector.broadcast %cst_49 : f32 to vector<2x8xf32>
      %194 = arith.mulf %193, %189 : vector<2x8xf32>
      %195 = arith.addf %176, %194 : vector<2x8xf32>
      %cst_50 = arith.constant 0.00562274177 : f32
      %196 = vector.broadcast %cst_50 : f32 to vector<2x8xf32>
      %197 = arith.mulf %196, %189 : vector<2x8xf32>
      %198 = arith.addf %179, %197 : vector<2x8xf32>
      %cst_51 = arith.constant 2.83608766E-4 : f32
      %199 = vector.broadcast %cst_51 : f32 to vector<2x8xf32>
      %200 = arith.mulf %199, %189 : vector<2x8xf32>
      %201 = arith.addf %157, %200 : vector<2x8xf32>
      %202 = vector.extract_strided_slice %192 {offsets = [0, 4], sizes = [2, 4], strides = [1, 1]} : vector<2x8xf32> to vector<2x4xf32>
      %203 = vector.extract_strided_slice %192 {offsets = [0, 0], sizes = [2, 4], strides = [1, 1]} : vector<2x8xf32> to vector<2x4xf32>
      %204 = tpu.concatenate %202, %203 in 1 : vector<2x4xf32>, vector<2x4xf32> -> vector<2x8xf32>
      %205 = arith.mulf %192, %192 : vector<2x8xf32>
      %206 = arith.mulf %204, %204 : vector<2x8xf32>
      %207 = arith.addf %205, %206 : vector<2x8xf32>
      %cst_52 = arith.constant dense<0.000000e+00> : vector<2x8xf32>
      %208 = tpu.matmul %192, %0, %cst_52 {dimension_numbers = #tpu.dot_dimension_numbers<[1], [0], [0], [1], [0, 0, 1, 1], [], []>, precision = #tpu.contract_precision<fp32>} : vector<2x8xf32>, vector<8x8xf32>, vector<2x8xf32> -> vector<2x8xf32>
      %209 = arith.mulf %3, %207 : vector<2x8xf32>
      %210 = arith.mulf %209, %204 : vector<2x8xf32>
      %211 = arith.addf %210, %208 : vector<2x8xf32>
      %cst_53 = arith.constant -1.8359175E-4 : f32
      %212 = vector.broadcast %cst_53 : f32 to vector<2x8xf32>
      %213 = arith.mulf %212, %211 : vector<2x8xf32>
      %214 = arith.addf %195, %213 : vector<2x8xf32>
      %cst_54 = arith.constant 1.75763314E-4 : f32
      %215 = vector.broadcast %cst_54 : f32 to vector<2x8xf32>
      %216 = arith.mulf %215, %211 : vector<2x8xf32>
      %217 = arith.addf %198, %216 : vector<2x8xf32>
      %cst_55 = arith.constant 4.11011162E-4 : f32
      %218 = vector.broadcast %cst_55 : f32 to vector<2x8xf32>
      %219 = arith.mulf %218, %211 : vector<2x8xf32>
      %220 = arith.addf %201, %219 : vector<2x8xf32>
      %221 = vector.extract_strided_slice %214 {offsets = [0, 4], sizes = [2, 4], strides = [1, 1]} : vector<2x8xf32> to vector<2x4xf32>
      %222 = vector.extract_strided_slice %214 {offsets = [0, 0], sizes = [2, 4], strides = [1, 1]} : vector<2x8xf32> to vector<2x4xf32>
      %223 = tpu.concatenate %221, %222 in 1 : vector<2x4xf32>, vector<2x4xf32> -> vector<2x8xf32>
      %224 = arith.mulf %214, %214 : vector<2x8xf32>
      %225 = arith.mulf %223, %223 : vector<2x8xf32>
      %226 = arith.addf %224, %225 : vector<2x8xf32>
      %cst_56 = arith.constant dense<0.000000e+00> : vector<2x8xf32>
      %227 = tpu.matmul %214, %0, %cst_56 {dimension_numbers = #tpu.dot_dimension_numbers<[1], [0], [0], [1], [0, 0, 1, 1], [], []>, precision = #tpu.contract_precision<fp32>} : vector<2x8xf32>, vector<8x8xf32>, vector<2x8xf32> -> vector<2x8xf32>
      %228 = arith.mulf %3, %226 : vector<2x8xf32>
      %229 = arith.mulf %228, %223 : vector<2x8xf32>
      %230 = arith.addf %229, %227 : vector<2x8xf32>
      %cst_57 = arith.constant -1.72683911E-4 : f32
      %231 = vector.broadcast %cst_57 : f32 to vector<2x8xf32>
      %232 = arith.mulf %231, %230 : vector<2x8xf32>
      %233 = arith.addf %217, %232 : vector<2x8xf32>
      %cst_58 = arith.constant -2.03520322E-4 : f32
      %234 = vector.broadcast %cst_58 : f32 to vector<2x8xf32>
      %235 = arith.mulf %234, %230 : vector<2x8xf32>
      %236 = arith.addf %220, %235 : vector<2x8xf32>
      %237 = vector.extract_strided_slice %233 {offsets = [0, 4], sizes = [2, 4], strides = [1, 1]} : vector<2x8xf32> to vector<2x4xf32>
      %238 = vector.extract_strided_slice %233 {offsets = [0, 0], sizes = [2, 4], strides = [1, 1]} : vector<2x8xf32> to vector<2x4xf32>
      %239 = tpu.concatenate %237, %238 in 1 : vector<2x4xf32>, vector<2x4xf32> -> vector<2x8xf32>
      %240 = arith.mulf %233, %233 : vector<2x8xf32>
      %241 = arith.mulf %239, %239 : vector<2x8xf32>
      %242 = arith.addf %240, %241 : vector<2x8xf32>
      %cst_59 = arith.constant dense<0.000000e+00> : vector<2x8xf32>
      %243 = tpu.matmul %233, %0, %cst_59 {dimension_numbers = #tpu.dot_dimension_numbers<[1], [0], [0], [1], [0, 0, 1, 1], [], []>, precision = #tpu.contract_precision<fp32>} : vector<2x8xf32>, vector<8x8xf32>, vector<2x8xf32> -> vector<2x8xf32>
      %244 = arith.mulf %3, %242 : vector<2x8xf32>
      %245 = arith.mulf %244, %239 : vector<2x8xf32>
      %246 = arith.addf %245, %243 : vector<2x8xf32>
      %cst_60 = arith.constant 8.26719551E-5 : f32
      %247 = vector.broadcast %cst_60 : f32 to vector<2x8xf32>
      %248 = arith.mulf %247, %246 : vector<2x8xf32>
      %249 = arith.addf %236, %248 : vector<2x8xf32>
      %250 = vector.extract_strided_slice %249 {offsets = [0, 4], sizes = [2, 4], strides = [1, 1]} : vector<2x8xf32> to vector<2x4xf32>
      %251 = vector.extract_strided_slice %249 {offsets = [0, 0], sizes = [2, 4], strides = [1, 1]} : vector<2x8xf32> to vector<2x4xf32>
      %252 = tpu.concatenate %250, %251 in 1 : vector<2x4xf32>, vector<2x4xf32> -> vector<2x8xf32>
      %253 = arith.mulf %249, %249 : vector<2x8xf32>
      %254 = arith.mulf %252, %252 : vector<2x8xf32>
      %255 = arith.addf %253, %254 : vector<2x8xf32>
      %cst_61 = arith.constant dense<0.000000e+00> : vector<2x8xf32>
      %256 = tpu.matmul %249, %0, %cst_61 {dimension_numbers = #tpu.dot_dimension_numbers<[1], [0], [0], [1], [0, 0, 1, 1], [], []>, precision = #tpu.contract_precision<fp32>} : vector<2x8xf32>, vector<8x8xf32>, vector<2x8xf32> -> vector<2x8xf32>
      %257 = arith.mulf %3, %255 : vector<2x8xf32>
      %258 = arith.mulf %257, %252 : vector<2x8xf32>
      %259 = arith.addf %258, %256 : vector<2x8xf32>
      %cst_62 = arith.constant 1.26262632E-4 : f32
      %260 = vector.broadcast %cst_62 : f32 to vector<2x8xf32>
      %261 = arith.mulf %260, %259 : vector<2x8xf32>
      %262 = arith.addf %249, %261 : vector<2x8xf32>
      %cst_63 = arith.constant 4.73484833E-5 : f32
      %263 = vector.broadcast %cst_63 : f32 to vector<2x8xf32>
      %264 = arith.mulf %263, %259 : vector<2x8xf32>
      %265 = arith.addf %249, %264 : vector<2x8xf32>
      %cst_64 = arith.constant 6.172840e-04 : f32
      %266 = vector.broadcast %cst_64 : f32 to vector<2x8xf32>
      %267 = arith.mulf %266, %259 : vector<2x8xf32>
      %268 = arith.addf %249, %267 : vector<2x8xf32>
      %cst_65 = arith.constant 0.00186401431 : f32
      %269 = vector.broadcast %cst_65 : f32 to vector<2x8xf32>
      %270 = arith.mulf %269, %259 : vector<2x8xf32>
      %271 = arith.addf %249, %270 : vector<2x8xf32>
      %cst_66 = arith.constant 0.00179689098 : f32
      %272 = vector.broadcast %cst_66 : f32 to vector<2x8xf32>
      %273 = arith.mulf %272, %259 : vector<2x8xf32>
      %274 = arith.addf %249, %273 : vector<2x8xf32>
      %cst_67 = arith.constant 5.75415615E-5 : f32
      %275 = vector.broadcast %cst_67 : f32 to vector<2x8xf32>
      %276 = arith.mulf %275, %259 : vector<2x8xf32>
      %277 = arith.addf %249, %276 : vector<2x8xf32>
      %278 = vector.extract_strided_slice %262 {offsets = [0, 4], sizes = [2, 4], strides = [1, 1]} : vector<2x8xf32> to vector<2x4xf32>
      %279 = vector.extract_strided_slice %262 {offsets = [0, 0], sizes = [2, 4], strides = [1, 1]} : vector<2x8xf32> to vector<2x4xf32>
      %280 = tpu.concatenate %278, %279 in 1 : vector<2x4xf32>, vector<2x4xf32> -> vector<2x8xf32>
      %281 = arith.mulf %262, %262 : vector<2x8xf32>
      %282 = arith.mulf %280, %280 : vector<2x8xf32>
      %283 = arith.addf %281, %282 : vector<2x8xf32>
      %cst_68 = arith.constant dense<0.000000e+00> : vector<2x8xf32>
      %284 = tpu.matmul %262, %0, %cst_68 {dimension_numbers = #tpu.dot_dimension_numbers<[1], [0], [0], [1], [0, 0, 1, 1], [], []>, precision = #tpu.contract_precision<fp32>} : vector<2x8xf32>, vector<8x8xf32>, vector<2x8xf32> -> vector<2x8xf32>
      %285 = arith.mulf %3, %283 : vector<2x8xf32>
      %286 = arith.mulf %285, %280 : vector<2x8xf32>
      %287 = arith.addf %286, %284 : vector<2x8xf32>
      %cst_69 = arith.constant 1.4204545E-4 : f32
      %288 = vector.broadcast %cst_69 : f32 to vector<2x8xf32>
      %289 = arith.mulf %288, %287 : vector<2x8xf32>
      %290 = arith.addf %265, %289 : vector<2x8xf32>
      %cst_70 = arith.constant -0.00235690246 : f32
      %291 = vector.broadcast %cst_70 : f32 to vector<2x8xf32>
      %292 = arith.mulf %291, %287 : vector<2x8xf32>
      %293 = arith.addf %268, %292 : vector<2x8xf32>
      %cst_71 = arith.constant -0.00732057681 : f32
      %294 = vector.broadcast %cst_71 : f32 to vector<2x8xf32>
      %295 = arith.mulf %294, %287 : vector<2x8xf32>
      %296 = arith.addf %271, %295 : vector<2x8xf32>
      %cst_72 = arith.constant -0.00679139886 : f32
      %297 = vector.broadcast %cst_72 : f32 to vector<2x8xf32>
      %298 = arith.mulf %297, %287 : vector<2x8xf32>
      %299 = arith.addf %274, %298 : vector<2x8xf32>
      %300 = vector.extract_strided_slice %290 {offsets = [0, 4], sizes = [2, 4], strides = [1, 1]} : vector<2x8xf32> to vector<2x4xf32>
      %301 = vector.extract_strided_slice %290 {offsets = [0, 0], sizes = [2, 4], strides = [1, 1]} : vector<2x8xf32> to vector<2x4xf32>
      %302 = tpu.concatenate %300, %301 in 1 : vector<2x4xf32>, vector<2x4xf32> -> vector<2x8xf32>
      %303 = arith.mulf %290, %290 : vector<2x8xf32>
      %304 = arith.mulf %302, %302 : vector<2x8xf32>
      %305 = arith.addf %303, %304 : vector<2x8xf32>
      %cst_73 = arith.constant dense<0.000000e+00> : vector<2x8xf32>
      %306 = tpu.matmul %290, %0, %cst_73 {dimension_numbers = #tpu.dot_dimension_numbers<[1], [0], [0], [1], [0, 0, 1, 1], [], []>, precision = #tpu.contract_precision<fp32>} : vector<2x8xf32>, vector<8x8xf32>, vector<2x8xf32> -> vector<2x8xf32>
      %307 = arith.mulf %3, %305 : vector<2x8xf32>
      %308 = arith.mulf %307, %302 : vector<2x8xf32>
      %309 = arith.addf %308, %306 : vector<2x8xf32>
      %cst_74 = arith.constant 0.00224466901 : f32
      %310 = vector.broadcast %cst_74 : f32 to vector<2x8xf32>
      %311 = arith.mulf %310, %309 : vector<2x8xf32>
      %312 = arith.addf %293, %311 : vector<2x8xf32>
      %cst_75 = arith.constant 0.00620132125 : f32
      %313 = vector.broadcast %cst_75 : f32 to vector<2x8xf32>
      %314 = arith.mulf %313, %309 : vector<2x8xf32>
      %315 = arith.addf %296, %314 : vector<2x8xf32>
      %cst_76 = arith.constant 0.00562274177 : f32
      %316 = vector.broadcast %cst_76 : f32 to vector<2x8xf32>
      %317 = arith.mulf %316, %309 : vector<2x8xf32>
      %318 = arith.addf %299, %317 : vector<2x8xf32>
      %cst_77 = arith.constant 2.83608766E-4 : f32
      %319 = vector.broadcast %cst_77 : f32 to vector<2x8xf32>
      %320 = arith.mulf %319, %309 : vector<2x8xf32>
      %321 = arith.addf %277, %320 : vector<2x8xf32>
      %322 = vector.extract_strided_slice %312 {offsets = [0, 4], sizes = [2, 4], strides = [1, 1]} : vector<2x8xf32> to vector<2x4xf32>
      %323 = vector.extract_strided_slice %312 {offsets = [0, 0], sizes = [2, 4], strides = [1, 1]} : vector<2x8xf32> to vector<2x4xf32>
      %324 = tpu.concatenate %322, %323 in 1 : vector<2x4xf32>, vector<2x4xf32> -> vector<2x8xf32>
      %325 = arith.mulf %312, %312 : vector<2x8xf32>
      %326 = arith.mulf %324, %324 : vector<2x8xf32>
      %327 = arith.addf %325, %326 : vector<2x8xf32>
      %cst_78 = arith.constant dense<0.000000e+00> : vector<2x8xf32>
      %328 = tpu.matmul %312, %0, %cst_78 {dimension_numbers = #tpu.dot_dimension_numbers<[1], [0], [0], [1], [0, 0, 1, 1], [], []>, precision = #tpu.contract_precision<fp32>} : vector<2x8xf32>, vector<8x8xf32>, vector<2x8xf32> -> vector<2x8xf32>
      %329 = arith.mulf %3, %327 : vector<2x8xf32>
      %330 = arith.mulf %329, %324 : vector<2x8xf32>
      %331 = arith.addf %330, %328 : vector<2x8xf32>
      %cst_79 = arith.constant -1.8359175E-4 : f32
      %332 = vector.broadcast %cst_79 : f32 to vector<2x8xf32>
      %333 = arith.mulf %332, %331 : vector<2x8xf32>
      %334 = arith.addf %315, %333 : vector<2x8xf32>
      %cst_80 = arith.constant 1.75763314E-4 : f32
      %335 = vector.broadcast %cst_80 : f32 to vector<2x8xf32>
      %336 = arith.mulf %335, %331 : vector<2x8xf32>
      %337 = arith.addf %318, %336 : vector<2x8xf32>
      %cst_81 = arith.constant 4.11011162E-4 : f32
      %338 = vector.broadcast %cst_81 : f32 to vector<2x8xf32>
      %339 = arith.mulf %338, %331 : vector<2x8xf32>
      %340 = arith.addf %321, %339 : vector<2x8xf32>
      %341 = vector.extract_strided_slice %334 {offsets = [0, 4], sizes = [2, 4], strides = [1, 1]} : vector<2x8xf32> to vector<2x4xf32>
      %342 = vector.extract_strided_slice %334 {offsets = [0, 0], sizes = [2, 4], strides = [1, 1]} : vector<2x8xf32> to vector<2x4xf32>
      %343 = tpu.concatenate %341, %342 in 1 : vector<2x4xf32>, vector<2x4xf32> -> vector<2x8xf32>
      %344 = arith.mulf %334, %334 : vector<2x8xf32>
      %345 = arith.mulf %343, %343 : vector<2x8xf32>
      %346 = arith.addf %344, %345 : vector<2x8xf32>
      %cst_82 = arith.constant dense<0.000000e+00> : vector<2x8xf32>
      %347 = tpu.matmul %334, %0, %cst_82 {dimension_numbers = #tpu.dot_dimension_numbers<[1], [0], [0], [1], [0, 0, 1, 1], [], []>, precision = #tpu.contract_precision<fp32>} : vector<2x8xf32>, vector<8x8xf32>, vector<2x8xf32> -> vector<2x8xf32>
      %348 = arith.mulf %3, %346 : vector<2x8xf32>
      %349 = arith.mulf %348, %343 : vector<2x8xf32>
      %350 = arith.addf %349, %347 : vector<2x8xf32>
      %cst_83 = arith.constant -1.72683911E-4 : f32
      %351 = vector.broadcast %cst_83 : f32 to vector<2x8xf32>
      %352 = arith.mulf %351, %350 : vector<2x8xf32>
      %353 = arith.addf %337, %352 : vector<2x8xf32>
      %cst_84 = arith.constant -2.03520322E-4 : f32
      %354 = vector.broadcast %cst_84 : f32 to vector<2x8xf32>
      %355 = arith.mulf %354, %350 : vector<2x8xf32>
      %356 = arith.addf %340, %355 : vector<2x8xf32>
      %357 = vector.extract_strided_slice %353 {offsets = [0, 4], sizes = [2, 4], strides = [1, 1]} : vector<2x8xf32> to vector<2x4xf32>
      %358 = vector.extract_strided_slice %353 {offsets = [0, 0], sizes = [2, 4], strides = [1, 1]} : vector<2x8xf32> to vector<2x4xf32>
      %359 = tpu.concatenate %357, %358 in 1 : vector<2x4xf32>, vector<2x4xf32> -> vector<2x8xf32>
      %360 = arith.mulf %353, %353 : vector<2x8xf32>
      %361 = arith.mulf %359, %359 : vector<2x8xf32>
      %362 = arith.addf %360, %361 : vector<2x8xf32>
      %cst_85 = arith.constant dense<0.000000e+00> : vector<2x8xf32>
      %363 = tpu.matmul %353, %0, %cst_85 {dimension_numbers = #tpu.dot_dimension_numbers<[1], [0], [0], [1], [0, 0, 1, 1], [], []>, precision = #tpu.contract_precision<fp32>} : vector<2x8xf32>, vector<8x8xf32>, vector<2x8xf32> -> vector<2x8xf32>
      %364 = arith.mulf %3, %362 : vector<2x8xf32>
      %365 = arith.mulf %364, %359 : vector<2x8xf32>
      %366 = arith.addf %365, %363 : vector<2x8xf32>
      %cst_86 = arith.constant 8.26719551E-5 : f32
      %367 = vector.broadcast %cst_86 : f32 to vector<2x8xf32>
      %368 = arith.mulf %367, %366 : vector<2x8xf32>
      %369 = arith.addf %356, %368 : vector<2x8xf32>
      %370 = vector.extract_strided_slice %369 {offsets = [0, 4], sizes = [2, 4], strides = [1, 1]} : vector<2x8xf32> to vector<2x4xf32>
      %371 = vector.extract_strided_slice %369 {offsets = [0, 0], sizes = [2, 4], strides = [1, 1]} : vector<2x8xf32> to vector<2x4xf32>
      %372 = tpu.concatenate %370, %371 in 1 : vector<2x4xf32>, vector<2x4xf32> -> vector<2x8xf32>
      %373 = arith.mulf %369, %369 : vector<2x8xf32>
      %374 = arith.mulf %372, %372 : vector<2x8xf32>
      %375 = arith.addf %373, %374 : vector<2x8xf32>
      %cst_87 = arith.constant dense<0.000000e+00> : vector<2x8xf32>
      %376 = tpu.matmul %369, %0, %cst_87 {dimension_numbers = #tpu.dot_dimension_numbers<[1], [0], [0], [1], [0, 0, 1, 1], [], []>, precision = #tpu.contract_precision<fp32>} : vector<2x8xf32>, vector<8x8xf32>, vector<2x8xf32> -> vector<2x8xf32>
      %377 = arith.mulf %3, %375 : vector<2x8xf32>
      %378 = arith.mulf %377, %372 : vector<2x8xf32>
      %379 = arith.addf %378, %376 : vector<2x8xf32>
      %cst_88 = arith.constant 1.26262632E-4 : f32
      %380 = vector.broadcast %cst_88 : f32 to vector<2x8xf32>
      %381 = arith.mulf %380, %379 : vector<2x8xf32>
      %382 = arith.addf %369, %381 : vector<2x8xf32>
      %cst_89 = arith.constant 4.73484833E-5 : f32
      %383 = vector.broadcast %cst_89 : f32 to vector<2x8xf32>
      %384 = arith.mulf %383, %379 : vector<2x8xf32>
      %385 = arith.addf %369, %384 : vector<2x8xf32>
      %cst_90 = arith.constant 6.172840e-04 : f32
      %386 = vector.broadcast %cst_90 : f32 to vector<2x8xf32>
      %387 = arith.mulf %386, %379 : vector<2x8xf32>
      %388 = arith.addf %369, %387 : vector<2x8xf32>
      %cst_91 = arith.constant 0.00186401431 : f32
      %389 = vector.broadcast %cst_91 : f32 to vector<2x8xf32>
      %390 = arith.mulf %389, %379 : vector<2x8xf32>
      %391 = arith.addf %369, %390 : vector<2x8xf32>
      %cst_92 = arith.constant 0.00179689098 : f32
      %392 = vector.broadcast %cst_92 : f32 to vector<2x8xf32>
      %393 = arith.mulf %392, %379 : vector<2x8xf32>
      %394 = arith.addf %369, %393 : vector<2x8xf32>
      %cst_93 = arith.constant 5.75415615E-5 : f32
      %395 = vector.broadcast %cst_93 : f32 to vector<2x8xf32>
      %396 = arith.mulf %395, %379 : vector<2x8xf32>
      %397 = arith.addf %369, %396 : vector<2x8xf32>
      %398 = vector.extract_strided_slice %382 {offsets = [0, 4], sizes = [2, 4], strides = [1, 1]} : vector<2x8xf32> to vector<2x4xf32>
      %399 = vector.extract_strided_slice %382 {offsets = [0, 0], sizes = [2, 4], strides = [1, 1]} : vector<2x8xf32> to vector<2x4xf32>
      %400 = tpu.concatenate %398, %399 in 1 : vector<2x4xf32>, vector<2x4xf32> -> vector<2x8xf32>
      %401 = arith.mulf %382, %382 : vector<2x8xf32>
      %402 = arith.mulf %400, %400 : vector<2x8xf32>
      %403 = arith.addf %401, %402 : vector<2x8xf32>
      %cst_94 = arith.constant dense<0.000000e+00> : vector<2x8xf32>
      %404 = tpu.matmul %382, %0, %cst_94 {dimension_numbers = #tpu.dot_dimension_numbers<[1], [0], [0], [1], [0, 0, 1, 1], [], []>, precision = #tpu.contract_precision<fp32>} : vector<2x8xf32>, vector<8x8xf32>, vector<2x8xf32> -> vector<2x8xf32>
      %405 = arith.mulf %3, %403 : vector<2x8xf32>
      %406 = arith.mulf %405, %400 : vector<2x8xf32>
      %407 = arith.addf %406, %404 : vector<2x8xf32>
      %cst_95 = arith.constant 1.4204545E-4 : f32
      %408 = vector.broadcast %cst_95 : f32 to vector<2x8xf32>
      %409 = arith.mulf %408, %407 : vector<2x8xf32>
      %410 = arith.addf %385, %409 : vector<2x8xf32>
      %cst_96 = arith.constant -0.00235690246 : f32
      %411 = vector.broadcast %cst_96 : f32 to vector<2x8xf32>
      %412 = arith.mulf %411, %407 : vector<2x8xf32>
      %413 = arith.addf %388, %412 : vector<2x8xf32>
      %cst_97 = arith.constant -0.00732057681 : f32
      %414 = vector.broadcast %cst_97 : f32 to vector<2x8xf32>
      %415 = arith.mulf %414, %407 : vector<2x8xf32>
      %416 = arith.addf %391, %415 : vector<2x8xf32>
      %cst_98 = arith.constant -0.00679139886 : f32
      %417 = vector.broadcast %cst_98 : f32 to vector<2x8xf32>
      %418 = arith.mulf %417, %407 : vector<2x8xf32>
      %419 = arith.addf %394, %418 : vector<2x8xf32>
      %420 = vector.extract_strided_slice %410 {offsets = [0, 4], sizes = [2, 4], strides = [1, 1]} : vector<2x8xf32> to vector<2x4xf32>
      %421 = vector.extract_strided_slice %410 {offsets = [0, 0], sizes = [2, 4], strides = [1, 1]} : vector<2x8xf32> to vector<2x4xf32>
      %422 = tpu.concatenate %420, %421 in 1 : vector<2x4xf32>, vector<2x4xf32> -> vector<2x8xf32>
      %423 = arith.mulf %410, %410 : vector<2x8xf32>
      %424 = arith.mulf %422, %422 : vector<2x8xf32>
      %425 = arith.addf %423, %424 : vector<2x8xf32>
      %cst_99 = arith.constant dense<0.000000e+00> : vector<2x8xf32>
      %426 = tpu.matmul %410, %0, %cst_99 {dimension_numbers = #tpu.dot_dimension_numbers<[1], [0], [0], [1], [0, 0, 1, 1], [], []>, precision = #tpu.contract_precision<fp32>} : vector<2x8xf32>, vector<8x8xf32>, vector<2x8xf32> -> vector<2x8xf32>
      %427 = arith.mulf %3, %425 : vector<2x8xf32>
      %428 = arith.mulf %427, %422 : vector<2x8xf32>
      %429 = arith.addf %428, %426 : vector<2x8xf32>
      %cst_100 = arith.constant 0.00224466901 : f32
      %430 = vector.broadcast %cst_100 : f32 to vector<2x8xf32>
      %431 = arith.mulf %430, %429 : vector<2x8xf32>
      %432 = arith.addf %413, %431 : vector<2x8xf32>
      %cst_101 = arith.constant 0.00620132125 : f32
      %433 = vector.broadcast %cst_101 : f32 to vector<2x8xf32>
      %434 = arith.mulf %433, %429 : vector<2x8xf32>
      %435 = arith.addf %416, %434 : vector<2x8xf32>
      %cst_102 = arith.constant 0.00562274177 : f32
      %436 = vector.broadcast %cst_102 : f32 to vector<2x8xf32>
      %437 = arith.mulf %436, %429 : vector<2x8xf32>
      %438 = arith.addf %419, %437 : vector<2x8xf32>
      %cst_103 = arith.constant 2.83608766E-4 : f32
      %439 = vector.broadcast %cst_103 : f32 to vector<2x8xf32>
      %440 = arith.mulf %439, %429 : vector<2x8xf32>
      %441 = arith.addf %397, %440 : vector<2x8xf32>
      %442 = vector.extract_strided_slice %432 {offsets = [0, 4], sizes = [2, 4], strides = [1, 1]} : vector<2x8xf32> to vector<2x4xf32>
      %443 = vector.extract_strided_slice %432 {offsets = [0, 0], sizes = [2, 4], strides = [1, 1]} : vector<2x8xf32> to vector<2x4xf32>
      %444 = tpu.concatenate %442, %443 in 1 : vector<2x4xf32>, vector<2x4xf32> -> vector<2x8xf32>
      %445 = arith.mulf %432, %432 : vector<2x8xf32>
      %446 = arith.mulf %444, %444 : vector<2x8xf32>
      %447 = arith.addf %445, %446 : vector<2x8xf32>
      %cst_104 = arith.constant dense<0.000000e+00> : vector<2x8xf32>
      %448 = tpu.matmul %432, %0, %cst_104 {dimension_numbers = #tpu.dot_dimension_numbers<[1], [0], [0], [1], [0, 0, 1, 1], [], []>, precision = #tpu.contract_precision<fp32>} : vector<2x8xf32>, vector<8x8xf32>, vector<2x8xf32> -> vector<2x8xf32>
      %449 = arith.mulf %3, %447 : vector<2x8xf32>
      %450 = arith.mulf %449, %444 : vector<2x8xf32>
      %451 = arith.addf %450, %448 : vector<2x8xf32>
      %cst_105 = arith.constant -1.8359175E-4 : f32
      %452 = vector.broadcast %cst_105 : f32 to vector<2x8xf32>
      %453 = arith.mulf %452, %451 : vector<2x8xf32>
      %454 = arith.addf %435, %453 : vector<2x8xf32>
      %cst_106 = arith.constant 1.75763314E-4 : f32
      %455 = vector.broadcast %cst_106 : f32 to vector<2x8xf32>
      %456 = arith.mulf %455, %451 : vector<2x8xf32>
      %457 = arith.addf %438, %456 : vector<2x8xf32>
      %cst_107 = arith.constant 4.11011162E-4 : f32
      %458 = vector.broadcast %cst_107 : f32 to vector<2x8xf32>
      %459 = arith.mulf %458, %451 : vector<2x8xf32>
      %460 = arith.addf %441, %459 : vector<2x8xf32>
      %461 = vector.extract_strided_slice %454 {offsets = [0, 4], sizes = [2, 4], strides = [1, 1]} : vector<2x8xf32> to vector<2x4xf32>
      %462 = vector.extract_strided_slice %454 {offsets = [0, 0], sizes = [2, 4], strides = [1, 1]} : vector<2x8xf32> to vector<2x4xf32>
      %463 = tpu.concatenate %461, %462 in 1 : vector<2x4xf32>, vector<2x4xf32> -> vector<2x8xf32>
      %464 = arith.mulf %454, %454 : vector<2x8xf32>
      %465 = arith.mulf %463, %463 : vector<2x8xf32>
      %466 = arith.addf %464, %465 : vector<2x8xf32>
      %cst_108 = arith.constant dense<0.000000e+00> : vector<2x8xf32>
      %467 = tpu.matmul %454, %0, %cst_108 {dimension_numbers = #tpu.dot_dimension_numbers<[1], [0], [0], [1], [0, 0, 1, 1], [], []>, precision = #tpu.contract_precision<fp32>} : vector<2x8xf32>, vector<8x8xf32>, vector<2x8xf32> -> vector<2x8xf32>
      %468 = arith.mulf %3, %466 : vector<2x8xf32>
      %469 = arith.mulf %468, %463 : vector<2x8xf32>
      %470 = arith.addf %469, %467 : vector<2x8xf32>
      %cst_109 = arith.constant -1.72683911E-4 : f32
      %471 = vector.broadcast %cst_109 : f32 to vector<2x8xf32>
      %472 = arith.mulf %471, %470 : vector<2x8xf32>
      %473 = arith.addf %457, %472 : vector<2x8xf32>
      %cst_110 = arith.constant -2.03520322E-4 : f32
      %474 = vector.broadcast %cst_110 : f32 to vector<2x8xf32>
      %475 = arith.mulf %474, %470 : vector<2x8xf32>
      %476 = arith.addf %460, %475 : vector<2x8xf32>
      %477 = vector.extract_strided_slice %473 {offsets = [0, 4], sizes = [2, 4], strides = [1, 1]} : vector<2x8xf32> to vector<2x4xf32>
      %478 = vector.extract_strided_slice %473 {offsets = [0, 0], sizes = [2, 4], strides = [1, 1]} : vector<2x8xf32> to vector<2x4xf32>
      %479 = tpu.concatenate %477, %478 in 1 : vector<2x4xf32>, vector<2x4xf32> -> vector<2x8xf32>
      %480 = arith.mulf %473, %473 : vector<2x8xf32>
      %481 = arith.mulf %479, %479 : vector<2x8xf32>
      %482 = arith.addf %480, %481 : vector<2x8xf32>
      %cst_111 = arith.constant dense<0.000000e+00> : vector<2x8xf32>
      %483 = tpu.matmul %473, %0, %cst_111 {dimension_numbers = #tpu.dot_dimension_numbers<[1], [0], [0], [1], [0, 0, 1, 1], [], []>, precision = #tpu.contract_precision<fp32>} : vector<2x8xf32>, vector<8x8xf32>, vector<2x8xf32> -> vector<2x8xf32>
      %484 = arith.mulf %3, %482 : vector<2x8xf32>
      %485 = arith.mulf %484, %479 : vector<2x8xf32>
      %486 = arith.addf %485, %483 : vector<2x8xf32>
      %cst_112 = arith.constant 8.26719551E-5 : f32
      %487 = vector.broadcast %cst_112 : f32 to vector<2x8xf32>
      %488 = arith.mulf %487, %486 : vector<2x8xf32>
      %489 = arith.addf %476, %488 : vector<2x8xf32>
      %490 = vector.extract_strided_slice %489 {offsets = [0, 4], sizes = [2, 4], strides = [1, 1]} : vector<2x8xf32> to vector<2x4xf32>
      %491 = vector.extract_strided_slice %489 {offsets = [0, 0], sizes = [2, 4], strides = [1, 1]} : vector<2x8xf32> to vector<2x4xf32>
      %492 = tpu.concatenate %490, %491 in 1 : vector<2x4xf32>, vector<2x4xf32> -> vector<2x8xf32>
      %493 = arith.mulf %489, %489 : vector<2x8xf32>
      %494 = arith.mulf %492, %492 : vector<2x8xf32>
      %495 = arith.addf %493, %494 : vector<2x8xf32>
      %cst_113 = arith.constant dense<0.000000e+00> : vector<2x8xf32>
      %496 = tpu.matmul %489, %0, %cst_113 {dimension_numbers = #tpu.dot_dimension_numbers<[1], [0], [0], [1], [0, 0, 1, 1], [], []>, precision = #tpu.contract_precision<fp32>} : vector<2x8xf32>, vector<8x8xf32>, vector<2x8xf32> -> vector<2x8xf32>
      %497 = arith.mulf %3, %495 : vector<2x8xf32>
      %498 = arith.mulf %497, %492 : vector<2x8xf32>
      %499 = arith.addf %498, %496 : vector<2x8xf32>
      %cst_114 = arith.constant 1.26262632E-4 : f32
      %500 = vector.broadcast %cst_114 : f32 to vector<2x8xf32>
      %501 = arith.mulf %500, %499 : vector<2x8xf32>
      %502 = arith.addf %489, %501 : vector<2x8xf32>
      %cst_115 = arith.constant 4.73484833E-5 : f32
      %503 = vector.broadcast %cst_115 : f32 to vector<2x8xf32>
      %504 = arith.mulf %503, %499 : vector<2x8xf32>
      %505 = arith.addf %489, %504 : vector<2x8xf32>
      %cst_116 = arith.constant 6.172840e-04 : f32
      %506 = vector.broadcast %cst_116 : f32 to vector<2x8xf32>
      %507 = arith.mulf %506, %499 : vector<2x8xf32>
      %508 = arith.addf %489, %507 : vector<2x8xf32>
      %cst_117 = arith.constant 0.00186401431 : f32
      %509 = vector.broadcast %cst_117 : f32 to vector<2x8xf32>
      %510 = arith.mulf %509, %499 : vector<2x8xf32>
      %511 = arith.addf %489, %510 : vector<2x8xf32>
      %cst_118 = arith.constant 0.00179689098 : f32
      %512 = vector.broadcast %cst_118 : f32 to vector<2x8xf32>
      %513 = arith.mulf %512, %499 : vector<2x8xf32>
      %514 = arith.addf %489, %513 : vector<2x8xf32>
      %cst_119 = arith.constant 5.75415615E-5 : f32
      %515 = vector.broadcast %cst_119 : f32 to vector<2x8xf32>
      %516 = arith.mulf %515, %499 : vector<2x8xf32>
      %517 = arith.addf %489, %516 : vector<2x8xf32>
      %518 = vector.extract_strided_slice %502 {offsets = [0, 4], sizes = [2, 4], strides = [1, 1]} : vector<2x8xf32> to vector<2x4xf32>
      %519 = vector.extract_strided_slice %502 {offsets = [0, 0], sizes = [2, 4], strides = [1, 1]} : vector<2x8xf32> to vector<2x4xf32>
      %520 = tpu.concatenate %518, %519 in 1 : vector<2x4xf32>, vector<2x4xf32> -> vector<2x8xf32>
      %521 = arith.mulf %502, %502 : vector<2x8xf32>
      %522 = arith.mulf %520, %520 : vector<2x8xf32>
      %523 = arith.addf %521, %522 : vector<2x8xf32>
      %cst_120 = arith.constant dense<0.000000e+00> : vector<2x8xf32>
      %524 = tpu.matmul %502, %0, %cst_120 {dimension_numbers = #tpu.dot_dimension_numbers<[1], [0], [0], [1], [0, 0, 1, 1], [], []>, precision = #tpu.contract_precision<fp32>} : vector<2x8xf32>, vector<8x8xf32>, vector<2x8xf32> -> vector<2x8xf32>
      %525 = arith.mulf %3, %523 : vector<2x8xf32>
      %526 = arith.mulf %525, %520 : vector<2x8xf32>
      %527 = arith.addf %526, %524 : vector<2x8xf32>
      %cst_121 = arith.constant 1.4204545E-4 : f32
      %528 = vector.broadcast %cst_121 : f32 to vector<2x8xf32>
      %529 = arith.mulf %528, %527 : vector<2x8xf32>
      %530 = arith.addf %505, %529 : vector<2x8xf32>
      %cst_122 = arith.constant -0.00235690246 : f32
      %531 = vector.broadcast %cst_122 : f32 to vector<2x8xf32>
      %532 = arith.mulf %531, %527 : vector<2x8xf32>
      %533 = arith.addf %508, %532 : vector<2x8xf32>
      %cst_123 = arith.constant -0.00732057681 : f32
      %534 = vector.broadcast %cst_123 : f32 to vector<2x8xf32>
      %535 = arith.mulf %534, %527 : vector<2x8xf32>
      %536 = arith.addf %511, %535 : vector<2x8xf32>
      %cst_124 = arith.constant -0.00679139886 : f32
      %537 = vector.broadcast %cst_124 : f32 to vector<2x8xf32>
      %538 = arith.mulf %537, %527 : vector<2x8xf32>
      %539 = arith.addf %514, %538 : vector<2x8xf32>
      %540 = vector.extract_strided_slice %530 {offsets = [0, 4], sizes = [2, 4], strides = [1, 1]} : vector<2x8xf32> to vector<2x4xf32>
      %541 = vector.extract_strided_slice %530 {offsets = [0, 0], sizes = [2, 4], strides = [1, 1]} : vector<2x8xf32> to vector<2x4xf32>
      %542 = tpu.concatenate %540, %541 in 1 : vector<2x4xf32>, vector<2x4xf32> -> vector<2x8xf32>
      %543 = arith.mulf %530, %530 : vector<2x8xf32>
      %544 = arith.mulf %542, %542 : vector<2x8xf32>
      %545 = arith.addf %543, %544 : vector<2x8xf32>
      %cst_125 = arith.constant dense<0.000000e+00> : vector<2x8xf32>
      %546 = tpu.matmul %530, %0, %cst_125 {dimension_numbers = #tpu.dot_dimension_numbers<[1], [0], [0], [1], [0, 0, 1, 1], [], []>, precision = #tpu.contract_precision<fp32>} : vector<2x8xf32>, vector<8x8xf32>, vector<2x8xf32> -> vector<2x8xf32>
      %547 = arith.mulf %3, %545 : vector<2x8xf32>
      %548 = arith.mulf %547, %542 : vector<2x8xf32>
      %549 = arith.addf %548, %546 : vector<2x8xf32>
      %cst_126 = arith.constant 0.00224466901 : f32
      %550 = vector.broadcast %cst_126 : f32 to vector<2x8xf32>
      %551 = arith.mulf %550, %549 : vector<2x8xf32>
      %552 = arith.addf %533, %551 : vector<2x8xf32>
      %cst_127 = arith.constant 0.00620132125 : f32
      %553 = vector.broadcast %cst_127 : f32 to vector<2x8xf32>
      %554 = arith.mulf %553, %549 : vector<2x8xf32>
      %555 = arith.addf %536, %554 : vector<2x8xf32>
      %cst_128 = arith.constant 0.00562274177 : f32
      %556 = vector.broadcast %cst_128 : f32 to vector<2x8xf32>
      %557 = arith.mulf %556, %549 : vector<2x8xf32>
      %558 = arith.addf %539, %557 : vector<2x8xf32>
      %cst_129 = arith.constant 2.83608766E-4 : f32
      %559 = vector.broadcast %cst_129 : f32 to vector<2x8xf32>
      %560 = arith.mulf %559, %549 : vector<2x8xf32>
      %561 = arith.addf %517, %560 : vector<2x8xf32>
      %562 = vector.extract_strided_slice %552 {offsets = [0, 4], sizes = [2, 4], strides = [1, 1]} : vector<2x8xf32> to vector<2x4xf32>
      %563 = vector.extract_strided_slice %552 {offsets = [0, 0], sizes = [2, 4], strides = [1, 1]} : vector<2x8xf32> to vector<2x4xf32>
      %564 = tpu.concatenate %562, %563 in 1 : vector<2x4xf32>, vector<2x4xf32> -> vector<2x8xf32>
      %565 = arith.mulf %552, %552 : vector<2x8xf32>
      %566 = arith.mulf %564, %564 : vector<2x8xf32>
      %567 = arith.addf %565, %566 : vector<2x8xf32>
      %cst_130 = arith.constant dense<0.000000e+00> : vector<2x8xf32>
      %568 = tpu.matmul %552, %0, %cst_130 {dimension_numbers = #tpu.dot_dimension_numbers<[1], [0], [0], [1], [0, 0, 1, 1], [], []>, precision = #tpu.contract_precision<fp32>} : vector<2x8xf32>, vector<8x8xf32>, vector<2x8xf32> -> vector<2x8xf32>
      %569 = arith.mulf %3, %567 : vector<2x8xf32>
      %570 = arith.mulf %569, %564 : vector<2x8xf32>
      %571 = arith.addf %570, %568 : vector<2x8xf32>
      %cst_131 = arith.constant -1.8359175E-4 : f32
      %572 = vector.broadcast %cst_131 : f32 to vector<2x8xf32>
      %573 = arith.mulf %572, %571 : vector<2x8xf32>
      %574 = arith.addf %555, %573 : vector<2x8xf32>
      %cst_132 = arith.constant 1.75763314E-4 : f32
      %575 = vector.broadcast %cst_132 : f32 to vector<2x8xf32>
      %576 = arith.mulf %575, %571 : vector<2x8xf32>
      %577 = arith.addf %558, %576 : vector<2x8xf32>
      %cst_133 = arith.constant 4.11011162E-4 : f32
      %578 = vector.broadcast %cst_133 : f32 to vector<2x8xf32>
      %579 = arith.mulf %578, %571 : vector<2x8xf32>
      %580 = arith.addf %561, %579 : vector<2x8xf32>
      %581 = vector.extract_strided_slice %574 {offsets = [0, 4], sizes = [2, 4], strides = [1, 1]} : vector<2x8xf32> to vector<2x4xf32>
      %582 = vector.extract_strided_slice %574 {offsets = [0, 0], sizes = [2, 4], strides = [1, 1]} : vector<2x8xf32> to vector<2x4xf32>
      %583 = tpu.concatenate %581, %582 in 1 : vector<2x4xf32>, vector<2x4xf32> -> vector<2x8xf32>
      %584 = arith.mulf %574, %574 : vector<2x8xf32>
      %585 = arith.mulf %583, %583 : vector<2x8xf32>
      %586 = arith.addf %584, %585 : vector<2x8xf32>
      %cst_134 = arith.constant dense<0.000000e+00> : vector<2x8xf32>
      %587 = tpu.matmul %574, %0, %cst_134 {dimension_numbers = #tpu.dot_dimension_numbers<[1], [0], [0], [1], [0, 0, 1, 1], [], []>, precision = #tpu.contract_precision<fp32>} : vector<2x8xf32>, vector<8x8xf32>, vector<2x8xf32> -> vector<2x8xf32>
      %588 = arith.mulf %3, %586 : vector<2x8xf32>
      %589 = arith.mulf %588, %583 : vector<2x8xf32>
      %590 = arith.addf %589, %587 : vector<2x8xf32>
      %cst_135 = arith.constant -1.72683911E-4 : f32
      %591 = vector.broadcast %cst_135 : f32 to vector<2x8xf32>
      %592 = arith.mulf %591, %590 : vector<2x8xf32>
      %593 = arith.addf %577, %592 : vector<2x8xf32>
      %cst_136 = arith.constant -2.03520322E-4 : f32
      %594 = vector.broadcast %cst_136 : f32 to vector<2x8xf32>
      %595 = arith.mulf %594, %590 : vector<2x8xf32>
      %596 = arith.addf %580, %595 : vector<2x8xf32>
      %597 = vector.extract_strided_slice %593 {offsets = [0, 4], sizes = [2, 4], strides = [1, 1]} : vector<2x8xf32> to vector<2x4xf32>
      %598 = vector.extract_strided_slice %593 {offsets = [0, 0], sizes = [2, 4], strides = [1, 1]} : vector<2x8xf32> to vector<2x4xf32>
      %599 = tpu.concatenate %597, %598 in 1 : vector<2x4xf32>, vector<2x4xf32> -> vector<2x8xf32>
      %600 = arith.mulf %593, %593 : vector<2x8xf32>
      %601 = arith.mulf %599, %599 : vector<2x8xf32>
      %602 = arith.addf %600, %601 : vector<2x8xf32>
      %cst_137 = arith.constant dense<0.000000e+00> : vector<2x8xf32>
      %603 = tpu.matmul %593, %0, %cst_137 {dimension_numbers = #tpu.dot_dimension_numbers<[1], [0], [0], [1], [0, 0, 1, 1], [], []>, precision = #tpu.contract_precision<fp32>} : vector<2x8xf32>, vector<8x8xf32>, vector<2x8xf32> -> vector<2x8xf32>
      %604 = arith.mulf %3, %602 : vector<2x8xf32>
      %605 = arith.mulf %604, %599 : vector<2x8xf32>
      %606 = arith.addf %605, %603 : vector<2x8xf32>
      %cst_138 = arith.constant 8.26719551E-5 : f32
      %607 = vector.broadcast %cst_138 : f32 to vector<2x8xf32>
      %608 = arith.mulf %607, %606 : vector<2x8xf32>
      %609 = arith.addf %596, %608 : vector<2x8xf32>
      %610 = vector.extract_strided_slice %609 {offsets = [0, 4], sizes = [2, 4], strides = [1, 1]} : vector<2x8xf32> to vector<2x4xf32>
      %611 = vector.extract_strided_slice %609 {offsets = [0, 0], sizes = [2, 4], strides = [1, 1]} : vector<2x8xf32> to vector<2x4xf32>
      %612 = tpu.concatenate %610, %611 in 1 : vector<2x4xf32>, vector<2x4xf32> -> vector<2x8xf32>
      %613 = arith.mulf %609, %609 : vector<2x8xf32>
      %614 = arith.mulf %612, %612 : vector<2x8xf32>
      %615 = arith.addf %613, %614 : vector<2x8xf32>
      %cst_139 = arith.constant dense<0.000000e+00> : vector<2x8xf32>
      %616 = tpu.matmul %609, %0, %cst_139 {dimension_numbers = #tpu.dot_dimension_numbers<[1], [0], [0], [1], [0, 0, 1, 1], [], []>, precision = #tpu.contract_precision<fp32>} : vector<2x8xf32>, vector<8x8xf32>, vector<2x8xf32> -> vector<2x8xf32>
      %617 = arith.mulf %3, %615 : vector<2x8xf32>
      %618 = arith.mulf %617, %612 : vector<2x8xf32>
      %619 = arith.addf %618, %616 : vector<2x8xf32>
      %cst_140 = arith.constant 1.26262632E-4 : f32
      %620 = vector.broadcast %cst_140 : f32 to vector<2x8xf32>
      %621 = arith.mulf %620, %619 : vector<2x8xf32>
      %622 = arith.addf %609, %621 : vector<2x8xf32>
      %cst_141 = arith.constant 4.73484833E-5 : f32
      %623 = vector.broadcast %cst_141 : f32 to vector<2x8xf32>
      %624 = arith.mulf %623, %619 : vector<2x8xf32>
      %625 = arith.addf %609, %624 : vector<2x8xf32>
      %cst_142 = arith.constant 6.172840e-04 : f32
      %626 = vector.broadcast %cst_142 : f32 to vector<2x8xf32>
      %627 = arith.mulf %626, %619 : vector<2x8xf32>
      %628 = arith.addf %609, %627 : vector<2x8xf32>
      %cst_143 = arith.constant 0.00186401431 : f32
      %629 = vector.broadcast %cst_143 : f32 to vector<2x8xf32>
      %630 = arith.mulf %629, %619 : vector<2x8xf32>
      %631 = arith.addf %609, %630 : vector<2x8xf32>
      %cst_144 = arith.constant 0.00179689098 : f32
      %632 = vector.broadcast %cst_144 : f32 to vector<2x8xf32>
      %633 = arith.mulf %632, %619 : vector<2x8xf32>
      %634 = arith.addf %609, %633 : vector<2x8xf32>
      %cst_145 = arith.constant 5.75415615E-5 : f32
      %635 = vector.broadcast %cst_145 : f32 to vector<2x8xf32>
      %636 = arith.mulf %635, %619 : vector<2x8xf32>
      %637 = arith.addf %609, %636 : vector<2x8xf32>
      %638 = vector.extract_strided_slice %622 {offsets = [0, 4], sizes = [2, 4], strides = [1, 1]} : vector<2x8xf32> to vector<2x4xf32>
      %639 = vector.extract_strided_slice %622 {offsets = [0, 0], sizes = [2, 4], strides = [1, 1]} : vector<2x8xf32> to vector<2x4xf32>
      %640 = tpu.concatenate %638, %639 in 1 : vector<2x4xf32>, vector<2x4xf32> -> vector<2x8xf32>
      %641 = arith.mulf %622, %622 : vector<2x8xf32>
      %642 = arith.mulf %640, %640 : vector<2x8xf32>
      %643 = arith.addf %641, %642 : vector<2x8xf32>
      %cst_146 = arith.constant dense<0.000000e+00> : vector<2x8xf32>
      %644 = tpu.matmul %622, %0, %cst_146 {dimension_numbers = #tpu.dot_dimension_numbers<[1], [0], [0], [1], [0, 0, 1, 1], [], []>, precision = #tpu.contract_precision<fp32>} : vector<2x8xf32>, vector<8x8xf32>, vector<2x8xf32> -> vector<2x8xf32>
      %645 = arith.mulf %3, %643 : vector<2x8xf32>
      %646 = arith.mulf %645, %640 : vector<2x8xf32>
      %647 = arith.addf %646, %644 : vector<2x8xf32>
      %cst_147 = arith.constant 1.4204545E-4 : f32
      %648 = vector.broadcast %cst_147 : f32 to vector<2x8xf32>
      %649 = arith.mulf %648, %647 : vector<2x8xf32>
      %650 = arith.addf %625, %649 : vector<2x8xf32>
      %cst_148 = arith.constant -0.00235690246 : f32
      %651 = vector.broadcast %cst_148 : f32 to vector<2x8xf32>
      %652 = arith.mulf %651, %647 : vector<2x8xf32>
      %653 = arith.addf %628, %652 : vector<2x8xf32>
      %cst_149 = arith.constant -0.00732057681 : f32
      %654 = vector.broadcast %cst_149 : f32 to vector<2x8xf32>
      %655 = arith.mulf %654, %647 : vector<2x8xf32>
      %656 = arith.addf %631, %655 : vector<2x8xf32>
      %cst_150 = arith.constant -0.00679139886 : f32
      %657 = vector.broadcast %cst_150 : f32 to vector<2x8xf32>
      %658 = arith.mulf %657, %647 : vector<2x8xf32>
      %659 = arith.addf %634, %658 : vector<2x8xf32>
      %660 = vector.extract_strided_slice %650 {offsets = [0, 4], sizes = [2, 4], strides = [1, 1]} : vector<2x8xf32> to vector<2x4xf32>
      %661 = vector.extract_strided_slice %650 {offsets = [0, 0], sizes = [2, 4], strides = [1, 1]} : vector<2x8xf32> to vector<2x4xf32>
      %662 = tpu.concatenate %660, %661 in 1 : vector<2x4xf32>, vector<2x4xf32> -> vector<2x8xf32>
      %663 = arith.mulf %650, %650 : vector<2x8xf32>
      %664 = arith.mulf %662, %662 : vector<2x8xf32>
      %665 = arith.addf %663, %664 : vector<2x8xf32>
      %cst_151 = arith.constant dense<0.000000e+00> : vector<2x8xf32>
      %666 = tpu.matmul %650, %0, %cst_151 {dimension_numbers = #tpu.dot_dimension_numbers<[1], [0], [0], [1], [0, 0, 1, 1], [], []>, precision = #tpu.contract_precision<fp32>} : vector<2x8xf32>, vector<8x8xf32>, vector<2x8xf32> -> vector<2x8xf32>
      %667 = arith.mulf %3, %665 : vector<2x8xf32>
      %668 = arith.mulf %667, %662 : vector<2x8xf32>
      %669 = arith.addf %668, %666 : vector<2x8xf32>
      %cst_152 = arith.constant 0.00224466901 : f32
      %670 = vector.broadcast %cst_152 : f32 to vector<2x8xf32>
      %671 = arith.mulf %670, %669 : vector<2x8xf32>
      %672 = arith.addf %653, %671 : vector<2x8xf32>
      %cst_153 = arith.constant 0.00620132125 : f32
      %673 = vector.broadcast %cst_153 : f32 to vector<2x8xf32>
      %674 = arith.mulf %673, %669 : vector<2x8xf32>
      %675 = arith.addf %656, %674 : vector<2x8xf32>
      %cst_154 = arith.constant 0.00562274177 : f32
      %676 = vector.broadcast %cst_154 : f32 to vector<2x8xf32>
      %677 = arith.mulf %676, %669 : vector<2x8xf32>
      %678 = arith.addf %659, %677 : vector<2x8xf32>
      %cst_155 = arith.constant 2.83608766E-4 : f32
      %679 = vector.broadcast %cst_155 : f32 to vector<2x8xf32>
      %680 = arith.mulf %679, %669 : vector<2x8xf32>
      %681 = arith.addf %637, %680 : vector<2x8xf32>
      %682 = vector.extract_strided_slice %672 {offsets = [0, 4], sizes = [2, 4], strides = [1, 1]} : vector<2x8xf32> to vector<2x4xf32>
      %683 = vector.extract_strided_slice %672 {offsets = [0, 0], sizes = [2, 4], strides = [1, 1]} : vector<2x8xf32> to vector<2x4xf32>
      %684 = tpu.concatenate %682, %683 in 1 : vector<2x4xf32>, vector<2x4xf32> -> vector<2x8xf32>
      %685 = arith.mulf %672, %672 : vector<2x8xf32>
      %686 = arith.mulf %684, %684 : vector<2x8xf32>
      %687 = arith.addf %685, %686 : vector<2x8xf32>
      %cst_156 = arith.constant dense<0.000000e+00> : vector<2x8xf32>
      %688 = tpu.matmul %672, %0, %cst_156 {dimension_numbers = #tpu.dot_dimension_numbers<[1], [0], [0], [1], [0, 0, 1, 1], [], []>, precision = #tpu.contract_precision<fp32>} : vector<2x8xf32>, vector<8x8xf32>, vector<2x8xf32> -> vector<2x8xf32>
      %689 = arith.mulf %3, %687 : vector<2x8xf32>
      %690 = arith.mulf %689, %684 : vector<2x8xf32>
      %691 = arith.addf %690, %688 : vector<2x8xf32>
      %cst_157 = arith.constant -1.8359175E-4 : f32
      %692 = vector.broadcast %cst_157 : f32 to vector<2x8xf32>
      %693 = arith.mulf %692, %691 : vector<2x8xf32>
      %694 = arith.addf %675, %693 : vector<2x8xf32>
      %cst_158 = arith.constant 1.75763314E-4 : f32
      %695 = vector.broadcast %cst_158 : f32 to vector<2x8xf32>
      %696 = arith.mulf %695, %691 : vector<2x8xf32>
      %697 = arith.addf %678, %696 : vector<2x8xf32>
      %cst_159 = arith.constant 4.11011162E-4 : f32
      %698 = vector.broadcast %cst_159 : f32 to vector<2x8xf32>
      %699 = arith.mulf %698, %691 : vector<2x8xf32>
      %700 = arith.addf %681, %699 : vector<2x8xf32>
      %701 = vector.extract_strided_slice %694 {offsets = [0, 4], sizes = [2, 4], strides = [1, 1]} : vector<2x8xf32> to vector<2x4xf32>
      %702 = vector.extract_strided_slice %694 {offsets = [0, 0], sizes = [2, 4], strides = [1, 1]} : vector<2x8xf32> to vector<2x4xf32>
      %703 = tpu.concatenate %701, %702 in 1 : vector<2x4xf32>, vector<2x4xf32> -> vector<2x8xf32>
      %704 = arith.mulf %694, %694 : vector<2x8xf32>
      %705 = arith.mulf %703, %703 : vector<2x8xf32>
      %706 = arith.addf %704, %705 : vector<2x8xf32>
      %cst_160 = arith.constant dense<0.000000e+00> : vector<2x8xf32>
      %707 = tpu.matmul %694, %0, %cst_160 {dimension_numbers = #tpu.dot_dimension_numbers<[1], [0], [0], [1], [0, 0, 1, 1], [], []>, precision = #tpu.contract_precision<fp32>} : vector<2x8xf32>, vector<8x8xf32>, vector<2x8xf32> -> vector<2x8xf32>
      %708 = arith.mulf %3, %706 : vector<2x8xf32>
      %709 = arith.mulf %708, %703 : vector<2x8xf32>
      %710 = arith.addf %709, %707 : vector<2x8xf32>
      %cst_161 = arith.constant -1.72683911E-4 : f32
      %711 = vector.broadcast %cst_161 : f32 to vector<2x8xf32>
      %712 = arith.mulf %711, %710 : vector<2x8xf32>
      %713 = arith.addf %697, %712 : vector<2x8xf32>
      %cst_162 = arith.constant -2.03520322E-4 : f32
      %714 = vector.broadcast %cst_162 : f32 to vector<2x8xf32>
      %715 = arith.mulf %714, %710 : vector<2x8xf32>
      %716 = arith.addf %700, %715 : vector<2x8xf32>
      %717 = vector.extract_strided_slice %713 {offsets = [0, 4], sizes = [2, 4], strides = [1, 1]} : vector<2x8xf32> to vector<2x4xf32>
      %718 = vector.extract_strided_slice %713 {offsets = [0, 0], sizes = [2, 4], strides = [1, 1]} : vector<2x8xf32> to vector<2x4xf32>
      %719 = tpu.concatenate %717, %718 in 1 : vector<2x4xf32>, vector<2x4xf32> -> vector<2x8xf32>
      %720 = arith.mulf %713, %713 : vector<2x8xf32>
      %721 = arith.mulf %719, %719 : vector<2x8xf32>
      %722 = arith.addf %720, %721 : vector<2x8xf32>
      %cst_163 = arith.constant dense<0.000000e+00> : vector<2x8xf32>
      %723 = tpu.matmul %713, %0, %cst_163 {dimension_numbers = #tpu.dot_dimension_numbers<[1], [0], [0], [1], [0, 0, 1, 1], [], []>, precision = #tpu.contract_precision<fp32>} : vector<2x8xf32>, vector<8x8xf32>, vector<2x8xf32> -> vector<2x8xf32>
      %724 = arith.mulf %3, %722 : vector<2x8xf32>
      %725 = arith.mulf %724, %719 : vector<2x8xf32>
      %726 = arith.addf %725, %723 : vector<2x8xf32>
      %cst_164 = arith.constant 8.26719551E-5 : f32
      %727 = vector.broadcast %cst_164 : f32 to vector<2x8xf32>
      %728 = arith.mulf %727, %726 : vector<2x8xf32>
      %729 = arith.addf %716, %728 : vector<2x8xf32>
      %730 = vector.extract_strided_slice %729 {offsets = [0, 4], sizes = [2, 4], strides = [1, 1]} : vector<2x8xf32> to vector<2x4xf32>
      %731 = vector.extract_strided_slice %729 {offsets = [0, 0], sizes = [2, 4], strides = [1, 1]} : vector<2x8xf32> to vector<2x4xf32>
      %732 = tpu.concatenate %730, %731 in 1 : vector<2x4xf32>, vector<2x4xf32> -> vector<2x8xf32>
      %733 = arith.mulf %729, %729 : vector<2x8xf32>
      %734 = arith.mulf %732, %732 : vector<2x8xf32>
      %735 = arith.addf %733, %734 : vector<2x8xf32>
      %cst_165 = arith.constant dense<0.000000e+00> : vector<2x8xf32>
      %736 = tpu.matmul %729, %0, %cst_165 {dimension_numbers = #tpu.dot_dimension_numbers<[1], [0], [0], [1], [0, 0, 1, 1], [], []>, precision = #tpu.contract_precision<fp32>} : vector<2x8xf32>, vector<8x8xf32>, vector<2x8xf32> -> vector<2x8xf32>
      %737 = arith.mulf %3, %735 : vector<2x8xf32>
      %738 = arith.mulf %737, %732 : vector<2x8xf32>
      %739 = arith.addf %738, %736 : vector<2x8xf32>
      %cst_166 = arith.constant 1.26262632E-4 : f32
      %740 = vector.broadcast %cst_166 : f32 to vector<2x8xf32>
      %741 = arith.mulf %740, %739 : vector<2x8xf32>
      %742 = arith.addf %729, %741 : vector<2x8xf32>
      %cst_167 = arith.constant 4.73484833E-5 : f32
      %743 = vector.broadcast %cst_167 : f32 to vector<2x8xf32>
      %744 = arith.mulf %743, %739 : vector<2x8xf32>
      %745 = arith.addf %729, %744 : vector<2x8xf32>
      %cst_168 = arith.constant 6.172840e-04 : f32
      %746 = vector.broadcast %cst_168 : f32 to vector<2x8xf32>
      %747 = arith.mulf %746, %739 : vector<2x8xf32>
      %748 = arith.addf %729, %747 : vector<2x8xf32>
      %cst_169 = arith.constant 0.00186401431 : f32
      %749 = vector.broadcast %cst_169 : f32 to vector<2x8xf32>
      %750 = arith.mulf %749, %739 : vector<2x8xf32>
      %751 = arith.addf %729, %750 : vector<2x8xf32>
      %cst_170 = arith.constant 0.00179689098 : f32
      %752 = vector.broadcast %cst_170 : f32 to vector<2x8xf32>
      %753 = arith.mulf %752, %739 : vector<2x8xf32>
      %754 = arith.addf %729, %753 : vector<2x8xf32>
      %cst_171 = arith.constant 5.75415615E-5 : f32
      %755 = vector.broadcast %cst_171 : f32 to vector<2x8xf32>
      %756 = arith.mulf %755, %739 : vector<2x8xf32>
      %757 = arith.addf %729, %756 : vector<2x8xf32>
      %758 = vector.extract_strided_slice %742 {offsets = [0, 4], sizes = [2, 4], strides = [1, 1]} : vector<2x8xf32> to vector<2x4xf32>
      %759 = vector.extract_strided_slice %742 {offsets = [0, 0], sizes = [2, 4], strides = [1, 1]} : vector<2x8xf32> to vector<2x4xf32>
      %760 = tpu.concatenate %758, %759 in 1 : vector<2x4xf32>, vector<2x4xf32> -> vector<2x8xf32>
      %761 = arith.mulf %742, %742 : vector<2x8xf32>
      %762 = arith.mulf %760, %760 : vector<2x8xf32>
      %763 = arith.addf %761, %762 : vector<2x8xf32>
      %cst_172 = arith.constant dense<0.000000e+00> : vector<2x8xf32>
      %764 = tpu.matmul %742, %0, %cst_172 {dimension_numbers = #tpu.dot_dimension_numbers<[1], [0], [0], [1], [0, 0, 1, 1], [], []>, precision = #tpu.contract_precision<fp32>} : vector<2x8xf32>, vector<8x8xf32>, vector<2x8xf32> -> vector<2x8xf32>
      %765 = arith.mulf %3, %763 : vector<2x8xf32>
      %766 = arith.mulf %765, %760 : vector<2x8xf32>
      %767 = arith.addf %766, %764 : vector<2x8xf32>
      %cst_173 = arith.constant 1.4204545E-4 : f32
      %768 = vector.broadcast %cst_173 : f32 to vector<2x8xf32>
      %769 = arith.mulf %768, %767 : vector<2x8xf32>
      %770 = arith.addf %745, %769 : vector<2x8xf32>
      %cst_174 = arith.constant -0.00235690246 : f32
      %771 = vector.broadcast %cst_174 : f32 to vector<2x8xf32>
      %772 = arith.mulf %771, %767 : vector<2x8xf32>
      %773 = arith.addf %748, %772 : vector<2x8xf32>
      %cst_175 = arith.constant -0.00732057681 : f32
      %774 = vector.broadcast %cst_175 : f32 to vector<2x8xf32>
      %775 = arith.mulf %774, %767 : vector<2x8xf32>
      %776 = arith.addf %751, %775 : vector<2x8xf32>
      %cst_176 = arith.constant -0.00679139886 : f32
      %777 = vector.broadcast %cst_176 : f32 to vector<2x8xf32>
      %778 = arith.mulf %777, %767 : vector<2x8xf32>
      %779 = arith.addf %754, %778 : vector<2x8xf32>
      %780 = vector.extract_strided_slice %770 {offsets = [0, 4], sizes = [2, 4], strides = [1, 1]} : vector<2x8xf32> to vector<2x4xf32>
      %781 = vector.extract_strided_slice %770 {offsets = [0, 0], sizes = [2, 4], strides = [1, 1]} : vector<2x8xf32> to vector<2x4xf32>
      %782 = tpu.concatenate %780, %781 in 1 : vector<2x4xf32>, vector<2x4xf32> -> vector<2x8xf32>
      %783 = arith.mulf %770, %770 : vector<2x8xf32>
      %784 = arith.mulf %782, %782 : vector<2x8xf32>
      %785 = arith.addf %783, %784 : vector<2x8xf32>
      %cst_177 = arith.constant dense<0.000000e+00> : vector<2x8xf32>
      %786 = tpu.matmul %770, %0, %cst_177 {dimension_numbers = #tpu.dot_dimension_numbers<[1], [0], [0], [1], [0, 0, 1, 1], [], []>, precision = #tpu.contract_precision<fp32>} : vector<2x8xf32>, vector<8x8xf32>, vector<2x8xf32> -> vector<2x8xf32>
      %787 = arith.mulf %3, %785 : vector<2x8xf32>
      %788 = arith.mulf %787, %782 : vector<2x8xf32>
      %789 = arith.addf %788, %786 : vector<2x8xf32>
      %cst_178 = arith.constant 0.00224466901 : f32
      %790 = vector.broadcast %cst_178 : f32 to vector<2x8xf32>
      %791 = arith.mulf %790, %789 : vector<2x8xf32>
      %792 = arith.addf %773, %791 : vector<2x8xf32>
      %cst_179 = arith.constant 0.00620132125 : f32
      %793 = vector.broadcast %cst_179 : f32 to vector<2x8xf32>
      %794 = arith.mulf %793, %789 : vector<2x8xf32>
      %795 = arith.addf %776, %794 : vector<2x8xf32>
      %cst_180 = arith.constant 0.00562274177 : f32
      %796 = vector.broadcast %cst_180 : f32 to vector<2x8xf32>
      %797 = arith.mulf %796, %789 : vector<2x8xf32>
      %798 = arith.addf %779, %797 : vector<2x8xf32>
      %cst_181 = arith.constant 2.83608766E-4 : f32
      %799 = vector.broadcast %cst_181 : f32 to vector<2x8xf32>
      %800 = arith.mulf %799, %789 : vector<2x8xf32>
      %801 = arith.addf %757, %800 : vector<2x8xf32>
      %802 = vector.extract_strided_slice %792 {offsets = [0, 4], sizes = [2, 4], strides = [1, 1]} : vector<2x8xf32> to vector<2x4xf32>
      %803 = vector.extract_strided_slice %792 {offsets = [0, 0], sizes = [2, 4], strides = [1, 1]} : vector<2x8xf32> to vector<2x4xf32>
      %804 = tpu.concatenate %802, %803 in 1 : vector<2x4xf32>, vector<2x4xf32> -> vector<2x8xf32>
      %805 = arith.mulf %792, %792 : vector<2x8xf32>
      %806 = arith.mulf %804, %804 : vector<2x8xf32>
      %807 = arith.addf %805, %806 : vector<2x8xf32>
      %cst_182 = arith.constant dense<0.000000e+00> : vector<2x8xf32>
      %808 = tpu.matmul %792, %0, %cst_182 {dimension_numbers = #tpu.dot_dimension_numbers<[1], [0], [0], [1], [0, 0, 1, 1], [], []>, precision = #tpu.contract_precision<fp32>} : vector<2x8xf32>, vector<8x8xf32>, vector<2x8xf32> -> vector<2x8xf32>
      %809 = arith.mulf %3, %807 : vector<2x8xf32>
      %810 = arith.mulf %809, %804 : vector<2x8xf32>
      %811 = arith.addf %810, %808 : vector<2x8xf32>
      %cst_183 = arith.constant -1.8359175E-4 : f32
      %812 = vector.broadcast %cst_183 : f32 to vector<2x8xf32>
      %813 = arith.mulf %812, %811 : vector<2x8xf32>
      %814 = arith.addf %795, %813 : vector<2x8xf32>
      %cst_184 = arith.constant 1.75763314E-4 : f32
      %815 = vector.broadcast %cst_184 : f32 to vector<2x8xf32>
      %816 = arith.mulf %815, %811 : vector<2x8xf32>
      %817 = arith.addf %798, %816 : vector<2x8xf32>
      %cst_185 = arith.constant 4.11011162E-4 : f32
      %818 = vector.broadcast %cst_185 : f32 to vector<2x8xf32>
      %819 = arith.mulf %818, %811 : vector<2x8xf32>
      %820 = arith.addf %801, %819 : vector<2x8xf32>
      %821 = vector.extract_strided_slice %814 {offsets = [0, 4], sizes = [2, 4], strides = [1, 1]} : vector<2x8xf32> to vector<2x4xf32>
      %822 = vector.extract_strided_slice %814 {offsets = [0, 0], sizes = [2, 4], strides = [1, 1]} : vector<2x8xf32> to vector<2x4xf32>
      %823 = tpu.concatenate %821, %822 in 1 : vector<2x4xf32>, vector<2x4xf32> -> vector<2x8xf32>
      %824 = arith.mulf %814, %814 : vector<2x8xf32>
      %825 = arith.mulf %823, %823 : vector<2x8xf32>
      %826 = arith.addf %824, %825 : vector<2x8xf32>
      %cst_186 = arith.constant dense<0.000000e+00> : vector<2x8xf32>
      %827 = tpu.matmul %814, %0, %cst_186 {dimension_numbers = #tpu.dot_dimension_numbers<[1], [0], [0], [1], [0, 0, 1, 1], [], []>, precision = #tpu.contract_precision<fp32>} : vector<2x8xf32>, vector<8x8xf32>, vector<2x8xf32> -> vector<2x8xf32>
      %828 = arith.mulf %3, %826 : vector<2x8xf32>
      %829 = arith.mulf %828, %823 : vector<2x8xf32>
      %830 = arith.addf %829, %827 : vector<2x8xf32>
      %cst_187 = arith.constant -1.72683911E-4 : f32
      %831 = vector.broadcast %cst_187 : f32 to vector<2x8xf32>
      %832 = arith.mulf %831, %830 : vector<2x8xf32>
      %833 = arith.addf %817, %832 : vector<2x8xf32>
      %cst_188 = arith.constant -2.03520322E-4 : f32
      %834 = vector.broadcast %cst_188 : f32 to vector<2x8xf32>
      %835 = arith.mulf %834, %830 : vector<2x8xf32>
      %836 = arith.addf %820, %835 : vector<2x8xf32>
      %837 = vector.extract_strided_slice %833 {offsets = [0, 4], sizes = [2, 4], strides = [1, 1]} : vector<2x8xf32> to vector<2x4xf32>
      %838 = vector.extract_strided_slice %833 {offsets = [0, 0], sizes = [2, 4], strides = [1, 1]} : vector<2x8xf32> to vector<2x4xf32>
      %839 = tpu.concatenate %837, %838 in 1 : vector<2x4xf32>, vector<2x4xf32> -> vector<2x8xf32>
      %840 = arith.mulf %833, %833 : vector<2x8xf32>
      %841 = arith.mulf %839, %839 : vector<2x8xf32>
      %842 = arith.addf %840, %841 : vector<2x8xf32>
      %cst_189 = arith.constant dense<0.000000e+00> : vector<2x8xf32>
      %843 = tpu.matmul %833, %0, %cst_189 {dimension_numbers = #tpu.dot_dimension_numbers<[1], [0], [0], [1], [0, 0, 1, 1], [], []>, precision = #tpu.contract_precision<fp32>} : vector<2x8xf32>, vector<8x8xf32>, vector<2x8xf32> -> vector<2x8xf32>
      %844 = arith.mulf %3, %842 : vector<2x8xf32>
      %845 = arith.mulf %844, %839 : vector<2x8xf32>
      %846 = arith.addf %845, %843 : vector<2x8xf32>
      %cst_190 = arith.constant 8.26719551E-5 : f32
      %847 = vector.broadcast %cst_190 : f32 to vector<2x8xf32>
      %848 = arith.mulf %847, %846 : vector<2x8xf32>
      %849 = arith.addf %836, %848 : vector<2x8xf32>
      %850 = vector.extract_strided_slice %849 {offsets = [0, 4], sizes = [2, 4], strides = [1, 1]} : vector<2x8xf32> to vector<2x4xf32>
      %851 = vector.extract_strided_slice %849 {offsets = [0, 0], sizes = [2, 4], strides = [1, 1]} : vector<2x8xf32> to vector<2x4xf32>
      %852 = tpu.concatenate %850, %851 in 1 : vector<2x4xf32>, vector<2x4xf32> -> vector<2x8xf32>
      %853 = arith.mulf %849, %849 : vector<2x8xf32>
      %854 = arith.mulf %852, %852 : vector<2x8xf32>
      %855 = arith.addf %853, %854 : vector<2x8xf32>
      %cst_191 = arith.constant dense<0.000000e+00> : vector<2x8xf32>
      %856 = tpu.matmul %849, %0, %cst_191 {dimension_numbers = #tpu.dot_dimension_numbers<[1], [0], [0], [1], [0, 0, 1, 1], [], []>, precision = #tpu.contract_precision<fp32>} : vector<2x8xf32>, vector<8x8xf32>, vector<2x8xf32> -> vector<2x8xf32>
      %857 = arith.mulf %3, %855 : vector<2x8xf32>
      %858 = arith.mulf %857, %852 : vector<2x8xf32>
      %859 = arith.addf %858, %856 : vector<2x8xf32>
      %cst_192 = arith.constant 1.26262632E-4 : f32
      %860 = vector.broadcast %cst_192 : f32 to vector<2x8xf32>
      %861 = arith.mulf %860, %859 : vector<2x8xf32>
      %862 = arith.addf %849, %861 : vector<2x8xf32>
      %cst_193 = arith.constant 4.73484833E-5 : f32
      %863 = vector.broadcast %cst_193 : f32 to vector<2x8xf32>
      %864 = arith.mulf %863, %859 : vector<2x8xf32>
      %865 = arith.addf %849, %864 : vector<2x8xf32>
      %cst_194 = arith.constant 6.172840e-04 : f32
      %866 = vector.broadcast %cst_194 : f32 to vector<2x8xf32>
      %867 = arith.mulf %866, %859 : vector<2x8xf32>
      %868 = arith.addf %849, %867 : vector<2x8xf32>
      %cst_195 = arith.constant 0.00186401431 : f32
      %869 = vector.broadcast %cst_195 : f32 to vector<2x8xf32>
      %870 = arith.mulf %869, %859 : vector<2x8xf32>
      %871 = arith.addf %849, %870 : vector<2x8xf32>
      %cst_196 = arith.constant 0.00179689098 : f32
      %872 = vector.broadcast %cst_196 : f32 to vector<2x8xf32>
      %873 = arith.mulf %872, %859 : vector<2x8xf32>
      %874 = arith.addf %849, %873 : vector<2x8xf32>
      %cst_197 = arith.constant 5.75415615E-5 : f32
      %875 = vector.broadcast %cst_197 : f32 to vector<2x8xf32>
      %876 = arith.mulf %875, %859 : vector<2x8xf32>
      %877 = arith.addf %849, %876 : vector<2x8xf32>
      %878 = vector.extract_strided_slice %862 {offsets = [0, 4], sizes = [2, 4], strides = [1, 1]} : vector<2x8xf32> to vector<2x4xf32>
      %879 = vector.extract_strided_slice %862 {offsets = [0, 0], sizes = [2, 4], strides = [1, 1]} : vector<2x8xf32> to vector<2x4xf32>
      %880 = tpu.concatenate %878, %879 in 1 : vector<2x4xf32>, vector<2x4xf32> -> vector<2x8xf32>
      %881 = arith.mulf %862, %862 : vector<2x8xf32>
      %882 = arith.mulf %880, %880 : vector<2x8xf32>
      %883 = arith.addf %881, %882 : vector<2x8xf32>
      %cst_198 = arith.constant dense<0.000000e+00> : vector<2x8xf32>
      %884 = tpu.matmul %862, %0, %cst_198 {dimension_numbers = #tpu.dot_dimension_numbers<[1], [0], [0], [1], [0, 0, 1, 1], [], []>, precision = #tpu.contract_precision<fp32>} : vector<2x8xf32>, vector<8x8xf32>, vector<2x8xf32> -> vector<2x8xf32>
      %885 = arith.mulf %3, %883 : vector<2x8xf32>
      %886 = arith.mulf %885, %880 : vector<2x8xf32>
      %887 = arith.addf %886, %884 : vector<2x8xf32>
      %cst_199 = arith.constant 1.4204545E-4 : f32
      %888 = vector.broadcast %cst_199 : f32 to vector<2x8xf32>
      %889 = arith.mulf %888, %887 : vector<2x8xf32>
      %890 = arith.addf %865, %889 : vector<2x8xf32>
      %cst_200 = arith.constant -0.00235690246 : f32
      %891 = vector.broadcast %cst_200 : f32 to vector<2x8xf32>
      %892 = arith.mulf %891, %887 : vector<2x8xf32>
      %893 = arith.addf %868, %892 : vector<2x8xf32>
      %cst_201 = arith.constant -0.00732057681 : f32
      %894 = vector.broadcast %cst_201 : f32 to vector<2x8xf32>
      %895 = arith.mulf %894, %887 : vector<2x8xf32>
      %896 = arith.addf %871, %895 : vector<2x8xf32>
      %cst_202 = arith.constant -0.00679139886 : f32
      %897 = vector.broadcast %cst_202 : f32 to vector<2x8xf32>
      %898 = arith.mulf %897, %887 : vector<2x8xf32>
      %899 = arith.addf %874, %898 : vector<2x8xf32>
      %900 = vector.extract_strided_slice %890 {offsets = [0, 4], sizes = [2, 4], strides = [1, 1]} : vector<2x8xf32> to vector<2x4xf32>
      %901 = vector.extract_strided_slice %890 {offsets = [0, 0], sizes = [2, 4], strides = [1, 1]} : vector<2x8xf32> to vector<2x4xf32>
      %902 = tpu.concatenate %900, %901 in 1 : vector<2x4xf32>, vector<2x4xf32> -> vector<2x8xf32>
      %903 = arith.mulf %890, %890 : vector<2x8xf32>
      %904 = arith.mulf %902, %902 : vector<2x8xf32>
      %905 = arith.addf %903, %904 : vector<2x8xf32>
      %cst_203 = arith.constant dense<0.000000e+00> : vector<2x8xf32>
      %906 = tpu.matmul %890, %0, %cst_203 {dimension_numbers = #tpu.dot_dimension_numbers<[1], [0], [0], [1], [0, 0, 1, 1], [], []>, precision = #tpu.contract_precision<fp32>} : vector<2x8xf32>, vector<8x8xf32>, vector<2x8xf32> -> vector<2x8xf32>
      %907 = arith.mulf %3, %905 : vector<2x8xf32>
      %908 = arith.mulf %907, %902 : vector<2x8xf32>
      %909 = arith.addf %908, %906 : vector<2x8xf32>
      %cst_204 = arith.constant 0.00224466901 : f32
      %910 = vector.broadcast %cst_204 : f32 to vector<2x8xf32>
      %911 = arith.mulf %910, %909 : vector<2x8xf32>
      %912 = arith.addf %893, %911 : vector<2x8xf32>
      %cst_205 = arith.constant 0.00620132125 : f32
      %913 = vector.broadcast %cst_205 : f32 to vector<2x8xf32>
      %914 = arith.mulf %913, %909 : vector<2x8xf32>
      %915 = arith.addf %896, %914 : vector<2x8xf32>
      %cst_206 = arith.constant 0.00562274177 : f32
      %916 = vector.broadcast %cst_206 : f32 to vector<2x8xf32>
      %917 = arith.mulf %916, %909 : vector<2x8xf32>
      %918 = arith.addf %899, %917 : vector<2x8xf32>
      %cst_207 = arith.constant 2.83608766E-4 : f32
      %919 = vector.broadcast %cst_207 : f32 to vector<2x8xf32>
      %920 = arith.mulf %919, %909 : vector<2x8xf32>
      %921 = arith.addf %877, %920 : vector<2x8xf32>
      %922 = vector.extract_strided_slice %912 {offsets = [0, 4], sizes = [2, 4], strides = [1, 1]} : vector<2x8xf32> to vector<2x4xf32>
      %923 = vector.extract_strided_slice %912 {offsets = [0, 0], sizes = [2, 4], strides = [1, 1]} : vector<2x8xf32> to vector<2x4xf32>
      %924 = tpu.concatenate %922, %923 in 1 : vector<2x4xf32>, vector<2x4xf32> -> vector<2x8xf32>
      %925 = arith.mulf %912, %912 : vector<2x8xf32>
      %926 = arith.mulf %924, %924 : vector<2x8xf32>
      %927 = arith.addf %925, %926 : vector<2x8xf32>
      %cst_208 = arith.constant dense<0.000000e+00> : vector<2x8xf32>
      %928 = tpu.matmul %912, %0, %cst_208 {dimension_numbers = #tpu.dot_dimension_numbers<[1], [0], [0], [1], [0, 0, 1, 1], [], []>, precision = #tpu.contract_precision<fp32>} : vector<2x8xf32>, vector<8x8xf32>, vector<2x8xf32> -> vector<2x8xf32>
      %929 = arith.mulf %3, %927 : vector<2x8xf32>
      %930 = arith.mulf %929, %924 : vector<2x8xf32>
      %931 = arith.addf %930, %928 : vector<2x8xf32>
      %cst_209 = arith.constant -1.8359175E-4 : f32
      %932 = vector.broadcast %cst_209 : f32 to vector<2x8xf32>
      %933 = arith.mulf %932, %931 : vector<2x8xf32>
      %934 = arith.addf %915, %933 : vector<2x8xf32>
      %cst_210 = arith.constant 1.75763314E-4 : f32
      %935 = vector.broadcast %cst_210 : f32 to vector<2x8xf32>
      %936 = arith.mulf %935, %931 : vector<2x8xf32>
      %937 = arith.addf %918, %936 : vector<2x8xf32>
      %cst_211 = arith.constant 4.11011162E-4 : f32
      %938 = vector.broadcast %cst_211 : f32 to vector<2x8xf32>
      %939 = arith.mulf %938, %931 : vector<2x8xf32>
      %940 = arith.addf %921, %939 : vector<2x8xf32>
      %941 = vector.extract_strided_slice %934 {offsets = [0, 4], sizes = [2, 4], strides = [1, 1]} : vector<2x8xf32> to vector<2x4xf32>
      %942 = vector.extract_strided_slice %934 {offsets = [0, 0], sizes = [2, 4], strides = [1, 1]} : vector<2x8xf32> to vector<2x4xf32>
      %943 = tpu.concatenate %941, %942 in 1 : vector<2x4xf32>, vector<2x4xf32> -> vector<2x8xf32>
      %944 = arith.mulf %934, %934 : vector<2x8xf32>
      %945 = arith.mulf %943, %943 : vector<2x8xf32>
      %946 = arith.addf %944, %945 : vector<2x8xf32>
      %cst_212 = arith.constant dense<0.000000e+00> : vector<2x8xf32>
      %947 = tpu.matmul %934, %0, %cst_212 {dimension_numbers = #tpu.dot_dimension_numbers<[1], [0], [0], [1], [0, 0, 1, 1], [], []>, precision = #tpu.contract_precision<fp32>} : vector<2x8xf32>, vector<8x8xf32>, vector<2x8xf32> -> vector<2x8xf32>
      %948 = arith.mulf %3, %946 : vector<2x8xf32>
      %949 = arith.mulf %948, %943 : vector<2x8xf32>
      %950 = arith.addf %949, %947 : vector<2x8xf32>
      %cst_213 = arith.constant -1.72683911E-4 : f32
      %951 = vector.broadcast %cst_213 : f32 to vector<2x8xf32>
      %952 = arith.mulf %951, %950 : vector<2x8xf32>
      %953 = arith.addf %937, %952 : vector<2x8xf32>
      %cst_214 = arith.constant -2.03520322E-4 : f32
      %954 = vector.broadcast %cst_214 : f32 to vector<2x8xf32>
      %955 = arith.mulf %954, %950 : vector<2x8xf32>
      %956 = arith.addf %940, %955 : vector<2x8xf32>
      %957 = vector.extract_strided_slice %953 {offsets = [0, 4], sizes = [2, 4], strides = [1, 1]} : vector<2x8xf32> to vector<2x4xf32>
      %958 = vector.extract_strided_slice %953 {offsets = [0, 0], sizes = [2, 4], strides = [1, 1]} : vector<2x8xf32> to vector<2x4xf32>
      %959 = tpu.concatenate %957, %958 in 1 : vector<2x4xf32>, vector<2x4xf32> -> vector<2x8xf32>
      %960 = arith.mulf %953, %953 : vector<2x8xf32>
      %961 = arith.mulf %959, %959 : vector<2x8xf32>
      %962 = arith.addf %960, %961 : vector<2x8xf32>
      %cst_215 = arith.constant dense<0.000000e+00> : vector<2x8xf32>
      %963 = tpu.matmul %953, %0, %cst_215 {dimension_numbers = #tpu.dot_dimension_numbers<[1], [0], [0], [1], [0, 0, 1, 1], [], []>, precision = #tpu.contract_precision<fp32>} : vector<2x8xf32>, vector<8x8xf32>, vector<2x8xf32> -> vector<2x8xf32>
      %964 = arith.mulf %3, %962 : vector<2x8xf32>
      %965 = arith.mulf %964, %959 : vector<2x8xf32>
      %966 = arith.addf %965, %963 : vector<2x8xf32>
      %cst_216 = arith.constant 8.26719551E-5 : f32
      %967 = vector.broadcast %cst_216 : f32 to vector<2x8xf32>
      %968 = arith.mulf %967, %966 : vector<2x8xf32>
      %969 = arith.addf %956, %968 : vector<2x8xf32>
      %970 = arith.index_cast %arg4 : i32 to index
      %c0_217 = arith.constant 0 : index
      %c0_218 = arith.constant 0 : index
      %971 = vector.load %arg3[%970, %c0_217, %c0_218] : memref<100x2x8xf32, #tpu.memory_space<vmem>>, vector<1x2x8xf32>
      %972 = vector.shape_cast %971 : vector<1x2x8xf32> to vector<2x8xf32>
      %973 = vector.shape_cast %969 : vector<2x8xf32> to vector<1x2x8xf32>
      tpu.vector_store %arg3[%970, %c0_217, %c0_218], %973 {strides = array<i32>} : memref<100x2x8xf32, #tpu.memory_space<vmem>>, vector<1x2x8xf32>,
      scf.yield %969 : vector<2x8xf32>
    }
    %c99_i32_9 = arith.constant 99 : i32
    return
  }
}

</mosaic_0001>

<bundles_post_ra>
// kernel: tpu_custom_call.1
= control target key start
LH: loop header
LB: loop body
LE: loop exit
PB: predicated region body
PF: predicated region fallthrough
CT: control target
= control target key end

     0   :  { %8 = vsyncpa [#allocation3], 0  ;;  %s9072_s0 = inlined_call_operand.hbm [shape: f32[2,8], index: 0, kind: input, shape index: {}]   ;;  %s9073_s1 = inlined_call_operand.hbm [shape: f32[1,8], index: 1, kind: input, shape index: {}]   ;;  %s9074_s2 = inlined_call_operand.hbm [shape: f32[8,8], index: 2, kind: input, shape index: {}]   ;;  %s9075_s3 = inlined_call_operand.vmem [shape: f32[100,2,8], index: 3, kind: output, shape index: {}]  }
   0x1   :  { %9 = vsyncpa [#allocation5], 0  ;;  %s26_s14 = sshll.u32 %s9073_s1, 4  ;;  %s8302_s15 = smov [#allocation4]   ;;  %s27_s14 = int_to_ptr.hbm [resolvable:$true] %s26_s14 }
   0x2   :  { %s28_s16 = sshll.u32 %s8302_s15, 4  ;;  %s15_s19 = sshll.u32 %s9072_s0, 4  ;;  %s29_s16 = int_to_ptr.vmem [resolvable:$true] %s28_s16  ;;  %s16_s19 = int_to_ptr.hbm [resolvable:$true] %s15_s19 }
   0x3   :  { %31 = dma.hbm_to_vmem [thread:$0]  %s27_s14, 16, %s29_s16, [#allocation5]  }
   0x4   :  { %s8303_s20 = smov [#allocation2]   ;;  %s37_s24 = sshll.u32 %s9074_s2, 4  ;;  %s38_s24 = int_to_ptr.hbm [resolvable:$true] %s37_s24 }
   0x5   :  { %s17_s21 = sshll.u32 %s8303_s20, 4  ;;  %s8304_s1 = smov [#allocation6]   ;;  %s18_s21 = int_to_ptr.vmem [resolvable:$true] %s17_s21 }
   0x6   :  { %20 = dma.hbm_to_vmem [thread:$0]  %s16_s19, 32, %s18_s21, [#allocation3]  }
   0x7   :  { %s39_s25 = sshll.u32 %s8304_s1, 4  ;;  %s40_s25 = int_to_ptr.vmem [resolvable:$true] %s39_s25 }
   0x8   :  { %42 = dma.hbm_to_vmem [thread:$0]  %s38_s24, 128, %s40_s25, [#allocation5]  }
   0x9   :  { %8290 = dma.done.wait [#allocation3], 32  }
   0xa   :  { %8291 = vsyncadd [#allocation3], 4294967264 }
   0xb   :  { %8292 = dma.done.wait [#allocation5], 144  }
   0xc   :  { %8293 = vsyncadd [#allocation5], 4294967152  ;;  %vm61_vm0 = vcmask 58368   ;;  %v8336_v0 = vld [vmem:[#allocation6] sm:$0xff]  ;;  %v8338_v1 = vld [vmem:[#allocation4] ss:$0 sm:$0xff] }
   0xd   :  { %v60_v2 = vld [vmem:[#allocation2] sm:$0x3]   ;;  %s8346_s26 = smov 1  }
   0xe   :  { %62 = vst.msk [vmem:[%s9075_s3] sm:$0x3] %vm61_vm0, %v60_v2 }
   0xf LB: > { %v8355_v3 = vand.u32 4294901760, %v8336_v0  ;;  %vm82_vm1 = vcmask 64512   ;;  %s8305_s27 = smov 124   ;;  %s8306_s28 = smov 4   ;;  %vm77_vm2 = vcmask 31744   ;;  %v79_v18 = vmul.f32 %v8296_v2, %v8296_v2  ;;  %s8300_s26 = sphi %s8346_s26, %s68_s26   ;;  %v8296_v2 = vphi %v60_v2, %v8167_v2  }
  0x10   : > { %71 = vrot.lane.b32.xlu0 %v8296_v2, %s8305_s27  ;;  %v83_v5 = vsel %vm82_vm1, %v8296_v2, 0  ;;  %s8187_s29 = sshll.u32 %s8300_s26, 1  ;;  %s68_s26 = sadd.s32 1, %s8300_s26  }
  0x11   : > { %v8361_v4 = vsub.f32 %v8336_v0, %v8355_v3  ;;  %177 = vmatpush.msra.mxu3 %v8355_v3  ;;  %v102_v6 = vand.u32 4294901760, %v83_v5  ;;  %101 = vmatpush.msra.mxu0 %v8355_v3  ;;  %s8169_s5 = scalar_lea.vmem %s9075_s3, %s8187_s29  ;;  %p65_p0 = scmp.ge.s32.totalorder %s68_s26, 100  }
  0x13   : > { %154 = vmatpush.msra.mxu2 %v8361_v4  ;;  %v8369_v7 = vand.u32 4294901760, %v8361_v4  ;;  %v103_v8 = vsub.f32 %v83_v5, %v102_v6 }
  0x15   : > { %275 = vmatpush.msrb.mxu2 %v8355_v3  ;;  %v129_v9 = vsub.f32 %v8361_v4, %v8369_v7  ;;  %203 = vmatpush.msrb.mxu0 %v8369_v7  ;;  %v104_v10 = vand.u32 4294901760, %v103_v8 }
  0x16   : > { %157 = vmatmul.f32.vlgmr.msra.gmra.mxu2 %v103_v8 }
  0x17   : > { %v8375_v11 = vand.u32 4294901760, %v129_v9  ;;  %377 = vmatpush.msra.mxu2 %v8369_v7  ;;  %181 = vmatmul.f32.vlgmr.msra.gmra.mxu3 %v104_v10  ;;  %v105_v12 = vsub.f32 %v103_v8, %v104_v10 }
  0x18   : > { %74 = vrot.lane.b32.xlu0 %v8296_v2, %s8306_s28 }
  0x19   : > { %131 = vmatpush.msra.mxu1 %v8375_v11  ;;  %v106_v13 = vand.u32 4294901760, %v105_v12  ;;  %305 = vmatpush.msrb.mxu3 %v8375_v11 }
  0x1a   : > { %133 = vmatmul.f32.vlgmr.msra.gmra.mxu1 %v102_v6 }
  0x1b   : > { %225 = vmatpush.msrb.mxu1 %v8355_v3  ;;  %399 = vmatpush.msra.mxu3 %v8355_v3 }
  0x1c   : > { %107 = vmatmul.f32.vlgmr.msra.gmra.mxu0 %v106_v13 }
  0x1d   : > { %351 = vmatpush.msra.mxu1 %v8355_v3  ;;  %328 = vmatpush.msra.mxu0 %v8361_v4 }
  0x22   : > { %227 = vmatmul.f32.vlgmr.msrb.gmra.mxu1 %v102_v6 }
  0x23   : > { %475 = vmatpush.msrb.mxu1 %v8375_v11 }
  0x24   : > { %205 = vmatmul.f32.vlgmr.msrb.gmra.mxu0 %v102_v6 }
  0x25   : > { %445 = vmatpush.msrb.mxu0 %v8355_v3 }
  0x82   : > { %v72_v14 = vpop.permute.xlu0 %71 }
  0x8a   : > { %v75_v15 = vpop.permute.xlu0 %74 }
  0x8b   : > { %v78_v16 = vsel %vm77_vm2, %v72_v14, %v75_v15 }
  0x8c   : > { %v80_v19 = vmul.f32 %v78_v16, %v78_v16 }
  0x8e   : > { %v81_v23 = vadd.f32 %v80_v19, %v79_v18 }
  0x90   : > { %v231_v26 = vmul.f32 %v8338_v1, %v81_v23 }
  0x92   : > { %v232_v31 = vmul.f32 %v231_v26, %v78_v16 }
  0x97   : > { %v134_v17 = vpop.f32.mrf.mxu1 }
  0x99   : > { %v108_v20 = vpop.f32.mrf.mxu0  ;;  %v158_v21 = vpop.f32.mrf.mxu2 }
  0x9a   : > { %v135_v22 = vadd.f32 %v134_v17, %v108_v20  ;;  %v182_v25 = vpop.f32.mrf.mxu3 }
  0x9c   : > { %v159_v24 = vadd.f32 %v158_v21, %v135_v22 }
  0x9e   : > { %v183_v27 = vadd.f32 %v182_v25, %v159_v24 }
  0x9f   : > { %v228_v29 = vpop.f32.mrf.mxu1 }
  0xa1   : > { %v206_v28 = vpop.f32.mrf.mxu0 }
  0xa2   : > { %v207_v30 = vadd.f32 %v206_v28, %v183_v27 }
  0xa4   : > { %v229_v32 = vadd.f32 %v228_v29, %v207_v30 }
  0xa6   : > { %v8392_v33 = vadd.f32 %v232_v31, %v229_v32 }
  0xa8   : > { %v234_v34 = vmul.f32 0.00012626263, %v8392_v33  ;;  %v236_v59 = vmul.f32 4.7348483e-05, %v8392_v33  ;;  %v238_v60 = vmul.f32 0.000617284, %v8392_v33 }
  0xa9   : > { %v242_v63 = vmul.f32 0.001796891, %v8392_v33  ;;  %v240_v5 = vmul.f32 0.0018640143, %v8392_v33 }
  0xaa   : > { %v235_v35 = vadd.f32 %v8296_v2, %v234_v34  ;;  %v237_v8 = vadd.f32 %v8296_v2, %v236_v59  ;;  %v239_v9 = vadd.f32 %v8296_v2, %v238_v60 }
  0xab   : > { %v243_v14 = vadd.f32 %v8296_v2, %v242_v63  ;;  %v241_v15 = vadd.f32 %v8296_v2, %v240_v5 }
  0xac   : > { %247 = vrot.lane.b32.xlu1 %v235_v35, %s8305_s27  ;;  %v257_v36 = vsel %vm82_vm1, %v235_v35, 0  ;;  %v254_v48 = vmul.f32 %v235_v35, %v235_v35 }
  0xad   : > { %v276_v37 = vand.u32 4294901760, %v257_v36 }
  0xaf   : > { %307 = vmatmul.f32.vlgmr.msrb.gmra.mxu3 %v276_v37  ;;  %v277_v38 = vsub.f32 %v257_v36, %v276_v37 }
  0xb0   : > { %521 = vmatpush.msrb.mxu3 %v8355_v3 }
  0xb1   : > { %331 = vmatmul.f32.vlgmr.msra.gmra.mxu0 %v277_v38  ;;  %v278_v39 = vand.u32 4294901760, %v277_v38 }
  0xb2   : > { %547 = vmatpush.msra.mxu0 %v8369_v7 }
  0xb3   : > { %355 = vmatmul.f32.vlgmr.msra.gmra.mxu1 %v278_v39  ;;  %v279_v40 = vsub.f32 %v277_v38, %v278_v39 }
  0xb4   : > { %250 = vrot.lane.b32.xlu1 %v235_v35, %s8306_s28  ;;  %569 = vmatpush.msra.mxu1 %v8355_v3 }
  0xb5   : > { %v280_v41 = vand.u32 4294901760, %v279_v40 }
  0xb7   : > { %281 = vmatmul.f32.vlgmr.msrb.gmra.mxu2 %v280_v41  ;;  %401 = vmatmul.f32.vlgmr.msra.gmra.mxu3 %v276_v37 }
  0xb8   : > { %498 = vmatpush.msrb.mxu2 %v8361_v4  ;;  %645 = vmatpush.msra.mxu3 %v8375_v11 }
  0xbf   : > { %379 = vmatmul.f32.vlgmr.msra.gmra.mxu2 %v276_v37 }
  0xc0   : > { %615 = vmatpush.msra.mxu2 %v8355_v3 }
 0x11e   : > { %v248_v42 = vpop.permute.xlu1 %247 }
 0x126   : > { %v251_v43 = vpop.permute.xlu1 %250 }
 0x127   : > { %v253_v44 = vsel %vm77_vm2, %v248_v42, %v251_v43 }
 0x128   : > { %v255_v45 = vmul.f32 %v253_v44, %v253_v44 }
 0x12a   : > { %v256_v51 = vadd.f32 %v255_v45, %v254_v48 }
 0x12c   : > { %v405_v54 = vmul.f32 %v8338_v1, %v256_v51 }
 0x12e   : > { %v332_v50 = vpop.f32.mrf.mxu0  ;;  %v406_v61 = vmul.f32 %v405_v54, %v253_v44 }
 0x130   : > { %v356_v53 = vpop.f32.mrf.mxu1 }
 0x132   : > { %v308_v46 = vpop.f32.mrf.mxu3 }
 0x13a   : > { %v282_v47 = vpop.f32.mrf.mxu2  ;;  %v402_v58 = vpop.f32.mrf.mxu3 }
 0x13b   : > { %v309_v49 = vadd.f32 %v308_v46, %v282_v47  ;;  %v244_v47 = vmul.f32 5.754156e-05, %v8392_v33 }
 0x13d   : > { %v333_v52 = vadd.f32 %v332_v50, %v309_v49 }
 0x13f   : > { %v357_v55 = vadd.f32 %v356_v53, %v333_v52  ;;  %v245_v52 = vadd.f32 %v8296_v2, %v244_v47 }
 0x142   : > { %v380_v56 = vpop.f32.mrf.mxu2 }
 0x143   : > { %v381_v57 = vadd.f32 %v380_v56, %v357_v55 }
 0x145   : > { %v403_v62 = vadd.f32 %v402_v58, %v381_v57 }
 0x147   : > { %v407_v6 = vadd.f32 %v406_v61, %v403_v62 }
 0x149   : > { %v414_v10 = vmul.f32 -0.006791399, %v407_v6  ;;  %v408_v12 = vmul.f32 0.00014204545, %v407_v6  ;;  %v410_v13 = vmul.f32 -0.0023569025, %v407_v6 }
 0x14a   : > { %v412_v16 = vmul.f32 -0.007320577, %v407_v6 }
 0x14b   : > { %v409_v17 = vadd.f32 %v408_v12, %v237_v8  ;;  %v411_v18 = vadd.f32 %v410_v13, %v239_v9  ;;  %v415_v19 = vadd.f32 %v414_v10, %v243_v14 }
 0x14c   : > { %v413_v20 = vadd.f32 %v412_v16, %v241_v15 }
 0x14d   : > { %417 = vrot.lane.b32.xlu2 %v409_v17, %s8305_s27  ;;  %v427_v21 = vsel %vm82_vm1, %v409_v17, 0  ;;  %v424_v34 = vmul.f32 %v409_v17, %v409_v17 }
 0x14e   : > { %v446_v22 = vand.u32 4294901760, %v427_v21 }
 0x150   : > { %477 = vmatmul.f32.vlgmr.msrb.gmra.mxu1 %v446_v22  ;;  %v447_v23 = vsub.f32 %v427_v21, %v446_v22 }
 0x151   : > { %691 = vmatpush.msrb.mxu1 %v8355_v3 }
 0x152   : > { %501 = vmatmul.f32.vlgmr.msrb.gmra.mxu2 %v447_v23  ;;  %v448_v24 = vand.u32 4294901760, %v447_v23 }
 0x153   : > { %717 = vmatpush.msrb.mxu2 %v8369_v7 }
 0x154   : > { %525 = vmatmul.f32.vlgmr.msrb.gmra.mxu3 %v448_v24  ;;  %v449_v25 = vsub.f32 %v447_v23, %v448_v24 }
 0x155   : > { %420 = vrot.lane.b32.xlu2 %v409_v17, %s8306_s28  ;;  %739 = vmatpush.msrb.mxu3 %v8355_v3 }
 0x156   : > { %v450_v26 = vand.u32 4294901760, %v449_v25 }
 0x158   : > { %451 = vmatmul.f32.vlgmr.msrb.gmra.mxu0 %v450_v26  ;;  %571 = vmatmul.f32.vlgmr.msra.gmra.mxu1 %v446_v22 }
 0x159   : > { %668 = vmatpush.msrb.mxu0 %v8361_v4  ;;  %813 = vmatpush.msra.mxu1 %v8375_v11 }
 0x160   : > { %549 = vmatmul.f32.vlgmr.msra.gmra.mxu0 %v446_v22 }
 0x161   : > { %783 = vmatpush.msra.mxu0 %v8355_v3 }
 0x1a7   : > { %v418_v27 = vpop.permute.xlu2 %417 }
 0x1af   : > { %v421_v28 = vpop.permute.xlu2 %420 }
 0x1b0   : > { %v423_v29 = vsel %vm77_vm2, %v418_v27, %v421_v28 }
 0x1b1   : > { %v425_v30 = vmul.f32 %v423_v29, %v423_v29 }
 0x1b3   : > { %v426_v37 = vadd.f32 %v425_v30, %v424_v34 }
 0x1b5   : > { %v575_v40 = vmul.f32 %v8338_v1, %v426_v37 }
 0x1b7   : > { %v576_v45 = vmul.f32 %v575_v40, %v423_v29 }
 0x1cd   : > { %v478_v31 = vpop.f32.mrf.mxu1 }
 0x1d5   : > { %v452_v32 = vpop.f32.mrf.mxu0  ;;  %v502_v36 = vpop.f32.mrf.mxu2 }
 0x1d6   : > { %v479_v35 = vadd.f32 %v478_v31, %v452_v32  ;;  %v572_v44 = vpop.f32.mrf.mxu1 }
 0x1d7   : > { %v526_v39 = vpop.f32.mrf.mxu3 }
 0x1d8   : > { %v503_v38 = vadd.f32 %v502_v36, %v479_v35 }
 0x1da   : > { %v527_v41 = vadd.f32 %v526_v39, %v503_v38 }
 0x1dd   : > { %v550_v42 = vpop.f32.mrf.mxu0 }
 0x1de   : > { %v551_v43 = vadd.f32 %v550_v42, %v527_v41 }
 0x1e0   : > { %v573_v46 = vadd.f32 %v572_v44, %v551_v43 }
 0x1e2   : > { %v577_v48 = vadd.f32 %v576_v45, %v573_v46 }
 0x1e4   : > { %v584_v49 = vmul.f32 0.00028360877, %v577_v48  ;;  %v578_v50 = vmul.f32 0.002244669, %v577_v48  ;;  %v580_v51 = vmul.f32 0.0062013213, %v577_v48 }
 0x1e5   : > { %v582_v53 = vmul.f32 0.0056227418, %v577_v48 }
 0x1e6   : > { %v579_v54 = vadd.f32 %v578_v50, %v411_v18  ;;  %v581_v55 = vadd.f32 %v580_v51, %v413_v20  ;;  %v585_v56 = vadd.f32 %v584_v49, %v245_v52 }
 0x1e7   : > { %v583_v57 = vadd.f32 %v582_v53, %v415_v19 }
 0x1e8   : > { %590 = vrot.lane.b32.xlu1 %v579_v54, %s8306_s28  ;;  %587 = vrot.lane.b32.xlu0 %v579_v54, %s8305_s27  ;;  %v597_v58 = vsel %vm82_vm1, %v579_v54, 0  ;;  %v594_v10 = vmul.f32 %v579_v54, %v579_v54 }
 0x1e9   : > { %v616_v59 = vand.u32 4294901760, %v597_v58 }
 0x1eb   : > { %647 = vmatmul.f32.vlgmr.msra.gmra.mxu3 %v616_v59  ;;  %v617_v33 = vsub.f32 %v597_v58, %v616_v59 }
 0x1ec   : > { %859 = vmatpush.msra.mxu3 %v8355_v3 }
 0x1ed   : > { %671 = vmatmul.f32.vlgmr.msrb.gmra.mxu0 %v617_v33  ;;  %v618_v60 = vand.u32 4294901760, %v617_v33 }
 0x1ee   : > { %885 = vmatpush.msrb.mxu0 %v8369_v7 }
 0x1ef   : > { %695 = vmatmul.f32.vlgmr.msrb.gmra.mxu1 %v618_v60  ;;  %v619_v2 = vsub.f32 %v617_v33, %v618_v60 }
 0x1f0   : > { %907 = vmatpush.msrb.mxu1 %v8355_v3 }
 0x1f1   : > { %v620_v61 = vand.u32 4294901760, %v619_v2 }
 0x1f3   : > { %621 = vmatmul.f32.vlgmr.msra.gmra.mxu2 %v620_v61  ;;  %741 = vmatmul.f32.vlgmr.msrb.gmra.mxu3 %v616_v59 }
 0x1f4   : > { %836 = vmatpush.msra.mxu2 %v8361_v4  ;;  %979 = vmatpush.msrb.mxu3 %v8375_v11 }
 0x1fb   : > { %719 = vmatmul.f32.vlgmr.msrb.gmra.mxu2 %v616_v59 }
 0x1fc   : > { %949 = vmatpush.msrb.mxu2 %v8355_v3 }
 0x25a   : > { %v591_v62 = vpop.permute.xlu1 %590  ;;  %v588_v63 = vpop.permute.xlu0 %587 }
 0x25b   : > { %v593_v5 = vsel %vm77_vm2, %v588_v63, %v591_v62 }
 0x25c   : > { %v595_v6 = vmul.f32 %v593_v5, %v593_v5 }
 0x25e   : > { %v596_v14 = vadd.f32 %v595_v6, %v594_v10 }
 0x260   : > { %v745_v17 = vmul.f32 %v8338_v1, %v596_v14 }
 0x262   : > { %v746_v22 = vmul.f32 %v745_v17, %v593_v5 }
 0x26a   : > { %v672_v13 = vpop.f32.mrf.mxu0 }
 0x26c   : > { %v696_v16 = vpop.f32.mrf.mxu1 }
 0x26e   : > { %v648_v8 = vpop.f32.mrf.mxu3 }
 0x276   : > { %v622_v9 = vpop.f32.mrf.mxu2  ;;  %v742_v21 = vpop.f32.mrf.mxu3 }
 0x277   : > { %v649_v12 = vadd.f32 %v648_v8, %v622_v9 }
 0x279   : > { %v673_v15 = vadd.f32 %v672_v13, %v649_v12 }
 0x27b   : > { %v697_v18 = vadd.f32 %v696_v16, %v673_v15 }
 0x27e   : > { %v720_v19 = vpop.f32.mrf.mxu2 }
 0x27f   : > { %v721_v20 = vadd.f32 %v720_v19, %v697_v18 }
 0x281   : > { %v743_v23 = vadd.f32 %v742_v21, %v721_v20 }
 0x283   : > { %v747_v24 = vadd.f32 %v746_v22, %v743_v23 }
 0x285   : > { %v750_v25 = vmul.f32 0.00017576331, %v747_v24  ;;  %v752_v26 = vmul.f32 0.00041101116, %v747_v24  ;;  %v748_v27 = vmul.f32 -0.00018359175, %v747_v24 }
 0x287   : > { %v749_v28 = vadd.f32 %v748_v27, %v581_v55  ;;  %v753_v29 = vadd.f32 %v752_v26, %v585_v56  ;;  %v751_v30 = vadd.f32 %v750_v25, %v583_v57 }
 0x289   : > { %758 = vrot.lane.b32.xlu0 %v749_v28, %s8306_s28  ;;  %755 = vrot.lane.b32.xlu2 %v749_v28, %s8305_s27  ;;  %v765_v31 = vsel %vm82_vm1, %v749_v28, 0  ;;  %v762_v44 = vmul.f32 %v749_v28, %v749_v28 }
 0x28a   : > { %v784_v32 = vand.u32 4294901760, %v765_v31 }
 0x28c   : > { %815 = vmatmul.f32.vlgmr.msra.gmra.mxu1 %v784_v32  ;;  %v785_v34 = vsub.f32 %v765_v31, %v784_v32 }
 0x28d   : > { %1025 = vmatpush.msra.mxu1 %v8355_v3 }
 0x28e   : > { %839 = vmatmul.f32.vlgmr.msra.gmra.mxu2 %v785_v34  ;;  %v786_v35 = vand.u32 4294901760, %v785_v34 }
 0x28f   : > { %1051 = vmatpush.msra.mxu2 %v8369_v7 }
 0x290   : > { %863 = vmatmul.f32.vlgmr.msra.gmra.mxu3 %v786_v35  ;;  %v787_v36 = vsub.f32 %v785_v34, %v786_v35 }
 0x291   : > { %1073 = vmatpush.msra.mxu3 %v8355_v3 }
 0x292   : > { %v788_v37 = vand.u32 4294901760, %v787_v36 }
 0x294   : > { %789 = vmatmul.f32.vlgmr.msra.gmra.mxu0 %v788_v37  ;;  %909 = vmatmul.f32.vlgmr.msrb.gmra.mxu1 %v784_v32 }
 0x295   : > { %1002 = vmatpush.msra.mxu0 %v8361_v4  ;;  %1143 = vmatpush.msrb.mxu1 %v8375_v11 }
 0x29c   : > { %887 = vmatmul.f32.vlgmr.msrb.gmra.mxu0 %v784_v32 }
 0x29d   : > { %1113 = vmatpush.msrb.mxu0 %v8355_v3 }
 0x2e3   : > { %v756_v39 = vpop.permute.xlu2 %755 }
 0x2fb   : > { %v759_v38 = vpop.permute.xlu0 %758 }
 0x2fc   : > { %v761_v40 = vsel %vm77_vm2, %v756_v39, %v759_v38 }
 0x2fd   : > { %v763_v41 = vmul.f32 %v761_v40, %v761_v40 }
 0x2ff   : > { %v764_v47 = vadd.f32 %v763_v41, %v762_v44 }
 0x301   : > { %v913_v50 = vmul.f32 %v8338_v1, %v764_v47 }
 0x303   : > { %v914_v55 = vmul.f32 %v913_v50, %v761_v40 }
 0x309   : > { %v816_v42 = vpop.f32.mrf.mxu1 }
 0x311   : > { %v790_v43 = vpop.f32.mrf.mxu0  ;;  %v840_v46 = vpop.f32.mrf.mxu2 }
 0x312   : > { %v817_v45 = vadd.f32 %v816_v42, %v790_v43  ;;  %v910_v54 = vpop.f32.mrf.mxu1 }
 0x313   : > { %v864_v49 = vpop.f32.mrf.mxu3 }
 0x314   : > { %v841_v48 = vadd.f32 %v840_v46, %v817_v45 }
 0x316   : > { %v865_v51 = vadd.f32 %v864_v49, %v841_v48 }
 0x319   : > { %v888_v52 = vpop.f32.mrf.mxu0 }
 0x31a   : > { %v889_v53 = vadd.f32 %v888_v52, %v865_v51 }
 0x31c   : > { %v911_v56 = vadd.f32 %v910_v54, %v889_v53 }
 0x31e   : > { %v915_v57 = vadd.f32 %v914_v55, %v911_v56 }
 0x320   : > { %v916_v58 = vmul.f32 -0.00017268391, %v915_v57  ;;  %v918_v59 = vmul.f32 -0.00020352032, %v915_v57 }
 0x322   : > { %v919_v33 = vadd.f32 %v918_v59, %v753_v29  ;;  %v917_v60 = vadd.f32 %v916_v58, %v751_v30 }
 0x324   : > { %924 = vrot.lane.b32.xlu2 %v917_v60, %s8306_s28  ;;  %921 = vrot.lane.b32.xlu1 %v917_v60, %s8305_s27  ;;  %v931_v2 = vsel %vm82_vm1, %v917_v60, 0  ;;  %v928_v15 = vmul.f32 %v917_v60, %v917_v60 }
 0x325   : > { %v950_v61 = vand.u32 4294901760, %v931_v2 }
 0x327   : > { %981 = vmatmul.f32.vlgmr.msrb.gmra.mxu3 %v950_v61  ;;  %v951_v62 = vsub.f32 %v931_v2, %v950_v61 }
 0x328   : > { %1189 = vmatpush.msrb.mxu3 %v8355_v3 }
 0x329   : > { %1005 = vmatmul.f32.vlgmr.msra.gmra.mxu0 %v951_v62  ;;  %v952_v63 = vand.u32 4294901760, %v951_v62 }
 0x32a   : > { %1215 = vmatpush.msra.mxu0 %v8369_v7 }
 0x32b   : > { %1029 = vmatmul.f32.vlgmr.msra.gmra.mxu1 %v952_v63  ;;  %v953_v5 = vsub.f32 %v951_v62, %v952_v63 }
 0x32c   : > { %1237 = vmatpush.msra.mxu1 %v8355_v3 }
 0x32d   : > { %v954_v6 = vand.u32 4294901760, %v953_v5 }
 0x32f   : > { %955 = vmatmul.f32.vlgmr.msrb.gmra.mxu2 %v954_v6  ;;  %1075 = vmatmul.f32.vlgmr.msra.gmra.mxu3 %v950_v61 }
 0x330   : > { %1166 = vmatpush.msrb.mxu2 %v8361_v4  ;;  %1317 = vmatpush.msra.mxu3 %v8375_v11 }
 0x337   : > { %1053 = vmatmul.f32.vlgmr.msra.gmra.mxu2 %v950_v61 }
 0x338   : > { %1287 = vmatpush.msra.mxu2 %v8355_v3 }
 0x37e   : > { %v925_v9 = vpop.permute.xlu2 %924 }
 0x396   : > { %v922_v8 = vpop.permute.xlu1 %921 }
 0x397   : > { %v927_v10 = vsel %vm77_vm2, %v922_v8, %v925_v9 }
 0x398   : > { %v929_v12 = vmul.f32 %v927_v10, %v927_v10 }
 0x39a   : > { %v930_v18 = vadd.f32 %v929_v12, %v928_v15 }
 0x39c   : > { %v1079_v21 = vmul.f32 %v8338_v1, %v930_v18 }
 0x39e   : > { %v1080_v26 = vmul.f32 %v1079_v21, %v927_v10 }
 0x3a6   : > { %v1006_v17 = vpop.f32.mrf.mxu0 }
 0x3a8   : > { %v1030_v20 = vpop.f32.mrf.mxu1 }
 0x3aa   : > { %v982_v13 = vpop.f32.mrf.mxu3 }
 0x3b2   : > { %v956_v14 = vpop.f32.mrf.mxu2  ;;  %v1076_v25 = vpop.f32.mrf.mxu3 }
 0x3b3   : > { %v983_v16 = vadd.f32 %v982_v13, %v956_v14 }
 0x3b5   : > { %v1007_v19 = vadd.f32 %v1006_v17, %v983_v16 }
 0x3b7   : > { %v1031_v22 = vadd.f32 %v1030_v20, %v1007_v19 }
 0x3ba   : > { %v1054_v23 = vpop.f32.mrf.mxu2 }
 0x3bb   : > { %v1055_v24 = vadd.f32 %v1054_v23, %v1031_v22 }
 0x3bd   : > { %v1077_v27 = vadd.f32 %v1076_v25, %v1055_v24 }
 0x3bf   : > { %v1081_v28 = vadd.f32 %v1080_v26, %v1077_v27 }
 0x3c1   : > { %v1082_v29 = vmul.f32 8.2671955e-05, %v1081_v28 }
 0x3c3   : > { %v8461_v30 = vadd.f32 %v1082_v29, %v919_v33 }
 0x3c5   : > { %1088 = vrot.lane.b32.xlu1 %v8461_v30, %s8306_s28  ;;  %1085 = vrot.lane.b32.xlu0 %v8461_v30, %s8305_s27  ;;  %v1095_v31 = vsel %vm82_vm1, %v8461_v30, 0  ;;  %v1092_v44 = vmul.f32 %v8461_v30, %v8461_v30 }
 0x3c6   : > { %v1114_v32 = vand.u32 4294901760, %v1095_v31 }
 0x3c8   : > { %1145 = vmatmul.f32.vlgmr.msrb.gmra.mxu1 %v1114_v32  ;;  %v1115_v34 = vsub.f32 %v1095_v31, %v1114_v32 }
 0x3c9   : > { %1363 = vmatpush.msrb.mxu1 %v8355_v3 }
 0x3ca   : > { %1169 = vmatmul.f32.vlgmr.msrb.gmra.mxu2 %v1115_v34  ;;  %v1116_v35 = vand.u32 4294901760, %v1115_v34 }
 0x3cb   : > { %1389 = vmatpush.msrb.mxu2 %v8369_v7 }
 0x3cc   : > { %1193 = vmatmul.f32.vlgmr.msrb.gmra.mxu3 %v1116_v35  ;;  %v1117_v36 = vsub.f32 %v1115_v34, %v1116_v35 }
 0x3cd   : > { %1411 = vmatpush.msrb.mxu3 %v8355_v3 }
 0x3ce   : > { %v1118_v37 = vand.u32 4294901760, %v1117_v36 }
 0x3d0   : > { %1119 = vmatmul.f32.vlgmr.msrb.gmra.mxu0 %v1118_v37  ;;  %1239 = vmatmul.f32.vlgmr.msra.gmra.mxu1 %v1114_v32 }
 0x3d1   : > { %1340 = vmatpush.msrb.mxu0 %v8361_v4  ;;  %1487 = vmatpush.msra.mxu1 %v8375_v11 }
 0x3d8   : > { %1217 = vmatmul.f32.vlgmr.msra.gmra.mxu0 %v1114_v32 }
 0x3d9   : > { %1457 = vmatpush.msra.mxu0 %v8355_v3 }
 0x437   : > { %v1089_v38 = vpop.permute.xlu1 %1088  ;;  %v1086_v39 = vpop.permute.xlu0 %1085 }
 0x438   : > { %v1091_v40 = vsel %vm77_vm2, %v1086_v39, %v1089_v38 }
 0x439   : > { %v1093_v41 = vmul.f32 %v1091_v40, %v1091_v40 }
 0x43b   : > { %v1094_v47 = vadd.f32 %v1093_v41, %v1092_v44 }
 0x43d   : > { %v1243_v50 = vmul.f32 %v8338_v1, %v1094_v47 }
 0x43f   : > { %v1244_v55 = vmul.f32 %v1243_v50, %v1091_v40 }
 0x445   : > { %v1146_v42 = vpop.f32.mrf.mxu1 }
 0x44d   : > { %v1120_v43 = vpop.f32.mrf.mxu0  ;;  %v1170_v46 = vpop.f32.mrf.mxu2 }
 0x44e   : > { %v1147_v45 = vadd.f32 %v1146_v42, %v1120_v43  ;;  %v1240_v54 = vpop.f32.mrf.mxu1 }
 0x44f   : > { %v1194_v49 = vpop.f32.mrf.mxu3 }
 0x450   : > { %v1171_v48 = vadd.f32 %v1170_v46, %v1147_v45 }
 0x452   : > { %v1195_v51 = vadd.f32 %v1194_v49, %v1171_v48 }
 0x455   : > { %v1218_v52 = vpop.f32.mrf.mxu0 }
 0x456   : > { %v1219_v53 = vadd.f32 %v1218_v52, %v1195_v51 }
 0x458   : > { %v1241_v56 = vadd.f32 %v1240_v54, %v1219_v53 }
 0x45a   : > { %v8479_v57 = vadd.f32 %v1244_v55, %v1241_v56 }
 0x45c   : > { %v1246_v58 = vmul.f32 0.00012626263, %v8479_v57  ;;  %v1248_v24 = vmul.f32 4.7348483e-05, %v8479_v57  ;;  %v1250_v25 = vmul.f32 0.000617284, %v8479_v57 }
 0x45d   : > { %v1254_v28 = vmul.f32 0.001796891, %v8479_v57  ;;  %v1252_v29 = vmul.f32 0.0018640143, %v8479_v57 }
 0x45e   : > { %v1247_v59 = vadd.f32 %v1246_v58, %v8461_v30  ;;  %v1249_v32 = vadd.f32 %v1248_v24, %v8461_v30  ;;  %v1251_v34 = vadd.f32 %v1250_v25, %v8461_v30 }
 0x45f   : > { %v1255_v38 = vadd.f32 %v1254_v28, %v8461_v30  ;;  %v1253_v39 = vadd.f32 %v1252_v29, %v8461_v30 }
 0x460   : > { %1262 = vrot.lane.b32.xlu0 %v1247_v59, %s8306_s28  ;;  %1259 = vrot.lane.b32.xlu2 %v1247_v59, %s8305_s27  ;;  %v1269_v33 = vsel %vm82_vm1, %v1247_v59, 0  ;;  %v1266_v13 = vmul.f32 %v1247_v59, %v1247_v59 }
 0x461   : > { %v1288_v60 = vand.u32 4294901760, %v1269_v33 }
 0x463   : > { %1319 = vmatmul.f32.vlgmr.msra.gmra.mxu3 %v1288_v60  ;;  %v1289_v2 = vsub.f32 %v1269_v33, %v1288_v60 }
 0x464   : > { %1533 = vmatpush.msra.mxu3 %v8355_v3 }
 0x465   : > { %1343 = vmatmul.f32.vlgmr.msrb.gmra.mxu0 %v1289_v2  ;;  %v1290_v61 = vand.u32 4294901760, %v1289_v2 }
 0x466   : > { %1559 = vmatpush.msrb.mxu0 %v8369_v7 }
 0x467   : > { %1367 = vmatmul.f32.vlgmr.msrb.gmra.mxu1 %v1290_v61  ;;  %v1291_v62 = vsub.f32 %v1289_v2, %v1290_v61 }
 0x468   : > { %1581 = vmatpush.msrb.mxu1 %v8355_v3 }
 0x469   : > { %v1292_v63 = vand.u32 4294901760, %v1291_v62 }
 0x46b   : > { %1293 = vmatmul.f32.vlgmr.msra.gmra.mxu2 %v1292_v63  ;;  %1413 = vmatmul.f32.vlgmr.msrb.gmra.mxu3 %v1288_v60 }
 0x46c   : > { %1510 = vmatpush.msra.mxu2 %v8361_v4  ;;  %1657 = vmatpush.msrb.mxu3 %v8375_v11 }
 0x473   : > { %1391 = vmatmul.f32.vlgmr.msrb.gmra.mxu2 %v1288_v60 }
 0x474   : > { %1627 = vmatpush.msrb.mxu2 %v8355_v3 }
 0x4ba   : > { %v1260_v6 = vpop.permute.xlu2 %1259 }
 0x4d2   : > { %v1263_v5 = vpop.permute.xlu0 %1262 }
 0x4d3   : > { %v1265_v8 = vsel %vm77_vm2, %v1260_v6, %v1263_v5 }
 0x4d4   : > { %v1267_v9 = vmul.f32 %v1265_v8, %v1265_v8 }
 0x4d6   : > { %v1268_v16 = vadd.f32 %v1267_v9, %v1266_v13 }
 0x4d8   : > { %v1417_v19 = vmul.f32 %v8338_v1, %v1268_v16 }
 0x4da   : > { %v1418_v26 = vmul.f32 %v1417_v19, %v1265_v8 }
 0x4e2   : > { %v1344_v15 = vpop.f32.mrf.mxu0 }
 0x4e4   : > { %v1368_v18 = vpop.f32.mrf.mxu1 }
 0x4e6   : > { %v1320_v10 = vpop.f32.mrf.mxu3 }
 0x4ee   : > { %v1294_v12 = vpop.f32.mrf.mxu2  ;;  %v1414_v23 = vpop.f32.mrf.mxu3 }
 0x4ef   : > { %v1321_v14 = vadd.f32 %v1320_v10, %v1294_v12  ;;  %v1256_v12 = vmul.f32 5.754156e-05, %v8479_v57 }
 0x4f1   : > { %v1345_v17 = vadd.f32 %v1344_v15, %v1321_v14 }
 0x4f3   : > { %v1369_v20 = vadd.f32 %v1368_v18, %v1345_v17  ;;  %v1257_v17 = vadd.f32 %v1256_v12, %v8461_v30 }
 0x4f6   : > { %v1392_v21 = vpop.f32.mrf.mxu2 }
 0x4f7   : > { %v1393_v22 = vadd.f32 %v1392_v21, %v1369_v20 }
 0x4f9   : > { %v1415_v27 = vadd.f32 %v1414_v23, %v1393_v22 }
 0x4fb   : > { %v1419_v31 = vadd.f32 %v1418_v26, %v1415_v27 }
 0x4fd   : > { %v1426_v35 = vmul.f32 -0.006791399, %v1419_v31  ;;  %v1420_v36 = vmul.f32 0.00014204545, %v1419_v31  ;;  %v1422_v37 = vmul.f32 -0.0023569025, %v1419_v31 }
 0x4fe   : > { %v1424_v40 = vmul.f32 -0.007320577, %v1419_v31 }
 0x4ff   : > { %v1421_v41 = vadd.f32 %v1420_v36, %v1249_v32  ;;  %v1423_v42 = vadd.f32 %v1422_v37, %v1251_v34  ;;  %v1427_v43 = vadd.f32 %v1426_v35, %v1255_v38 }
 0x500   : > { %v1425_v44 = vadd.f32 %v1424_v40, %v1253_v39 }
 0x501   : > { %1432 = vrot.lane.b32.xlu2 %v1421_v41, %s8306_s28  ;;  %1429 = vrot.lane.b32.xlu1 %v1421_v41, %s8305_s27  ;;  %v1439_v45 = vsel %vm82_vm1, %v1421_v41, 0  ;;  %v1436_v58 = vmul.f32 %v1421_v41, %v1421_v41 }
 0x502   : > { %v1458_v46 = vand.u32 4294901760, %v1439_v45 }
 0x504   : > { %1489 = vmatmul.f32.vlgmr.msra.gmra.mxu1 %v1458_v46  ;;  %v1459_v47 = vsub.f32 %v1439_v45, %v1458_v46 }
 0x505   : > { %1703 = vmatpush.msra.mxu1 %v8355_v3 }
 0x506   : > { %1513 = vmatmul.f32.vlgmr.msra.gmra.mxu2 %v1459_v47  ;;  %v1460_v48 = vand.u32 4294901760, %v1459_v47 }
 0x507   : > { %1729 = vmatpush.msra.mxu2 %v8369_v7 }
 0x508   : > { %1537 = vmatmul.f32.vlgmr.msra.gmra.mxu3 %v1460_v48  ;;  %v1461_v49 = vsub.f32 %v1459_v47, %v1460_v48 }
 0x509   : > { %1751 = vmatpush.msra.mxu3 %v8355_v3 }
 0x50a   : > { %v1462_v50 = vand.u32 4294901760, %v1461_v49 }
 0x50c   : > { %1463 = vmatmul.f32.vlgmr.msra.gmra.mxu0 %v1462_v50  ;;  %1583 = vmatmul.f32.vlgmr.msrb.gmra.mxu1 %v1458_v46 }
 0x50d   : > { %1680 = vmatpush.msra.mxu0 %v8361_v4  ;;  %1825 = vmatpush.msrb.mxu1 %v8375_v11 }
 0x514   : > { %1561 = vmatmul.f32.vlgmr.msrb.gmra.mxu0 %v1458_v46 }
 0x515   : > { %1795 = vmatpush.msrb.mxu0 %v8355_v3 }
 0x55b   : > { %v1433_v52 = vpop.permute.xlu2 %1432 }
 0x573   : > { %v1430_v51 = vpop.permute.xlu1 %1429 }
 0x574   : > { %v1435_v53 = vsel %vm77_vm2, %v1430_v51, %v1433_v52 }
 0x575   : > { %v1437_v54 = vmul.f32 %v1435_v53, %v1435_v53 }
 0x577   : > { %v1438_v60 = vadd.f32 %v1437_v54, %v1436_v58 }
 0x579   : > { %v1587_v62 = vmul.f32 %v8338_v1, %v1438_v60 }
 0x57b   : > { %v1588_v9 = vmul.f32 %v1587_v62, %v1435_v53 }
 0x581   : > { %v1490_v55 = vpop.f32.mrf.mxu1 }
 0x589   : > { %v1464_v56 = vpop.f32.mrf.mxu0  ;;  %v1514_v33 = vpop.f32.mrf.mxu2 }
 0x58a   : > { %v1491_v59 = vadd.f32 %v1490_v55, %v1464_v56  ;;  %v1584_v8 = vpop.f32.mrf.mxu1 }
 0x58b   : > { %v1538_v61 = vpop.f32.mrf.mxu3 }
 0x58c   : > { %v1515_v2 = vadd.f32 %v1514_v33, %v1491_v59 }
 0x58e   : > { %v1539_v63 = vadd.f32 %v1538_v61, %v1515_v2 }
 0x591   : > { %v1562_v5 = vpop.f32.mrf.mxu0 }
 0x592   : > { %v1563_v6 = vadd.f32 %v1562_v5, %v1539_v63 }
 0x594   : > { %v1585_v10 = vadd.f32 %v1584_v8, %v1563_v6 }
 0x596   : > { %v1589_v13 = vadd.f32 %v1588_v9, %v1585_v10 }
 0x598   : > { %v1596_v14 = vmul.f32 0.00028360877, %v1589_v13  ;;  %v1590_v15 = vmul.f32 0.002244669, %v1589_v13  ;;  %v1592_v16 = vmul.f32 0.0062013213, %v1589_v13 }
 0x599   : > { %v1594_v18 = vmul.f32 0.0056227418, %v1589_v13 }
 0x59a   : > { %v1591_v19 = vadd.f32 %v1590_v15, %v1423_v42  ;;  %v1593_v20 = vadd.f32 %v1592_v16, %v1425_v44  ;;  %v1597_v21 = vadd.f32 %v1596_v14, %v1257_v17 }
 0x59b   : > { %v1595_v22 = vadd.f32 %v1594_v18, %v1427_v43 }
 0x59c   : > { %1602 = vrot.lane.b32.xlu1 %v1591_v19, %s8306_s28  ;;  %1599 = vrot.lane.b32.xlu0 %v1591_v19, %s8305_s27  ;;  %v1609_v23 = vsel %vm82_vm1, %v1591_v19, 0  ;;  %v1606_v35 = vmul.f32 %v1591_v19, %v1591_v19 }
 0x59d   : > { %v1628_v24 = vand.u32 4294901760, %v1609_v23 }
 0x59f   : > { %1659 = vmatmul.f32.vlgmr.msrb.gmra.mxu3 %v1628_v24  ;;  %v1629_v57 = vsub.f32 %v1609_v23, %v1628_v24 }
 0x5a0   : > { %1871 = vmatpush.msrb.mxu3 %v8355_v3 }
 0x5a1   : > { %1683 = vmatmul.f32.vlgmr.msra.gmra.mxu0 %v1629_v57  ;;  %v1630_v25 = vand.u32 4294901760, %v1629_v57 }
 0x5a2   : > { %1897 = vmatpush.msra.mxu0 %v8369_v7 }
 0x5a3   : > { %1707 = vmatmul.f32.vlgmr.msra.gmra.mxu1 %v1630_v25  ;;  %v1631_v30 = vsub.f32 %v1629_v57, %v1630_v25 }
 0x5a4   : > { %1919 = vmatpush.msra.mxu1 %v8355_v3 }
 0x5a5   : > { %v1632_v26 = vand.u32 4294901760, %v1631_v30 }
 0x5a7   : > { %1633 = vmatmul.f32.vlgmr.msrb.gmra.mxu2 %v1632_v26  ;;  %1753 = vmatmul.f32.vlgmr.msra.gmra.mxu3 %v1628_v24 }
 0x5a8   : > { %1848 = vmatpush.msrb.mxu2 %v8361_v4  ;;  %1991 = vmatpush.msra.mxu3 %v8375_v11 }
 0x5af   : > { %1731 = vmatmul.f32.vlgmr.msra.gmra.mxu2 %v1628_v24 }
 0x5b0   : > { %1961 = vmatpush.msra.mxu2 %v8355_v3 }
 0x60e   : > { %v1603_v27 = vpop.permute.xlu1 %1602  ;;  %v1600_v28 = vpop.permute.xlu0 %1599 }
 0x60f   : > { %v1605_v29 = vsel %vm77_vm2, %v1600_v28, %v1603_v27 }
 0x610   : > { %v1607_v31 = vmul.f32 %v1605_v29, %v1605_v29 }
 0x612   : > { %v1608_v38 = vadd.f32 %v1607_v31, %v1606_v35 }
 0x614   : > { %v1757_v41 = vmul.f32 %v8338_v1, %v1608_v38 }
 0x616   : > { %v1758_v46 = vmul.f32 %v1757_v41, %v1605_v29 }
 0x61e   : > { %v1684_v37 = vpop.f32.mrf.mxu0 }
 0x620   : > { %v1708_v40 = vpop.f32.mrf.mxu1 }
 0x622   : > { %v1660_v32 = vpop.f32.mrf.mxu3 }
 0x62a   : > { %v1634_v34 = vpop.f32.mrf.mxu2  ;;  %v1754_v45 = vpop.f32.mrf.mxu3 }
 0x62b   : > { %v1661_v36 = vadd.f32 %v1660_v32, %v1634_v34 }
 0x62d   : > { %v1685_v39 = vadd.f32 %v1684_v37, %v1661_v36 }
 0x62f   : > { %v1709_v42 = vadd.f32 %v1708_v40, %v1685_v39 }
 0x632   : > { %v1732_v43 = vpop.f32.mrf.mxu2 }
 0x633   : > { %v1733_v44 = vadd.f32 %v1732_v43, %v1709_v42 }
 0x635   : > { %v1755_v47 = vadd.f32 %v1754_v45, %v1733_v44 }
 0x637   : > { %v1759_v48 = vadd.f32 %v1758_v46, %v1755_v47 }
 0x639   : > { %v1762_v49 = vmul.f32 0.00017576331, %v1759_v48  ;;  %v1764_v50 = vmul.f32 0.00041101116, %v1759_v48  ;;  %v1760_v51 = vmul.f32 -0.00018359175, %v1759_v48 }
 0x63b   : > { %v1761_v52 = vadd.f32 %v1760_v51, %v1593_v20  ;;  %v1765_v53 = vadd.f32 %v1764_v50, %v1597_v21  ;;  %v1763_v54 = vadd.f32 %v1762_v49, %v1595_v22 }
 0x63d   : > { %1770 = vrot.lane.b32.xlu0 %v1761_v52, %s8306_s28  ;;  %1767 = vrot.lane.b32.xlu2 %v1761_v52, %s8305_s27  ;;  %v1777_v55 = vsel %vm82_vm1, %v1761_v52, 0  ;;  %v1774_v8 = vmul.f32 %v1761_v52, %v1761_v52 }
 0x63e   : > { %v1796_v56 = vand.u32 4294901760, %v1777_v55 }
 0x640   : > { %1827 = vmatmul.f32.vlgmr.msrb.gmra.mxu1 %v1796_v56  ;;  %v1797_v58 = vsub.f32 %v1777_v55, %v1796_v56 }
 0x641   : > { %2037 = vmatpush.msrb.mxu1 %v8355_v3 }
 0x642   : > { %1851 = vmatmul.f32.vlgmr.msrb.gmra.mxu2 %v1797_v58  ;;  %v1798_v59 = vand.u32 4294901760, %v1797_v58 }
 0x643   : > { %2063 = vmatpush.msrb.mxu2 %v8369_v7 }
 0x644   : > { %1875 = vmatmul.f32.vlgmr.msrb.gmra.mxu3 %v1798_v59  ;;  %v1799_v33 = vsub.f32 %v1797_v58, %v1798_v59 }
 0x645   : > { %2085 = vmatpush.msrb.mxu3 %v8355_v3 }
 0x646   : > { %v1800_v60 = vand.u32 4294901760, %v1799_v33 }
 0x648   : > { %1801 = vmatmul.f32.vlgmr.msrb.gmra.mxu0 %v1800_v60  ;;  %1921 = vmatmul.f32.vlgmr.msra.gmra.mxu1 %v1796_v56 }
 0x649   : > { %2014 = vmatpush.msrb.mxu0 %v8361_v4  ;;  %2155 = vmatpush.msra.mxu1 %v8375_v11 }
 0x650   : > { %1899 = vmatmul.f32.vlgmr.msra.gmra.mxu0 %v1796_v56 }
 0x651   : > { %2125 = vmatpush.msra.mxu0 %v8355_v3 }
 0x697   : > { %v1768_v61 = vpop.permute.xlu2 %1767 }
 0x6af   : > { %v1771_v2 = vpop.permute.xlu0 %1770 }
 0x6b0   : > { %v1773_v62 = vsel %vm77_vm2, %v1768_v61, %v1771_v2 }
 0x6b1   : > { %v1775_v63 = vmul.f32 %v1773_v62, %v1773_v62 }
 0x6b3   : > { %v1776_v12 = vadd.f32 %v1775_v63, %v1774_v8 }
 0x6b5   : > { %v1925_v15 = vmul.f32 %v8338_v1, %v1776_v12 }
 0x6b7   : > { %v1926_v20 = vmul.f32 %v1925_v15, %v1773_v62 }
 0x6bd   : > { %v1828_v5 = vpop.f32.mrf.mxu1 }
 0x6c5   : > { %v1802_v6 = vpop.f32.mrf.mxu0  ;;  %v1852_v10 = vpop.f32.mrf.mxu2 }
 0x6c6   : > { %v1829_v9 = vadd.f32 %v1828_v5, %v1802_v6  ;;  %v1922_v19 = vpop.f32.mrf.mxu1 }
 0x6c7   : > { %v1876_v14 = vpop.f32.mrf.mxu3 }
 0x6c8   : > { %v1853_v13 = vadd.f32 %v1852_v10, %v1829_v9 }
 0x6ca   : > { %v1877_v16 = vadd.f32 %v1876_v14, %v1853_v13 }
 0x6cd   : > { %v1900_v17 = vpop.f32.mrf.mxu0 }
 0x6ce   : > { %v1901_v18 = vadd.f32 %v1900_v17, %v1877_v16 }
 0x6d0   : > { %v1923_v21 = vadd.f32 %v1922_v19, %v1901_v18 }
 0x6d2   : > { %v1927_v22 = vadd.f32 %v1926_v20, %v1923_v21 }
 0x6d4   : > { %v1928_v23 = vmul.f32 -0.00017268391, %v1927_v22  ;;  %v1930_v24 = vmul.f32 -0.00020352032, %v1927_v22 }
 0x6d6   : > { %v1931_v57 = vadd.f32 %v1930_v24, %v1765_v53  ;;  %v1929_v25 = vadd.f32 %v1928_v23, %v1763_v54 }
 0x6d8   : > { %1936 = vrot.lane.b32.xlu2 %v1929_v25, %s8306_s28  ;;  %1933 = vrot.lane.b32.xlu1 %v1929_v25, %s8305_s27  ;;  %v1943_v30 = vsel %vm82_vm1, %v1929_v25, 0  ;;  %v1940_v39 = vmul.f32 %v1929_v25, %v1929_v25 }
 0x6d9   : > { %v1962_v26 = vand.u32 4294901760, %v1943_v30 }
 0x6db   : > { %1993 = vmatmul.f32.vlgmr.msra.gmra.mxu3 %v1962_v26  ;;  %v1963_v27 = vsub.f32 %v1943_v30, %v1962_v26 }
 0x6dc   : > { %2201 = vmatpush.msra.mxu3 %v8355_v3 }
 0x6dd   : > { %2017 = vmatmul.f32.vlgmr.msrb.gmra.mxu0 %v1963_v27  ;;  %v1964_v28 = vand.u32 4294901760, %v1963_v27 }
 0x6de   : > { %2227 = vmatpush.msrb.mxu0 %v8369_v7 }
 0x6df   : > { %2041 = vmatmul.f32.vlgmr.msrb.gmra.mxu1 %v1964_v28  ;;  %v1965_v29 = vsub.f32 %v1963_v27, %v1964_v28 }
 0x6e0   : > { %2249 = vmatpush.msrb.mxu1 %v8355_v3 }
 0x6e1   : > { %v1966_v31 = vand.u32 4294901760, %v1965_v29 }
 0x6e3   : > { %1967 = vmatmul.f32.vlgmr.msra.gmra.mxu2 %v1966_v31  ;;  %2087 = vmatmul.f32.vlgmr.msrb.gmra.mxu3 %v1962_v26 }
 0x6e4   : > { %2178 = vmatpush.msra.mxu2 %v8361_v4  ;;  %2329 = vmatpush.msrb.mxu3 %v8375_v11 }
 0x6eb   : > { %2065 = vmatmul.f32.vlgmr.msrb.gmra.mxu2 %v1962_v26 }
 0x6ec   : > { %2299 = vmatpush.msrb.mxu2 %v8355_v3 }
 0x732   : > { %v1937_v34 = vpop.permute.xlu2 %1936 }
 0x74a   : > { %v1934_v32 = vpop.permute.xlu1 %1933 }
 0x74b   : > { %v1939_v35 = vsel %vm77_vm2, %v1934_v32, %v1937_v34 }
 0x74c   : > { %v1941_v36 = vmul.f32 %v1939_v35, %v1939_v35 }
 0x74e   : > { %v1942_v42 = vadd.f32 %v1941_v36, %v1940_v39 }
 0x750   : > { %v2091_v45 = vmul.f32 %v8338_v1, %v1942_v42 }
 0x752   : > { %v2092_v50 = vmul.f32 %v2091_v45, %v1939_v35 }
 0x75a   : > { %v2018_v41 = vpop.f32.mrf.mxu0 }
 0x75c   : > { %v2042_v44 = vpop.f32.mrf.mxu1 }
 0x75e   : > { %v1994_v37 = vpop.f32.mrf.mxu3 }
 0x766   : > { %v1968_v38 = vpop.f32.mrf.mxu2  ;;  %v2088_v49 = vpop.f32.mrf.mxu3 }
 0x767   : > { %v1995_v40 = vadd.f32 %v1994_v37, %v1968_v38 }
 0x769   : > { %v2019_v43 = vadd.f32 %v2018_v41, %v1995_v40 }
 0x76b   : > { %v2043_v46 = vadd.f32 %v2042_v44, %v2019_v43 }
 0x76e   : > { %v2066_v47 = vpop.f32.mrf.mxu2 }
 0x76f   : > { %v2067_v48 = vadd.f32 %v2066_v47, %v2043_v46 }
 0x771   : > { %v2089_v51 = vadd.f32 %v2088_v49, %v2067_v48 }
 0x773   : > { %v2093_v52 = vadd.f32 %v2092_v50, %v2089_v51 }
 0x775   : > { %v2094_v53 = vmul.f32 8.2671955e-05, %v2093_v52 }
 0x777   : > { %v8548_v54 = vadd.f32 %v2094_v53, %v1931_v57 }
 0x779   : > { %2100 = vrot.lane.b32.xlu1 %v8548_v54, %s8306_s28  ;;  %2097 = vrot.lane.b32.xlu0 %v8548_v54, %s8305_s27  ;;  %v2107_v55 = vsel %vm82_vm1, %v8548_v54, 0  ;;  %v2104_v8 = vmul.f32 %v8548_v54, %v8548_v54 }
 0x77a   : > { %v2126_v56 = vand.u32 4294901760, %v2107_v55 }
 0x77c   : > { %2157 = vmatmul.f32.vlgmr.msra.gmra.mxu1 %v2126_v56  ;;  %v2127_v58 = vsub.f32 %v2107_v55, %v2126_v56 }
 0x77d   : > { %2375 = vmatpush.msra.mxu1 %v8355_v3 }
 0x77e   : > { %2181 = vmatmul.f32.vlgmr.msra.gmra.mxu2 %v2127_v58  ;;  %v2128_v59 = vand.u32 4294901760, %v2127_v58 }
 0x77f   : > { %2401 = vmatpush.msra.mxu2 %v8369_v7 }
 0x780   : > { %2205 = vmatmul.f32.vlgmr.msra.gmra.mxu3 %v2128_v59  ;;  %v2129_v33 = vsub.f32 %v2127_v58, %v2128_v59 }
 0x781   : > { %2423 = vmatpush.msra.mxu3 %v8355_v3 }
 0x782   : > { %v2130_v60 = vand.u32 4294901760, %v2129_v33 }
 0x784   : > { %2131 = vmatmul.f32.vlgmr.msra.gmra.mxu0 %v2130_v60  ;;  %2251 = vmatmul.f32.vlgmr.msrb.gmra.mxu1 %v2126_v56 }
 0x785   : > { %2352 = vmatpush.msra.mxu0 %v8361_v4  ;;  %2499 = vmatpush.msrb.mxu1 %v8375_v11 }
 0x78c   : > { %2229 = vmatmul.f32.vlgmr.msrb.gmra.mxu0 %v2126_v56 }
 0x78d   : > { %2469 = vmatpush.msrb.mxu0 %v8355_v3 }
 0x7eb   : > { %v2101_v2 = vpop.permute.xlu1 %2100  ;;  %v2098_v61 = vpop.permute.xlu0 %2097 }
 0x7ec   : > { %v2103_v62 = vsel %vm77_vm2, %v2098_v61, %v2101_v2 }
 0x7ed   : > { %v2105_v63 = vmul.f32 %v2103_v62, %v2103_v62 }
 0x7ef   : > { %v2106_v12 = vadd.f32 %v2105_v63, %v2104_v8 }
 0x7f1   : > { %v2255_v15 = vmul.f32 %v8338_v1, %v2106_v12 }
 0x7f3   : > { %v2256_v20 = vmul.f32 %v2255_v15, %v2103_v62 }
 0x7f9   : > { %v2158_v5 = vpop.f32.mrf.mxu1 }
 0x801   : > { %v2132_v6 = vpop.f32.mrf.mxu0  ;;  %v2182_v10 = vpop.f32.mrf.mxu2 }
 0x802   : > { %v2159_v9 = vadd.f32 %v2158_v5, %v2132_v6  ;;  %v2252_v19 = vpop.f32.mrf.mxu1 }
 0x803   : > { %v2206_v14 = vpop.f32.mrf.mxu3 }
 0x804   : > { %v2183_v13 = vadd.f32 %v2182_v10, %v2159_v9 }
 0x806   : > { %v2207_v16 = vadd.f32 %v2206_v14, %v2183_v13 }
 0x809   : > { %v2230_v17 = vpop.f32.mrf.mxu0 }
 0x80a   : > { %v2231_v18 = vadd.f32 %v2230_v17, %v2207_v16 }
 0x80c   : > { %v2253_v21 = vadd.f32 %v2252_v19, %v2231_v18 }
 0x80e   : > { %v8566_v22 = vadd.f32 %v2256_v20, %v2253_v21 }
 0x810   : > { %v2258_v23 = vmul.f32 0.00012626263, %v8566_v22  ;;  %v2260_v48 = vmul.f32 4.7348483e-05, %v8566_v22  ;;  %v2262_v49 = vmul.f32 0.000617284, %v8566_v22 }
 0x811   : > { %v2266_v52 = vmul.f32 0.001796891, %v8566_v22  ;;  %v2264_v53 = vmul.f32 0.0018640143, %v8566_v22 }
 0x812   : > { %v2259_v24 = vadd.f32 %v2258_v23, %v8548_v54  ;;  %v2261_v56 = vadd.f32 %v2260_v48, %v8548_v54  ;;  %v2263_v58 = vadd.f32 %v2262_v49, %v8548_v54 }
 0x813   : > { %v2267_v2 = vadd.f32 %v2266_v52, %v8548_v54  ;;  %v2265_v61 = vadd.f32 %v2264_v53, %v8548_v54 }
 0x814   : > { %2274 = vrot.lane.b32.xlu0 %v2259_v24, %s8306_s28  ;;  %2271 = vrot.lane.b32.xlu2 %v2259_v24, %s8305_s27  ;;  %v2281_v57 = vsel %vm82_vm1, %v2259_v24, 0  ;;  %v2278_v37 = vmul.f32 %v2259_v24, %v2259_v24 }
 0x815   : > { %v2300_v25 = vand.u32 4294901760, %v2281_v57 }
 0x817   : > { %2331 = vmatmul.f32.vlgmr.msrb.gmra.mxu3 %v2300_v25  ;;  %v2301_v30 = vsub.f32 %v2281_v57, %v2300_v25 }
 0x818   : > { %2545 = vmatpush.msrb.mxu3 %v8355_v3 }
 0x819   : > { %2355 = vmatmul.f32.vlgmr.msra.gmra.mxu0 %v2301_v30  ;;  %v2302_v26 = vand.u32 4294901760, %v2301_v30 }
 0x81a   : > { %2571 = vmatpush.msra.mxu0 %v8369_v7 }
 0x81b   : > { %2379 = vmatmul.f32.vlgmr.msra.gmra.mxu1 %v2302_v26  ;;  %v2303_v27 = vsub.f32 %v2301_v30, %v2302_v26 }
 0x81c   : > { %2593 = vmatpush.msra.mxu1 %v8355_v3 }
 0x81d   : > { %v2304_v28 = vand.u32 4294901760, %v2303_v27 }
 0x81f   : > { %2305 = vmatmul.f32.vlgmr.msrb.gmra.mxu2 %v2304_v28  ;;  %2425 = vmatmul.f32.vlgmr.msra.gmra.mxu3 %v2300_v25 }
 0x820   : > { %2522 = vmatpush.msrb.mxu2 %v8361_v4  ;;  %2669 = vmatpush.msra.mxu3 %v8375_v11 }
 0x827   : > { %2403 = vmatmul.f32.vlgmr.msra.gmra.mxu2 %v2300_v25 }
 0x828   : > { %2639 = vmatpush.msra.mxu2 %v8355_v3 }
 0x86e   : > { %v2272_v31 = vpop.permute.xlu2 %2271 }
 0x886   : > { %v2275_v29 = vpop.permute.xlu0 %2274 }
 0x887   : > { %v2277_v32 = vsel %vm77_vm2, %v2272_v31, %v2275_v29 }
 0x888   : > { %v2279_v34 = vmul.f32 %v2277_v32, %v2277_v32 }
 0x88a   : > { %v2280_v40 = vadd.f32 %v2279_v34, %v2278_v37 }
 0x88c   : > { %v2429_v43 = vmul.f32 %v8338_v1, %v2280_v40 }
 0x88e   : > { %v2430_v50 = vmul.f32 %v2429_v43, %v2277_v32 }
 0x896   : > { %v2356_v39 = vpop.f32.mrf.mxu0 }
 0x898   : > { %v2380_v42 = vpop.f32.mrf.mxu1 }
 0x89a   : > { %v2332_v35 = vpop.f32.mrf.mxu3 }
 0x8a2   : > { %v2306_v36 = vpop.f32.mrf.mxu2  ;;  %v2426_v47 = vpop.f32.mrf.mxu3 }
 0x8a3   : > { %v2333_v38 = vadd.f32 %v2332_v35, %v2306_v36  ;;  %v2268_v36 = vmul.f32 5.754156e-05, %v8566_v22 }
 0x8a5   : > { %v2357_v41 = vadd.f32 %v2356_v39, %v2333_v38 }
 0x8a7   : > { %v2381_v44 = vadd.f32 %v2380_v42, %v2357_v41  ;;  %v2269_v41 = vadd.f32 %v2268_v36, %v8548_v54 }
 0x8aa   : > { %v2404_v45 = vpop.f32.mrf.mxu2 }
 0x8ab   : > { %v2405_v46 = vadd.f32 %v2404_v45, %v2381_v44 }
 0x8ad   : > { %v2427_v51 = vadd.f32 %v2426_v47, %v2405_v46 }
 0x8af   : > { %v2431_v55 = vadd.f32 %v2430_v50, %v2427_v51 }
 0x8b1   : > { %v2438_v59 = vmul.f32 -0.006791399, %v2431_v55  ;;  %v2432_v33 = vmul.f32 0.00014204545, %v2431_v55  ;;  %v2434_v60 = vmul.f32 -0.0023569025, %v2431_v55 }
 0x8b2   : > { %v2436_v62 = vmul.f32 -0.007320577, %v2431_v55 }
 0x8b3   : > { %v2433_v63 = vadd.f32 %v2432_v33, %v2261_v56  ;;  %v2435_v5 = vadd.f32 %v2434_v60, %v2263_v58  ;;  %v2439_v6 = vadd.f32 %v2438_v59, %v2267_v2 }
 0x8b4   : > { %v2437_v8 = vadd.f32 %v2436_v62, %v2265_v61 }
 0x8b5   : > { %2444 = vrot.lane.b32.xlu2 %v2433_v63, %s8306_s28  ;;  %2441 = vrot.lane.b32.xlu1 %v2433_v63, %s8305_s27  ;;  %v2451_v9 = vsel %vm82_vm1, %v2433_v63, 0  ;;  %v2448_v23 = vmul.f32 %v2433_v63, %v2433_v63 }
 0x8b6   : > { %v2470_v10 = vand.u32 4294901760, %v2451_v9 }
 0x8b8   : > { %2501 = vmatmul.f32.vlgmr.msrb.gmra.mxu1 %v2470_v10  ;;  %v2471_v12 = vsub.f32 %v2451_v9, %v2470_v10 }
 0x8b9   : > { %2715 = vmatpush.msrb.mxu1 %v8355_v3 }
 0x8ba   : > { %2525 = vmatmul.f32.vlgmr.msrb.gmra.mxu2 %v2471_v12  ;;  %v2472_v13 = vand.u32 4294901760, %v2471_v12 }
 0x8bb   : > { %2741 = vmatpush.msrb.mxu2 %v8369_v7 }
 0x8bc   : > { %2549 = vmatmul.f32.vlgmr.msrb.gmra.mxu3 %v2472_v13  ;;  %v2473_v14 = vsub.f32 %v2471_v12, %v2472_v13 }
 0x8bd   : > { %2763 = vmatpush.msrb.mxu3 %v8355_v3 }
 0x8be   : > { %v2474_v15 = vand.u32 4294901760, %v2473_v14 }
 0x8c0   : > { %2475 = vmatmul.f32.vlgmr.msrb.gmra.mxu0 %v2474_v15  ;;  %2595 = vmatmul.f32.vlgmr.msra.gmra.mxu1 %v2470_v10 }
 0x8c1   : > { %2692 = vmatpush.msrb.mxu0 %v8361_v4  ;;  %2837 = vmatpush.msra.mxu1 %v8375_v11 }
 0x8c8   : > { %2573 = vmatmul.f32.vlgmr.msra.gmra.mxu0 %v2470_v10 }
 0x8c9   : > { %2807 = vmatpush.msra.mxu0 %v8355_v3 }
 0x90f   : > { %v2445_v17 = vpop.permute.xlu2 %2444 }
 0x927   : > { %v2442_v16 = vpop.permute.xlu1 %2441 }
 0x928   : > { %v2447_v18 = vsel %vm77_vm2, %v2442_v16, %v2445_v17 }
 0x929   : > { %v2449_v19 = vmul.f32 %v2447_v18, %v2447_v18 }
 0x92b   : > { %v2450_v25 = vadd.f32 %v2449_v19, %v2448_v23 }
 0x92d   : > { %v2599_v27 = vmul.f32 %v8338_v1, %v2450_v25 }
 0x92f   : > { %v2600_v34 = vmul.f32 %v2599_v27, %v2447_v18 }
 0x935   : > { %v2502_v20 = vpop.f32.mrf.mxu1 }
 0x93d   : > { %v2476_v21 = vpop.f32.mrf.mxu0  ;;  %v2526_v57 = vpop.f32.mrf.mxu2 }
 0x93e   : > { %v2503_v24 = vadd.f32 %v2502_v20, %v2476_v21  ;;  %v2596_v32 = vpop.f32.mrf.mxu1 }
 0x93f   : > { %v2550_v26 = vpop.f32.mrf.mxu3 }
 0x940   : > { %v2527_v30 = vadd.f32 %v2526_v57, %v2503_v24 }
 0x942   : > { %v2551_v28 = vadd.f32 %v2550_v26, %v2527_v30 }
 0x945   : > { %v2574_v29 = vpop.f32.mrf.mxu0 }
 0x946   : > { %v2575_v31 = vadd.f32 %v2574_v29, %v2551_v28 }
 0x948   : > { %v2597_v35 = vadd.f32 %v2596_v32, %v2575_v31 }
 0x94a   : > { %v2601_v37 = vadd.f32 %v2600_v34, %v2597_v35 }
 0x94c   : > { %v2608_v38 = vmul.f32 0.00028360877, %v2601_v37  ;;  %v2602_v39 = vmul.f32 0.002244669, %v2601_v37  ;;  %v2604_v40 = vmul.f32 0.0062013213, %v2601_v37 }
 0x94d   : > { %v2606_v42 = vmul.f32 0.0056227418, %v2601_v37 }
 0x94e   : > { %v2603_v43 = vadd.f32 %v2602_v39, %v2435_v5  ;;  %v2605_v44 = vadd.f32 %v2604_v40, %v2437_v8  ;;  %v2609_v45 = vadd.f32 %v2608_v38, %v2269_v41 }
 0x94f   : > { %v2607_v46 = vadd.f32 %v2606_v42, %v2439_v6 }
 0x950   : > { %2614 = vrot.lane.b32.xlu1 %v2603_v43, %s8306_s28  ;;  %2611 = vrot.lane.b32.xlu0 %v2603_v43, %s8305_s27  ;;  %v2621_v47 = vsel %vm82_vm1, %v2603_v43, 0  ;;  %v2618_v59 = vmul.f32 %v2603_v43, %v2603_v43 }
 0x951   : > { %v2640_v48 = vand.u32 4294901760, %v2621_v47 }
 0x953   : > { %2671 = vmatmul.f32.vlgmr.msra.gmra.mxu3 %v2640_v48  ;;  %v2641_v22 = vsub.f32 %v2621_v47, %v2640_v48 }
 0x954   : > { %2883 = vmatpush.msra.mxu3 %v8355_v3 }
 0x955   : > { %2695 = vmatmul.f32.vlgmr.msrb.gmra.mxu0 %v2641_v22  ;;  %v2642_v49 = vand.u32 4294901760, %v2641_v22 }
 0x956   : > { %2909 = vmatpush.msrb.mxu0 %v8369_v7 }
 0x957   : > { %2719 = vmatmul.f32.vlgmr.msrb.gmra.mxu1 %v2642_v49  ;;  %v2643_v54 = vsub.f32 %v2641_v22, %v2642_v49 }
 0x958   : > { %2931 = vmatpush.msrb.mxu1 %v8355_v3 }
 0x959   : > { %v2644_v50 = vand.u32 4294901760, %v2643_v54 }
 0x95b   : > { %2645 = vmatmul.f32.vlgmr.msra.gmra.mxu2 %v2644_v50  ;;  %2765 = vmatmul.f32.vlgmr.msrb.gmra.mxu3 %v2640_v48 }
 0x95c   : > { %2860 = vmatpush.msra.mxu2 %v8361_v4  ;;  %3003 = vmatpush.msrb.mxu3 %v8375_v11 }
 0x963   : > { %2743 = vmatmul.f32.vlgmr.msrb.gmra.mxu2 %v2640_v48 }
 0x964   : > { %2973 = vmatpush.msrb.mxu2 %v8355_v3 }
 0x9c2   : > { %v2615_v51 = vpop.permute.xlu1 %2614  ;;  %v2612_v52 = vpop.permute.xlu0 %2611 }
 0x9c3   : > { %v2617_v53 = vsel %vm77_vm2, %v2612_v52, %v2615_v51 }
 0x9c4   : > { %v2619_v55 = vmul.f32 %v2617_v53, %v2617_v53 }
 0x9c6   : > { %v2620_v2 = vadd.f32 %v2619_v55, %v2618_v59 }
 0x9c8   : > { %v2769_v63 = vmul.f32 %v8338_v1, %v2620_v2 }
 0x9ca   : > { %v2770_v10 = vmul.f32 %v2769_v63, %v2617_v53 }
 0x9d2   : > { %v2696_v60 = vpop.f32.mrf.mxu0 }
 0x9d4   : > { %v2720_v62 = vpop.f32.mrf.mxu1 }
 0x9d6   : > { %v2672_v56 = vpop.f32.mrf.mxu3 }
 0x9de   : > { %v2646_v58 = vpop.f32.mrf.mxu2  ;;  %v2766_v9 = vpop.f32.mrf.mxu3 }
 0x9df   : > { %v2673_v33 = vadd.f32 %v2672_v56, %v2646_v58 }
 0x9e1   : > { %v2697_v61 = vadd.f32 %v2696_v60, %v2673_v33 }
 0x9e3   : > { %v2721_v5 = vadd.f32 %v2720_v62, %v2697_v61 }
 0x9e6   : > { %v2744_v6 = vpop.f32.mrf.mxu2 }
 0x9e7   : > { %v2745_v8 = vadd.f32 %v2744_v6, %v2721_v5 }
 0x9e9   : > { %v2767_v12 = vadd.f32 %v2766_v9, %v2745_v8 }
 0x9eb   : > { %v2771_v13 = vadd.f32 %v2770_v10, %v2767_v12 }
 0x9ed   : > { %v2774_v14 = vmul.f32 0.00017576331, %v2771_v13  ;;  %v2776_v15 = vmul.f32 0.00041101116, %v2771_v13  ;;  %v2772_v16 = vmul.f32 -0.00018359175, %v2771_v13 }
 0x9ef   : > { %v2773_v17 = vadd.f32 %v2772_v16, %v2605_v44  ;;  %v2777_v18 = vadd.f32 %v2776_v15, %v2609_v45  ;;  %v2775_v19 = vadd.f32 %v2774_v14, %v2607_v46 }
 0x9f1   : > { %2782 = vrot.lane.b32.xlu0 %v2773_v17, %s8306_s28  ;;  %2779 = vrot.lane.b32.xlu2 %v2773_v17, %s8305_s27  ;;  %v2789_v20 = vsel %vm82_vm1, %v2773_v17, 0  ;;  %v2786_v32 = vmul.f32 %v2773_v17, %v2773_v17 }
 0x9f2   : > { %v2808_v21 = vand.u32 4294901760, %v2789_v20 }
 0x9f4   : > { %2839 = vmatmul.f32.vlgmr.msra.gmra.mxu1 %v2808_v21  ;;  %v2809_v23 = vsub.f32 %v2789_v20, %v2808_v21 }
 0x9f5   : > { %3049 = vmatpush.msra.mxu1 %v8355_v3 }
 0x9f6   : > { %2863 = vmatmul.f32.vlgmr.msra.gmra.mxu2 %v2809_v23  ;;  %v2810_v24 = vand.u32 4294901760, %v2809_v23 }
 0x9f7   : > { %3075 = vmatpush.msra.mxu2 %v8369_v7 }
 0x9f8   : > { %2887 = vmatmul.f32.vlgmr.msra.gmra.mxu3 %v2810_v24  ;;  %v2811_v57 = vsub.f32 %v2809_v23, %v2810_v24 }
 0x9f9   : > { %3097 = vmatpush.msra.mxu3 %v8355_v3 }
 0x9fa   : > { %v2812_v25 = vand.u32 4294901760, %v2811_v57 }
 0x9fc   : > { %2813 = vmatmul.f32.vlgmr.msra.gmra.mxu0 %v2812_v25  ;;  %2933 = vmatmul.f32.vlgmr.msrb.gmra.mxu1 %v2808_v21 }
 0x9fd   : > { %3026 = vmatpush.msra.mxu0 %v8361_v4  ;;  %3167 = vmatpush.msrb.mxu1 %v8375_v11 }
 0xa04   : > { %2911 = vmatmul.f32.vlgmr.msrb.gmra.mxu0 %v2808_v21 }
 0xa05   : > { %3137 = vmatpush.msrb.mxu0 %v8355_v3 }
 0xa4b   : > { %v2780_v26 = vpop.permute.xlu2 %2779 }
 0xa63   : > { %v2783_v30 = vpop.permute.xlu0 %2782 }
 0xa64   : > { %v2785_v27 = vsel %vm77_vm2, %v2780_v26, %v2783_v30 }
 0xa65   : > { %v2787_v28 = vmul.f32 %v2785_v27, %v2785_v27 }
 0xa67   : > { %v2788_v36 = vadd.f32 %v2787_v28, %v2786_v32 }
 0xa69   : > { %v2937_v39 = vmul.f32 %v8338_v1, %v2788_v36 }
 0xa6b   : > { %v2938_v44 = vmul.f32 %v2937_v39, %v2785_v27 }
 0xa71   : > { %v2840_v29 = vpop.f32.mrf.mxu1 }
 0xa79   : > { %v2814_v31 = vpop.f32.mrf.mxu0  ;;  %v2864_v35 = vpop.f32.mrf.mxu2 }
 0xa7a   : > { %v2841_v34 = vadd.f32 %v2840_v29, %v2814_v31  ;;  %v2934_v43 = vpop.f32.mrf.mxu1 }
 0xa7b   : > { %v2888_v38 = vpop.f32.mrf.mxu3 }
 0xa7c   : > { %v2865_v37 = vadd.f32 %v2864_v35, %v2841_v34 }
 0xa7e   : > { %v2889_v40 = vadd.f32 %v2888_v38, %v2865_v37 }
 0xa81   : > { %v2912_v41 = vpop.f32.mrf.mxu0 }
 0xa82   : > { %v2913_v42 = vadd.f32 %v2912_v41, %v2889_v40 }
 0xa84   : > { %v2935_v45 = vadd.f32 %v2934_v43, %v2913_v42 }
 0xa86   : > { %v2939_v46 = vadd.f32 %v2938_v44, %v2935_v45 }
 0xa88   : > { %v2940_v47 = vmul.f32 -0.00017268391, %v2939_v46  ;;  %v2942_v48 = vmul.f32 -0.00020352032, %v2939_v46 }
 0xa8a   : > { %v2943_v22 = vadd.f32 %v2942_v48, %v2777_v18  ;;  %v2941_v49 = vadd.f32 %v2940_v47, %v2775_v19 }
 0xa8c   : > { %2948 = vrot.lane.b32.xlu2 %v2941_v49, %s8306_s28  ;;  %2945 = vrot.lane.b32.xlu1 %v2941_v49, %s8305_s27  ;;  %v2955_v54 = vsel %vm82_vm1, %v2941_v49, 0  ;;  %v2952_v61 = vmul.f32 %v2941_v49, %v2941_v49 }
 0xa8d   : > { %v2974_v50 = vand.u32 4294901760, %v2955_v54 }
 0xa8f   : > { %3005 = vmatmul.f32.vlgmr.msrb.gmra.mxu3 %v2974_v50  ;;  %v2975_v51 = vsub.f32 %v2955_v54, %v2974_v50 }
 0xa90   : > { %3213 = vmatpush.msrb.mxu3 %v8355_v3 }
 0xa91   : > { %3029 = vmatmul.f32.vlgmr.msra.gmra.mxu0 %v2975_v51  ;;  %v2976_v52 = vand.u32 4294901760, %v2975_v51 }
 0xa92   : > { %3239 = vmatpush.msra.mxu0 %v8369_v7 }
 0xa93   : > { %3053 = vmatmul.f32.vlgmr.msra.gmra.mxu1 %v2976_v52  ;;  %v2977_v53 = vsub.f32 %v2975_v51, %v2976_v52 }
 0xa94   : > { %3261 = vmatpush.msra.mxu1 %v8355_v3 }
 0xa95   : > { %v2978_v55 = vand.u32 4294901760, %v2977_v53 }
 0xa97   : > { %2979 = vmatmul.f32.vlgmr.msrb.gmra.mxu2 %v2978_v55  ;;  %3099 = vmatmul.f32.vlgmr.msra.gmra.mxu3 %v2974_v50 }
 0xa98   : > { %3190 = vmatpush.msrb.mxu2 %v8361_v4  ;;  %3341 = vmatpush.msra.mxu3 %v8375_v11 }
 0xa9f   : > { %3077 = vmatmul.f32.vlgmr.msra.gmra.mxu2 %v2974_v50 }
 0xaa0   : > { %3311 = vmatpush.msra.mxu2 %v8355_v3 }
 0xae6   : > { %v2949_v58 = vpop.permute.xlu2 %2948 }
 0xafe   : > { %v2946_v56 = vpop.permute.xlu1 %2945 }
 0xaff   : > { %v2951_v59 = vsel %vm77_vm2, %v2946_v56, %v2949_v58 }
 0xb00   : > { %v2953_v33 = vmul.f32 %v2951_v59, %v2951_v59 }
 0xb02   : > { %v2954_v5 = vadd.f32 %v2953_v33, %v2952_v61 }
 0xb04   : > { %v3103_v9 = vmul.f32 %v8338_v1, %v2954_v5 }
 0xb06   : > { %v3104_v15 = vmul.f32 %v3103_v9, %v2951_v59 }
 0xb0e   : > { %v3030_v63 = vpop.f32.mrf.mxu0 }
 0xb10   : > { %v3054_v8 = vpop.f32.mrf.mxu1 }
 0xb12   : > { %v3006_v60 = vpop.f32.mrf.mxu3 }
 0xb1a   : > { %v2980_v2 = vpop.f32.mrf.mxu2  ;;  %v3100_v14 = vpop.f32.mrf.mxu3 }
 0xb1b   : > { %v3007_v62 = vadd.f32 %v3006_v60, %v2980_v2 }
 0xb1d   : > { %v3031_v6 = vadd.f32 %v3030_v63, %v3007_v62 }
 0xb1f   : > { %v3055_v10 = vadd.f32 %v3054_v8, %v3031_v6 }
 0xb22   : > { %v3078_v12 = vpop.f32.mrf.mxu2 }
 0xb23   : > { %v3079_v13 = vadd.f32 %v3078_v12, %v3055_v10 }
 0xb25   : > { %v3101_v16 = vadd.f32 %v3100_v14, %v3079_v13 }
 0xb27   : > { %v3105_v17 = vadd.f32 %v3104_v15, %v3101_v16 }
 0xb29   : > { %v3106_v18 = vmul.f32 8.2671955e-05, %v3105_v17 }
 0xb2b   : > { %v8635_v19 = vadd.f32 %v3106_v18, %v2943_v22 }
 0xb2d   : > { %3112 = vrot.lane.b32.xlu1 %v8635_v19, %s8306_s28  ;;  %3109 = vrot.lane.b32.xlu0 %v8635_v19, %s8305_s27  ;;  %v3119_v20 = vsel %vm82_vm1, %v8635_v19, 0  ;;  %v3116_v32 = vmul.f32 %v8635_v19, %v8635_v19 }
 0xb2e   : > { %v3138_v21 = vand.u32 4294901760, %v3119_v20 }
 0xb30   : > { %3169 = vmatmul.f32.vlgmr.msrb.gmra.mxu1 %v3138_v21  ;;  %v3139_v23 = vsub.f32 %v3119_v20, %v3138_v21 }
 0xb31   : > { %3387 = vmatpush.msrb.mxu1 %v8355_v3 }
 0xb32   : > { %3193 = vmatmul.f32.vlgmr.msrb.gmra.mxu2 %v3139_v23  ;;  %v3140_v24 = vand.u32 4294901760, %v3139_v23 }
 0xb33   : > { %3413 = vmatpush.msrb.mxu2 %v8369_v7 }
 0xb34   : > { %3217 = vmatmul.f32.vlgmr.msrb.gmra.mxu3 %v3140_v24  ;;  %v3141_v57 = vsub.f32 %v3139_v23, %v3140_v24 }
 0xb35   : > { %3435 = vmatpush.msrb.mxu3 %v8355_v3 }
 0xb36   : > { %v3142_v25 = vand.u32 4294901760, %v3141_v57 }
 0xb38   : > { %3143 = vmatmul.f32.vlgmr.msrb.gmra.mxu0 %v3142_v25  ;;  %3263 = vmatmul.f32.vlgmr.msra.gmra.mxu1 %v3138_v21 }
 0xb39   : > { %3364 = vmatpush.msrb.mxu0 %v8361_v4  ;;  %3511 = vmatpush.msra.mxu1 %v8375_v11 }
 0xb40   : > { %3241 = vmatmul.f32.vlgmr.msra.gmra.mxu0 %v3138_v21 }
 0xb41   : > { %3481 = vmatpush.msra.mxu0 %v8355_v3 }
 0xb9f   : > { %v3113_v30 = vpop.permute.xlu1 %3112  ;;  %v3110_v26 = vpop.permute.xlu0 %3109 }
 0xba0   : > { %v3115_v27 = vsel %vm77_vm2, %v3110_v26, %v3113_v30 }
 0xba1   : > { %v3117_v28 = vmul.f32 %v3115_v27, %v3115_v27 }
 0xba3   : > { %v3118_v36 = vadd.f32 %v3117_v28, %v3116_v32 }
 0xba5   : > { %v3267_v39 = vmul.f32 %v8338_v1, %v3118_v36 }
 0xba7   : > { %v3268_v44 = vmul.f32 %v3267_v39, %v3115_v27 }
 0xbad   : > { %v3170_v29 = vpop.f32.mrf.mxu1 }
 0xbb5   : > { %v3144_v31 = vpop.f32.mrf.mxu0  ;;  %v3194_v35 = vpop.f32.mrf.mxu2 }
 0xbb6   : > { %v3171_v34 = vadd.f32 %v3170_v29, %v3144_v31  ;;  %v3264_v43 = vpop.f32.mrf.mxu1 }
 0xbb7   : > { %v3218_v38 = vpop.f32.mrf.mxu3 }
 0xbb8   : > { %v3195_v37 = vadd.f32 %v3194_v35, %v3171_v34 }
 0xbba   : > { %v3219_v40 = vadd.f32 %v3218_v38, %v3195_v37 }
 0xbbd   : > { %v3242_v41 = vpop.f32.mrf.mxu0 }
 0xbbe   : > { %v3243_v42 = vadd.f32 %v3242_v41, %v3219_v40 }
 0xbc0   : > { %v3265_v45 = vadd.f32 %v3264_v43, %v3243_v42 }
 0xbc2   : > { %v8653_v46 = vadd.f32 %v3268_v44, %v3265_v45 }
 0xbc4   : > { %v3270_v47 = vmul.f32 0.00012626263, %v8653_v46  ;;  %v3272_v13 = vmul.f32 4.7348483e-05, %v8653_v46  ;;  %v3274_v14 = vmul.f32 0.000617284, %v8653_v46 }
 0xbc5   : > { %v3278_v17 = vmul.f32 0.001796891, %v8653_v46  ;;  %v3276_v18 = vmul.f32 0.0018640143, %v8653_v46 }
 0xbc6   : > { %v3271_v48 = vadd.f32 %v3270_v47, %v8635_v19  ;;  %v3273_v21 = vadd.f32 %v3272_v13, %v8635_v19  ;;  %v3275_v23 = vadd.f32 %v3274_v14, %v8635_v19 }
 0xbc7   : > { %v3279_v30 = vadd.f32 %v3278_v17, %v8635_v19  ;;  %v3277_v26 = vadd.f32 %v3276_v18, %v8635_v19 }
 0xbc8   : > { %3286 = vrot.lane.b32.xlu0 %v3271_v48, %s8306_s28  ;;  %3283 = vrot.lane.b32.xlu2 %v3271_v48, %s8305_s27  ;;  %v3293_v22 = vsel %vm82_vm1, %v3271_v48, 0  ;;  %v3290_v60 = vmul.f32 %v3271_v48, %v3271_v48 }
 0xbc9   : > { %v3312_v49 = vand.u32 4294901760, %v3293_v22 }
 0xbcb   : > { %3343 = vmatmul.f32.vlgmr.msra.gmra.mxu3 %v3312_v49  ;;  %v3313_v54 = vsub.f32 %v3293_v22, %v3312_v49 }
 0xbcc   : > { %3557 = vmatpush.msra.mxu3 %v8355_v3 }
 0xbcd   : > { %3367 = vmatmul.f32.vlgmr.msrb.gmra.mxu0 %v3313_v54  ;;  %v3314_v50 = vand.u32 4294901760, %v3313_v54 }
 0xbce   : > { %3583 = vmatpush.msrb.mxu0 %v8369_v7 }
 0xbcf   : > { %3391 = vmatmul.f32.vlgmr.msrb.gmra.mxu1 %v3314_v50  ;;  %v3315_v51 = vsub.f32 %v3313_v54, %v3314_v50 }
 0xbd0   : > { %3605 = vmatpush.msrb.mxu1 %v8355_v3 }
 0xbd1   : > { %v3316_v52 = vand.u32 4294901760, %v3315_v51 }
 0xbd3   : > { %3317 = vmatmul.f32.vlgmr.msra.gmra.mxu2 %v3316_v52  ;;  %3437 = vmatmul.f32.vlgmr.msrb.gmra.mxu3 %v3312_v49 }
 0xbd4   : > { %3534 = vmatpush.msra.mxu2 %v8361_v4  ;;  %3681 = vmatpush.msrb.mxu3 %v8375_v11 }
 0xbdb   : > { %3415 = vmatmul.f32.vlgmr.msrb.gmra.mxu2 %v3312_v49 }
 0xbdc   : > { %3651 = vmatpush.msrb.mxu2 %v8355_v3 }
 0xc22   : > { %v3284_v55 = vpop.permute.xlu2 %3283 }
 0xc3a   : > { %v3287_v53 = vpop.permute.xlu0 %3286 }
 0xc3b   : > { %v3289_v56 = vsel %vm77_vm2, %v3284_v55, %v3287_v53 }
 0xc3c   : > { %v3291_v58 = vmul.f32 %v3289_v56, %v3289_v56 }
 0xc3e   : > { %v3292_v62 = vadd.f32 %v3291_v58, %v3290_v60 }
 0xc40   : > { %v3441_v6 = vmul.f32 %v8338_v1, %v3292_v62 }
 0xc42   : > { %v3442_v15 = vmul.f32 %v3441_v6, %v3289_v56 }
 0xc4a   : > { %v3368_v61 = vpop.f32.mrf.mxu0 }
 0xc4c   : > { %v3392_v5 = vpop.f32.mrf.mxu1 }
 0xc4e   : > { %v3344_v59 = vpop.f32.mrf.mxu3 }
 0xc56   : > { %v3318_v33 = vpop.f32.mrf.mxu2  ;;  %v3438_v12 = vpop.f32.mrf.mxu3 }
 0xc57   : > { %v3345_v2 = vadd.f32 %v3344_v59, %v3318_v33  ;;  %v3280_v33 = vmul.f32 5.754156e-05, %v8653_v46 }
 0xc59   : > { %v3369_v63 = vadd.f32 %v3368_v61, %v3345_v2 }
 0xc5b   : > { %v3393_v8 = vadd.f32 %v3392_v5, %v3369_v63  ;;  %v3281_v63 = vadd.f32 %v3280_v33, %v8635_v19 }
 0xc5e   : > { %v3416_v9 = vpop.f32.mrf.mxu2 }
 0xc5f   : > { %v3417_v10 = vadd.f32 %v3416_v9, %v3393_v8 }
 0xc61   : > { %v3439_v16 = vadd.f32 %v3438_v12, %v3417_v10 }
 0xc63   : > { %v3443_v20 = vadd.f32 %v3442_v15, %v3439_v16 }
 0xc65   : > { %v3450_v24 = vmul.f32 -0.006791399, %v3443_v20  ;;  %v3444_v57 = vmul.f32 0.00014204545, %v3443_v20  ;;  %v3446_v25 = vmul.f32 -0.0023569025, %v3443_v20 }
 0xc66   : > { %v3448_v27 = vmul.f32 -0.007320577, %v3443_v20 }
 0xc67   : > { %v3445_v28 = vadd.f32 %v3444_v57, %v3273_v21  ;;  %v3447_v29 = vadd.f32 %v3446_v25, %v3275_v23  ;;  %v3451_v31 = vadd.f32 %v3450_v24, %v3279_v30 }
 0xc68   : > { %v3449_v32 = vadd.f32 %v3448_v27, %v3277_v26 }
 0xc69   : > { %3456 = vrot.lane.b32.xlu2 %v3445_v28, %s8306_s28  ;;  %3453 = vrot.lane.b32.xlu1 %v3445_v28, %s8305_s27  ;;  %v3463_v34 = vsel %vm82_vm1, %v3445_v28, 0  ;;  %v3460_v47 = vmul.f32 %v3445_v28, %v3445_v28 }
 0xc6a   : > { %v3482_v35 = vand.u32 4294901760, %v3463_v34 }
 0xc6c   : > { %3513 = vmatmul.f32.vlgmr.msra.gmra.mxu1 %v3482_v35  ;;  %v3483_v36 = vsub.f32 %v3463_v34, %v3482_v35 }
 0xc6d   : > { %3727 = vmatpush.msra.mxu1 %v8355_v3 }
 0xc6e   : > { %3537 = vmatmul.f32.vlgmr.msra.gmra.mxu2 %v3483_v36  ;;  %v3484_v37 = vand.u32 4294901760, %v3483_v36 }
 0xc6f   : > { %3753 = vmatpush.msra.mxu2 %v8369_v7 }
 0xc70   : > { %3561 = vmatmul.f32.vlgmr.msra.gmra.mxu3 %v3484_v37  ;;  %v3485_v38 = vsub.f32 %v3483_v36, %v3484_v37 }
 0xc71   : > { %3775 = vmatpush.msra.mxu3 %v8355_v3 }
 0xc72   : > { %v3486_v39 = vand.u32 4294901760, %v3485_v38 }
 0xc74   : > { %3487 = vmatmul.f32.vlgmr.msra.gmra.mxu0 %v3486_v39  ;;  %3607 = vmatmul.f32.vlgmr.msrb.gmra.mxu1 %v3482_v35 }
 0xc75   : > { %3704 = vmatpush.msra.mxu0 %v8361_v4  ;;  %3849 = vmatpush.msrb.mxu1 %v8375_v11 }
 0xc7c   : > { %3585 = vmatmul.f32.vlgmr.msrb.gmra.mxu0 %v3482_v35 }
 0xc7d   : > { %3819 = vmatpush.msrb.mxu0 %v8355_v3 }
 0xcc3   : > { %v3457_v41 = vpop.permute.xlu2 %3456 }
 0xcdb   : > { %v3454_v40 = vpop.permute.xlu1 %3453 }
 0xcdc   : > { %v3459_v42 = vsel %vm77_vm2, %v3454_v40, %v3457_v41 }
 0xcdd   : > { %v3461_v43 = vmul.f32 %v3459_v42, %v3459_v42 }
 0xcdf   : > { %v3462_v49 = vadd.f32 %v3461_v43, %v3460_v47 }
 0xce1   : > { %v3611_v51 = vmul.f32 %v8338_v1, %v3462_v49 }
 0xce3   : > { %v3612_v58 = vmul.f32 %v3611_v51, %v3459_v42 }
 0xce9   : > { %v3514_v44 = vpop.f32.mrf.mxu1 }
 0xcf1   : > { %v3488_v45 = vpop.f32.mrf.mxu0  ;;  %v3538_v22 = vpop.f32.mrf.mxu2 }
 0xcf2   : > { %v3515_v48 = vadd.f32 %v3514_v44, %v3488_v45  ;;  %v3608_v56 = vpop.f32.mrf.mxu1 }
 0xcf3   : > { %v3562_v50 = vpop.f32.mrf.mxu3 }
 0xcf4   : > { %v3539_v54 = vadd.f32 %v3538_v22, %v3515_v48 }
 0xcf6   : > { %v3563_v52 = vadd.f32 %v3562_v50, %v3539_v54 }
 0xcf9   : > { %v3586_v53 = vpop.f32.mrf.mxu0 }
 0xcfa   : > { %v3587_v55 = vadd.f32 %v3586_v53, %v3563_v52 }
 0xcfc   : > { %v3609_v59 = vadd.f32 %v3608_v56, %v3587_v55 }
 0xcfe   : > { %v3613_v60 = vadd.f32 %v3612_v58, %v3609_v59 }
 0xd00   : > { %v3620_v2 = vmul.f32 0.00028360877, %v3613_v60  ;;  %v3614_v61 = vmul.f32 0.002244669, %v3613_v60  ;;  %v3616_v62 = vmul.f32 0.0062013213, %v3613_v60 }
 0xd01   : > { %v3618_v5 = vmul.f32 0.0056227418, %v3613_v60 }
 0xd02   : > { %v3615_v6 = vadd.f32 %v3614_v61, %v3447_v29  ;;  %v3617_v8 = vadd.f32 %v3616_v62, %v3449_v32  ;;  %v3621_v9 = vadd.f32 %v3620_v2, %v3281_v63 }
 0xd03   : > { %v3619_v10 = vadd.f32 %v3618_v5, %v3451_v31 }
 0xd04   : > { %3626 = vrot.lane.b32.xlu1 %v3615_v6, %s8306_s28  ;;  %3623 = vrot.lane.b32.xlu0 %v3615_v6, %s8305_s27  ;;  %v3633_v12 = vsel %vm82_vm1, %v3615_v6, 0  ;;  %v3630_v24 = vmul.f32 %v3615_v6, %v3615_v6 }
 0xd05   : > { %v3652_v13 = vand.u32 4294901760, %v3633_v12 }
 0xd07   : > { %3683 = vmatmul.f32.vlgmr.msrb.gmra.mxu3 %v3652_v13  ;;  %v3653_v46 = vsub.f32 %v3633_v12, %v3652_v13 }
 0xd08   : > { %3895 = vmatpush.msrb.mxu3 %v8355_v3 }
 0xd09   : > { %3707 = vmatmul.f32.vlgmr.msra.gmra.mxu0 %v3653_v46  ;;  %v3654_v14 = vand.u32 4294901760, %v3653_v46 }
 0xd0a   : > { %3921 = vmatpush.msra.mxu0 %v8369_v7 }
 0xd0b   : > { %3731 = vmatmul.f32.vlgmr.msra.gmra.mxu1 %v3654_v14  ;;  %v3655_v19 = vsub.f32 %v3653_v46, %v3654_v14 }
 0xd0c   : > { %3943 = vmatpush.msra.mxu1 %v8355_v3 }
 0xd0d   : > { %v3656_v15 = vand.u32 4294901760, %v3655_v19 }
 0xd0f   : > { %3657 = vmatmul.f32.vlgmr.msrb.gmra.mxu2 %v3656_v15  ;;  %3777 = vmatmul.f32.vlgmr.msra.gmra.mxu3 %v3652_v13 }
 0xd10   : > { %3872 = vmatpush.msrb.mxu2 %v8361_v4  ;;  %4015 = vmatpush.msra.mxu3 %v8375_v11 }
 0xd17   : > { %3755 = vmatmul.f32.vlgmr.msra.gmra.mxu2 %v3652_v13 }
 0xd18   : > { %3985 = vmatpush.msra.mxu2 %v8355_v3 }
 0xd76   : > { %v3627_v16 = vpop.permute.xlu1 %3626  ;;  %v3624_v17 = vpop.permute.xlu0 %3623 }
 0xd77   : > { %v3629_v18 = vsel %vm77_vm2, %v3624_v17, %v3627_v16 }
 0xd78   : > { %v3631_v20 = vmul.f32 %v3629_v18, %v3629_v18 }
 0xd7a   : > { %v3632_v30 = vadd.f32 %v3631_v20, %v3630_v24 }
 0xd7c   : > { %v3781_v28 = vmul.f32 %v8338_v1, %v3632_v30 }
 0xd7e   : > { %v3782_v35 = vmul.f32 %v3781_v28, %v3629_v18 }
 0xd86   : > { %v3708_v25 = vpop.f32.mrf.mxu0 }
 0xd88   : > { %v3732_v27 = vpop.f32.mrf.mxu1 }
 0xd8a   : > { %v3684_v21 = vpop.f32.mrf.mxu3 }
 0xd92   : > { %v3658_v23 = vpop.f32.mrf.mxu2  ;;  %v3778_v34 = vpop.f32.mrf.mxu3 }
 0xd93   : > { %v3685_v57 = vadd.f32 %v3684_v21, %v3658_v23 }
 0xd95   : > { %v3709_v26 = vadd.f32 %v3708_v25, %v3685_v57 }
 0xd97   : > { %v3733_v29 = vadd.f32 %v3732_v27, %v3709_v26 }
 0xd9a   : > { %v3756_v31 = vpop.f32.mrf.mxu2 }
 0xd9b   : > { %v3757_v32 = vadd.f32 %v3756_v31, %v3733_v29 }
 0xd9d   : > { %v3779_v36 = vadd.f32 %v3778_v34, %v3757_v32 }
 0xd9f   : > { %v3783_v37 = vadd.f32 %v3782_v35, %v3779_v36 }
 0xda1   : > { %v3786_v38 = vmul.f32 0.00017576331, %v3783_v37  ;;  %v3788_v39 = vmul.f32 0.00041101116, %v3783_v37  ;;  %v3784_v40 = vmul.f32 -0.00018359175, %v3783_v37 }
 0xda3   : > { %v3785_v41 = vadd.f32 %v3784_v40, %v3617_v8  ;;  %v3789_v42 = vadd.f32 %v3788_v39, %v3621_v9  ;;  %v3787_v43 = vadd.f32 %v3786_v38, %v3619_v10 }
 0xda5   : > { %3794 = vrot.lane.b32.xlu0 %v3785_v41, %s8306_s28  ;;  %3791 = vrot.lane.b32.xlu2 %v3785_v41, %s8305_s27  ;;  %v3801_v44 = vsel %vm82_vm1, %v3785_v41, 0  ;;  %v3798_v56 = vmul.f32 %v3785_v41, %v3785_v41 }
 0xda6   : > { %v3820_v45 = vand.u32 4294901760, %v3801_v44 }
 0xda8   : > { %3851 = vmatmul.f32.vlgmr.msrb.gmra.mxu1 %v3820_v45  ;;  %v3821_v47 = vsub.f32 %v3801_v44, %v3820_v45 }
 0xda9   : > { %4061 = vmatpush.msrb.mxu1 %v8355_v3 }
 0xdaa   : > { %3875 = vmatmul.f32.vlgmr.msrb.gmra.mxu2 %v3821_v47  ;;  %v3822_v48 = vand.u32 4294901760, %v3821_v47 }
 0xdab   : > { %4087 = vmatpush.msrb.mxu2 %v8369_v7 }
 0xdac   : > { %3899 = vmatmul.f32.vlgmr.msrb.gmra.mxu3 %v3822_v48  ;;  %v3823_v22 = vsub.f32 %v3821_v47, %v3822_v48 }
 0xdad   : > { %4109 = vmatpush.msrb.mxu3 %v8355_v3 }
 0xdae   : > { %v3824_v49 = vand.u32 4294901760, %v3823_v22 }
 0xdb0   : > { %3825 = vmatmul.f32.vlgmr.msrb.gmra.mxu0 %v3824_v49  ;;  %3945 = vmatmul.f32.vlgmr.msra.gmra.mxu1 %v3820_v45 }
 0xdb1   : > { %4038 = vmatpush.msrb.mxu0 %v8361_v4  ;;  %4179 = vmatpush.msra.mxu1 %v8375_v11 }
 0xdb8   : > { %3923 = vmatmul.f32.vlgmr.msra.gmra.mxu0 %v3820_v45 }
 0xdb9   : > { %4149 = vmatpush.msra.mxu0 %v8355_v3 }
 0xdff   : > { %v3792_v50 = vpop.permute.xlu2 %3791 }
 0xe17   : > { %v3795_v54 = vpop.permute.xlu0 %3794 }
 0xe18   : > { %v3797_v51 = vsel %vm77_vm2, %v3792_v50, %v3795_v54 }
 0xe19   : > { %v3799_v52 = vmul.f32 %v3797_v51, %v3797_v51 }
 0xe1b   : > { %v3800_v33 = vadd.f32 %v3799_v52, %v3798_v56 }
 0xe1d   : > { %v3949_v61 = vmul.f32 %v8338_v1, %v3800_v33 }
 0xe1f   : > { %v3950_v8 = vmul.f32 %v3949_v61, %v3797_v51 }
 0xe25   : > { %v3852_v53 = vpop.f32.mrf.mxu1 }
 0xe2d   : > { %v3826_v55 = vpop.f32.mrf.mxu0  ;;  %v3876_v59 = vpop.f32.mrf.mxu2 }
 0xe2e   : > { %v3853_v58 = vadd.f32 %v3852_v53, %v3826_v55  ;;  %v3946_v6 = vpop.f32.mrf.mxu1 }
 0xe2f   : > { %v3900_v2 = vpop.f32.mrf.mxu3 }
 0xe30   : > { %v3877_v60 = vadd.f32 %v3876_v59, %v3853_v58 }
 0xe32   : > { %v3901_v62 = vadd.f32 %v3900_v2, %v3877_v60 }
 0xe35   : > { %v3924_v63 = vpop.f32.mrf.mxu0 }
 0xe36   : > { %v3925_v5 = vadd.f32 %v3924_v63, %v3901_v62 }
 0xe38   : > { %v3947_v9 = vadd.f32 %v3946_v6, %v3925_v5 }
 0xe3a   : > { %v3951_v10 = vadd.f32 %v3950_v8, %v3947_v9 }
 0xe3c   : > { %v3952_v12 = vmul.f32 -0.00017268391, %v3951_v10  ;;  %v3954_v13 = vmul.f32 -0.00020352032, %v3951_v10 }
 0xe3e   : > { %v3955_v46 = vadd.f32 %v3954_v13, %v3789_v42  ;;  %v3953_v14 = vadd.f32 %v3952_v12, %v3787_v43 }
 0xe40   : > { %3960 = vrot.lane.b32.xlu2 %v3953_v14, %s8306_s28  ;;  %3957 = vrot.lane.b32.xlu1 %v3953_v14, %s8305_s27  ;;  %v3967_v19 = vsel %vm82_vm1, %v3953_v14, 0  ;;  %v3964_v26 = vmul.f32 %v3953_v14, %v3953_v14 }
 0xe41   : > { %v3986_v15 = vand.u32 4294901760, %v3967_v19 }
 0xe43   : > { %4017 = vmatmul.f32.vlgmr.msra.gmra.mxu3 %v3986_v15  ;;  %v3987_v16 = vsub.f32 %v3967_v19, %v3986_v15 }
 0xe44   : > { %4225 = vmatpush.msra.mxu3 %v8355_v3 }
 0xe45   : > { %4041 = vmatmul.f32.vlgmr.msrb.gmra.mxu0 %v3987_v16  ;;  %v3988_v17 = vand.u32 4294901760, %v3987_v16 }
 0xe46   : > { %4251 = vmatpush.msrb.mxu0 %v8369_v7 }
 0xe47   : > { %4065 = vmatmul.f32.vlgmr.msrb.gmra.mxu1 %v3988_v17  ;;  %v3989_v18 = vsub.f32 %v3987_v16, %v3988_v17 }
 0xe48   : > { %4273 = vmatpush.msrb.mxu1 %v8355_v3 }
 0xe49   : > { %v3990_v20 = vand.u32 4294901760, %v3989_v18 }
 0xe4b   : > { %3991 = vmatmul.f32.vlgmr.msra.gmra.mxu2 %v3990_v20  ;;  %4111 = vmatmul.f32.vlgmr.msrb.gmra.mxu3 %v3986_v15 }
 0xe4c   : > { %4202 = vmatpush.msra.mxu2 %v8361_v4  ;;  %4353 = vmatpush.msrb.mxu3 %v8375_v11 }
 0xe53   : > { %4089 = vmatmul.f32.vlgmr.msrb.gmra.mxu2 %v3986_v15 }
 0xe54   : > { %4323 = vmatpush.msrb.mxu2 %v8355_v3 }
 0xe9a   : > { %v3961_v23 = vpop.permute.xlu2 %3960 }
 0xeb2   : > { %v3958_v21 = vpop.permute.xlu1 %3957 }
 0xeb3   : > { %v3963_v24 = vsel %vm77_vm2, %v3958_v21, %v3961_v23 }
 0xeb4   : > { %v3965_v57 = vmul.f32 %v3963_v24, %v3963_v24 }
 0xeb6   : > { %v3966_v29 = vadd.f32 %v3965_v57, %v3964_v26 }
 0xeb8   : > { %v4115_v34 = vmul.f32 %v8338_v1, %v3966_v29 }
 0xeba   : > { %v4116_v39 = vmul.f32 %v4115_v34, %v3963_v24 }
 0xec2   : > { %v4042_v28 = vpop.f32.mrf.mxu0 }
 0xec4   : > { %v4066_v32 = vpop.f32.mrf.mxu1 }
 0xec6   : > { %v4018_v25 = vpop.f32.mrf.mxu3 }
 0xece   : > { %v3992_v30 = vpop.f32.mrf.mxu2  ;;  %v4112_v38 = vpop.f32.mrf.mxu3 }
 0xecf   : > { %v4019_v27 = vadd.f32 %v4018_v25, %v3992_v30 }
 0xed1   : > { %v4043_v31 = vadd.f32 %v4042_v28, %v4019_v27 }
 0xed3   : > { %v4067_v35 = vadd.f32 %v4066_v32, %v4043_v31 }
 0xed6   : > { %v4090_v36 = vpop.f32.mrf.mxu2 }
 0xed7   : > { %v4091_v37 = vadd.f32 %v4090_v36, %v4067_v35 }
 0xed9   : > { %v4113_v40 = vadd.f32 %v4112_v38, %v4091_v37 }
 0xedb   : > { %v4117_v41 = vadd.f32 %v4116_v39, %v4113_v40 }
 0xedd   : > { %v4118_v42 = vmul.f32 8.2671955e-05, %v4117_v41 }
 0xedf   : > { %v8722_v43 = vadd.f32 %v4118_v42, %v3955_v46 }
 0xee1   : > { %4124 = vrot.lane.b32.xlu1 %v8722_v43, %s8306_s28  ;;  %4121 = vrot.lane.b32.xlu0 %v8722_v43, %s8305_s27  ;;  %v4131_v44 = vsel %vm82_vm1, %v8722_v43, 0  ;;  %v4128_v56 = vmul.f32 %v8722_v43, %v8722_v43 }
 0xee2   : > { %v4150_v45 = vand.u32 4294901760, %v4131_v44 }
 0xee4   : > { %4181 = vmatmul.f32.vlgmr.msra.gmra.mxu1 %v4150_v45  ;;  %v4151_v47 = vsub.f32 %v4131_v44, %v4150_v45 }
 0xee5   : > { %4399 = vmatpush.msra.mxu1 %v8355_v3 }
 0xee6   : > { %4205 = vmatmul.f32.vlgmr.msra.gmra.mxu2 %v4151_v47  ;;  %v4152_v48 = vand.u32 4294901760, %v4151_v47 }
 0xee7   : > { %4425 = vmatpush.msra.mxu2 %v8369_v7 }
 0xee8   : > { %4229 = vmatmul.f32.vlgmr.msra.gmra.mxu3 %v4152_v48  ;;  %v4153_v22 = vsub.f32 %v4151_v47, %v4152_v48 }
 0xee9   : > { %4447 = vmatpush.msra.mxu3 %v8355_v3 }
 0xeea   : > { %v4154_v49 = vand.u32 4294901760, %v4153_v22 }
 0xeec   : > { %4155 = vmatmul.f32.vlgmr.msra.gmra.mxu0 %v4154_v49  ;;  %4275 = vmatmul.f32.vlgmr.msrb.gmra.mxu1 %v4150_v45 }
 0xeed   : > { %4376 = vmatpush.msra.mxu0 %v8361_v4  ;;  %4523 = vmatpush.msrb.mxu1 %v8375_v11 }
 0xef4   : > { %4253 = vmatmul.f32.vlgmr.msrb.gmra.mxu0 %v4150_v45 }
 0xef5   : > { %4493 = vmatpush.msrb.mxu0 %v8355_v3 }
 0xf53   : > { %v4125_v54 = vpop.permute.xlu1 %4124  ;;  %v4122_v50 = vpop.permute.xlu0 %4121 }
 0xf54   : > { %v4127_v51 = vsel %vm77_vm2, %v4122_v50, %v4125_v54 }
 0xf55   : > { %v4129_v52 = vmul.f32 %v4127_v51, %v4127_v51 }
 0xf57   : > { %v4130_v33 = vadd.f32 %v4129_v52, %v4128_v56 }
 0xf59   : > { %v4279_v61 = vmul.f32 %v8338_v1, %v4130_v33 }
 0xf5b   : > { %v4280_v8 = vmul.f32 %v4279_v61, %v4127_v51 }
 0xf61   : > { %v4182_v53 = vpop.f32.mrf.mxu1 }
 0xf69   : > { %v4156_v55 = vpop.f32.mrf.mxu0  ;;  %v4206_v59 = vpop.f32.mrf.mxu2 }
 0xf6a   : > { %v4183_v58 = vadd.f32 %v4182_v53, %v4156_v55  ;;  %v4276_v6 = vpop.f32.mrf.mxu1 }
 0xf6b   : > { %v4230_v2 = vpop.f32.mrf.mxu3 }
 0xf6c   : > { %v4207_v60 = vadd.f32 %v4206_v59, %v4183_v58 }
 0xf6e   : > { %v4231_v62 = vadd.f32 %v4230_v2, %v4207_v60 }
 0xf71   : > { %v4254_v63 = vpop.f32.mrf.mxu0 }
 0xf72   : > { %v4255_v5 = vadd.f32 %v4254_v63, %v4231_v62 }
 0xf74   : > { %v4277_v9 = vadd.f32 %v4276_v6, %v4255_v5 }
 0xf76   : > { %v8740_v10 = vadd.f32 %v4280_v8, %v4277_v9 }
 0xf78   : > { %v4282_v12 = vmul.f32 0.00012626263, %v8740_v10  ;;  %v4284_v37 = vmul.f32 4.7348483e-05, %v8740_v10  ;;  %v4286_v38 = vmul.f32 0.000617284, %v8740_v10 }
 0xf79   : > { %v4290_v41 = vmul.f32 0.001796891, %v8740_v10  ;;  %v4288_v42 = vmul.f32 0.0018640143, %v8740_v10 }
 0xf7a   : > { %v4283_v13 = vadd.f32 %v4282_v12, %v8722_v43  ;;  %v4285_v45 = vadd.f32 %v4284_v37, %v8722_v43  ;;  %v4287_v47 = vadd.f32 %v4286_v38, %v8722_v43 }
 0xf7b   : > { %v4291_v54 = vadd.f32 %v4290_v41, %v8722_v43  ;;  %v4289_v50 = vadd.f32 %v4288_v42, %v8722_v43 }
 0xf7c   : > { %4298 = vrot.lane.b32.xlu0 %v4283_v13, %s8306_s28  ;;  %4295 = vrot.lane.b32.xlu2 %v4283_v13, %s8305_s27  ;;  %v4305_v46 = vsel %vm82_vm1, %v4283_v13, 0  ;;  %v4302_v25 = vmul.f32 %v4283_v13, %v4283_v13 }
 0xf7d   : > { %v4324_v14 = vand.u32 4294901760, %v4305_v46 }
 0xf7f   : > { %4355 = vmatmul.f32.vlgmr.msrb.gmra.mxu3 %v4324_v14  ;;  %v4325_v19 = vsub.f32 %v4305_v46, %v4324_v14 }
 0xf80   : > { %4569 = vmatpush.msrb.mxu3 %v8355_v3 }
 0xf81   : > { %4379 = vmatmul.f32.vlgmr.msra.gmra.mxu0 %v4325_v19  ;;  %v4326_v15 = vand.u32 4294901760, %v4325_v19 }
 0xf82   : > { %4595 = vmatpush.msra.mxu0 %v8369_v7 }
 0xf83   : > { %4403 = vmatmul.f32.vlgmr.msra.gmra.mxu1 %v4326_v15  ;;  %v4327_v16 = vsub.f32 %v4325_v19, %v4326_v15 }
 0xf84   : > { %4617 = vmatpush.msra.mxu1 %v8355_v3 }
 0xf85   : > { %v4328_v17 = vand.u32 4294901760, %v4327_v16 }
 0xf87   : > { %4329 = vmatmul.f32.vlgmr.msrb.gmra.mxu2 %v4328_v17  ;;  %4449 = vmatmul.f32.vlgmr.msra.gmra.mxu3 %v4324_v14 }
 0xf88   : > { %4546 = vmatpush.msrb.mxu2 %v8361_v4  ;;  %4693 = vmatpush.msra.mxu3 %v8375_v11 }
 0xf8f   : > { %4427 = vmatmul.f32.vlgmr.msra.gmra.mxu2 %v4324_v14 }
 0xf90   : > { %4663 = vmatpush.msra.mxu2 %v8355_v3 }
 0xfd6   : > { %v4296_v20 = vpop.permute.xlu2 %4295 }
 0xfee   : > { %v4299_v18 = vpop.permute.xlu0 %4298 }
 0xfef   : > { %v4301_v21 = vsel %vm77_vm2, %v4296_v20, %v4299_v18 }
 0xff0   : > { %v4303_v23 = vmul.f32 %v4301_v21, %v4301_v21 }
 0xff2   : > { %v4304_v27 = vadd.f32 %v4303_v23, %v4302_v25 }
 0xff4   : > { %v4453_v31 = vmul.f32 %v8338_v1, %v4304_v27 }
 0xff6   : > { %v4454_v39 = vmul.f32 %v4453_v31, %v4301_v21 }
 0xffe   : > { %v4380_v26 = vpop.f32.mrf.mxu0 }
0x1000   : > { %v4404_v29 = vpop.f32.mrf.mxu1 }
0x1002   : > { %v4356_v24 = vpop.f32.mrf.mxu3 }
0x100a   : > { %v4330_v57 = vpop.f32.mrf.mxu2  ;;  %v4450_v36 = vpop.f32.mrf.mxu3 }
0x100b   : > { %v4357_v30 = vadd.f32 %v4356_v24, %v4330_v57  ;;  %v4292_v57 = vmul.f32 5.754156e-05, %v8740_v10 }
0x100d   : > { %v4381_v28 = vadd.f32 %v4380_v26, %v4357_v30 }
0x100f   : > { %v4405_v32 = vadd.f32 %v4404_v29, %v4381_v28  ;;  %v4293_v28 = vadd.f32 %v4292_v57, %v8722_v43 }
0x1012   : > { %v4428_v34 = vpop.f32.mrf.mxu2 }
0x1013   : > { %v4429_v35 = vadd.f32 %v4428_v34, %v4405_v32 }
0x1015   : > { %v4451_v40 = vadd.f32 %v4450_v36, %v4429_v35 }
0x1017   : > { %v4455_v44 = vadd.f32 %v4454_v39, %v4451_v40 }
0x1019   : > { %v4462_v48 = vmul.f32 -0.006791399, %v4455_v44  ;;  %v4456_v22 = vmul.f32 0.00014204545, %v4455_v44  ;;  %v4458_v49 = vmul.f32 -0.0023569025, %v4455_v44 }
0x101a   : > { %v4460_v51 = vmul.f32 -0.007320577, %v4455_v44 }
0x101b   : > { %v4457_v52 = vadd.f32 %v4456_v22, %v4285_v45  ;;  %v4459_v53 = vadd.f32 %v4458_v49, %v4287_v47  ;;  %v4463_v55 = vadd.f32 %v4462_v48, %v4291_v54 }
0x101c   : > { %v4461_v56 = vadd.f32 %v4460_v51, %v4289_v50 }
0x101d   : > { %4468 = vrot.lane.b32.xlu2 %v4457_v52, %s8306_s28  ;;  %4465 = vrot.lane.b32.xlu1 %v4457_v52, %s8305_s27  ;;  %v4475_v58 = vsel %vm82_vm1, %v4457_v52, 0  ;;  %v4472_v12 = vmul.f32 %v4457_v52, %v4457_v52 }
0x101e   : > { %v4494_v59 = vand.u32 4294901760, %v4475_v58 }
0x1020   : > { %4525 = vmatmul.f32.vlgmr.msrb.gmra.mxu1 %v4494_v59  ;;  %v4495_v33 = vsub.f32 %v4475_v58, %v4494_v59 }
0x1021   : > { %4739 = vmatpush.msrb.mxu1 %v8355_v3 }
0x1022   : > { %4549 = vmatmul.f32.vlgmr.msrb.gmra.mxu2 %v4495_v33  ;;  %v4496_v60 = vand.u32 4294901760, %v4495_v33 }
0x1023   : > { %4765 = vmatpush.msrb.mxu2 %v8369_v7 }
0x1024   : > { %4573 = vmatmul.f32.vlgmr.msrb.gmra.mxu3 %v4496_v60  ;;  %v4497_v2 = vsub.f32 %v4495_v33, %v4496_v60 }
0x1025   : > { %4787 = vmatpush.msrb.mxu3 %v8355_v3 }
0x1026   : > { %v4498_v61 = vand.u32 4294901760, %v4497_v2 }
0x1028   : > { %4499 = vmatmul.f32.vlgmr.msrb.gmra.mxu0 %v4498_v61  ;;  %4619 = vmatmul.f32.vlgmr.msra.gmra.mxu1 %v4494_v59 }
0x1029   : > { %4716 = vmatpush.msrb.mxu0 %v8361_v4  ;;  %4861 = vmatpush.msra.mxu1 %v8375_v11 }
0x1030   : > { %4597 = vmatmul.f32.vlgmr.msra.gmra.mxu0 %v4494_v59 }
0x1031   : > { %4831 = vmatpush.msra.mxu0 %v8355_v3 }
0x1077   : > { %v4469_v63 = vpop.permute.xlu2 %4468 }
0x108f   : > { %v4466_v62 = vpop.permute.xlu1 %4465 }
0x1090   : > { %v4471_v5 = vsel %vm77_vm2, %v4466_v62, %v4469_v63 }
0x1091   : > { %v4473_v6 = vmul.f32 %v4471_v5, %v4471_v5 }
0x1093   : > { %v4474_v14 = vadd.f32 %v4473_v6, %v4472_v12 }
0x1095   : > { %v4623_v16 = vmul.f32 %v8338_v1, %v4474_v14 }
0x1097   : > { %v4624_v23 = vmul.f32 %v4623_v16, %v4471_v5 }
0x109d   : > { %v4526_v8 = vpop.f32.mrf.mxu1 }
0x10a5   : > { %v4500_v9 = vpop.f32.mrf.mxu0  ;;  %v4550_v46 = vpop.f32.mrf.mxu2 }
0x10a6   : > { %v4527_v13 = vadd.f32 %v4526_v8, %v4500_v9  ;;  %v4620_v21 = vpop.f32.mrf.mxu1 }
0x10a7   : > { %v4574_v15 = vpop.f32.mrf.mxu3 }
0x10a8   : > { %v4551_v19 = vadd.f32 %v4550_v46, %v4527_v13 }
0x10aa   : > { %v4575_v17 = vadd.f32 %v4574_v15, %v4551_v19 }
0x10ad   : > { %v4598_v18 = vpop.f32.mrf.mxu0 }
0x10ae   : > { %v4599_v20 = vadd.f32 %v4598_v18, %v4575_v17 }
0x10b0   : > { %v4621_v24 = vadd.f32 %v4620_v21, %v4599_v20 }
0x10b2   : > { %v4625_v25 = vadd.f32 %v4624_v23, %v4621_v24 }
0x10b4   : > { %v4632_v30 = vmul.f32 0.00028360877, %v4625_v25  ;;  %v4626_v26 = vmul.f32 0.002244669, %v4625_v25  ;;  %v4628_v27 = vmul.f32 0.0062013213, %v4625_v25 }
0x10b5   : > { %v4630_v29 = vmul.f32 0.0056227418, %v4625_v25 }
0x10b6   : > { %v4627_v31 = vadd.f32 %v4626_v26, %v4459_v53  ;;  %v4629_v32 = vadd.f32 %v4628_v27, %v4461_v56  ;;  %v4633_v34 = vadd.f32 %v4632_v30, %v4293_v28 }
0x10b7   : > { %v4631_v35 = vadd.f32 %v4630_v29, %v4463_v55 }
0x10b8   : > { %4638 = vrot.lane.b32.xlu1 %v4627_v31, %s8306_s28  ;;  %4635 = vrot.lane.b32.xlu0 %v4627_v31, %s8305_s27  ;;  %v4645_v36 = vsel %vm82_vm1, %v4627_v31, 0  ;;  %v4642_v48 = vmul.f32 %v4627_v31, %v4627_v31 }
0x10b9   : > { %v4664_v37 = vand.u32 4294901760, %v4645_v36 }
0x10bb   : > { %4695 = vmatmul.f32.vlgmr.msra.gmra.mxu3 %v4664_v37  ;;  %v4665_v10 = vsub.f32 %v4645_v36, %v4664_v37 }
0x10bc   : > { %4907 = vmatpush.msra.mxu3 %v8355_v3 }
0x10bd   : > { %4719 = vmatmul.f32.vlgmr.msrb.gmra.mxu0 %v4665_v10  ;;  %v4666_v38 = vand.u32 4294901760, %v4665_v10 }
0x10be   : > { %4933 = vmatpush.msrb.mxu0 %v8369_v7 }
0x10bf   : > { %4743 = vmatmul.f32.vlgmr.msrb.gmra.mxu1 %v4666_v38  ;;  %v4667_v43 = vsub.f32 %v4665_v10, %v4666_v38 }
0x10c0   : > { %4955 = vmatpush.msrb.mxu1 %v8355_v3 }
0x10c1   : > { %v4668_v39 = vand.u32 4294901760, %v4667_v43 }
0x10c3   : > { %4669 = vmatmul.f32.vlgmr.msra.gmra.mxu2 %v4668_v39  ;;  %4789 = vmatmul.f32.vlgmr.msrb.gmra.mxu3 %v4664_v37 }
0x10c4   : > { %4884 = vmatpush.msra.mxu2 %v8361_v4  ;;  %5027 = vmatpush.msrb.mxu3 %v8375_v11 }
0x10cb   : > { %4767 = vmatmul.f32.vlgmr.msrb.gmra.mxu2 %v4664_v37 }
0x10cc   : > { %4997 = vmatpush.msrb.mxu2 %v8355_v3 }
0x112a   : > { %v4639_v40 = vpop.permute.xlu1 %4638  ;;  %v4636_v41 = vpop.permute.xlu0 %4635 }
0x112b   : > { %v4641_v42 = vsel %vm77_vm2, %v4636_v41, %v4639_v40 }
0x112c   : > { %v4643_v44 = vmul.f32 %v4641_v42, %v4641_v42 }
0x112e   : > { %v4644_v54 = vadd.f32 %v4643_v44, %v4642_v48 }
0x1130   : > { %v4793_v52 = vmul.f32 %v8338_v1, %v4644_v54 }
0x1132   : > { %v4794_v59 = vmul.f32 %v4793_v52, %v4641_v42 }
0x113a   : > { %v4720_v49 = vpop.f32.mrf.mxu0 }
0x113c   : > { %v4744_v51 = vpop.f32.mrf.mxu1 }
0x113e   : > { %v4696_v45 = vpop.f32.mrf.mxu3 }
0x1146   : > { %v4670_v47 = vpop.f32.mrf.mxu2  ;;  %v4790_v58 = vpop.f32.mrf.mxu3 }
0x1147   : > { %v4697_v22 = vadd.f32 %v4696_v45, %v4670_v47 }
0x1149   : > { %v4721_v50 = vadd.f32 %v4720_v49, %v4697_v22 }
0x114b   : > { %v4745_v53 = vadd.f32 %v4744_v51, %v4721_v50 }
0x114e   : > { %v4768_v55 = vpop.f32.mrf.mxu2 }
0x114f   : > { %v4769_v56 = vadd.f32 %v4768_v55, %v4745_v53 }
0x1151   : > { %v4791_v33 = vadd.f32 %v4790_v58, %v4769_v56 }
0x1153   : > { %v4795_v60 = vadd.f32 %v4794_v59, %v4791_v33 }
0x1155   : > { %v4798_v2 = vmul.f32 0.00017576331, %v4795_v60  ;;  %v4800_v61 = vmul.f32 0.00041101116, %v4795_v60  ;;  %v4796_v62 = vmul.f32 -0.00018359175, %v4795_v60 }
0x1157   : > { %v4797_v63 = vadd.f32 %v4796_v62, %v4629_v32  ;;  %v4801_v5 = vadd.f32 %v4800_v61, %v4633_v34  ;;  %v4799_v6 = vadd.f32 %v4798_v2, %v4631_v35 }
0x1159   : > { %4806 = vrot.lane.b32.xlu0 %v4797_v63, %s8306_s28  ;;  %4803 = vrot.lane.b32.xlu2 %v4797_v63, %s8305_s27  ;;  %v4813_v8 = vsel %vm82_vm1, %v4797_v63, 0  ;;  %v4810_v21 = vmul.f32 %v4797_v63, %v4797_v63 }
0x115a   : > { %v4832_v9 = vand.u32 4294901760, %v4813_v8 }
0x115c   : > { %4863 = vmatmul.f32.vlgmr.msra.gmra.mxu1 %v4832_v9  ;;  %v4833_v12 = vsub.f32 %v4813_v8, %v4832_v9 }
0x115d   : > { %5073 = vmatpush.msra.mxu1 %v8355_v3 }
0x115e   : > { %4887 = vmatmul.f32.vlgmr.msra.gmra.mxu2 %v4833_v12  ;;  %v4834_v13 = vand.u32 4294901760, %v4833_v12 }
0x115f   : > { %5099 = vmatpush.msra.mxu2 %v8369_v7 }
0x1160   : > { %4911 = vmatmul.f32.vlgmr.msra.gmra.mxu3 %v4834_v13  ;;  %v4835_v46 = vsub.f32 %v4833_v12, %v4834_v13 }
0x1161   : > { %5121 = vmatpush.msra.mxu3 %v8355_v3 }
0x1162   : > { %v4836_v14 = vand.u32 4294901760, %v4835_v46 }
0x1164   : > { %4837 = vmatmul.f32.vlgmr.msra.gmra.mxu0 %v4836_v14  ;;  %4957 = vmatmul.f32.vlgmr.msrb.gmra.mxu1 %v4832_v9 }
0x1165   : > { %5050 = vmatpush.msra.mxu0 %v8361_v4  ;;  %5191 = vmatpush.msrb.mxu1 %v8375_v11 }
0x116c   : > { %4935 = vmatmul.f32.vlgmr.msrb.gmra.mxu0 %v4832_v9 }
0x116d   : > { %5161 = vmatpush.msrb.mxu0 %v8355_v3 }
0x11b3   : > { %v4804_v15 = vpop.permute.xlu2 %4803 }
0x11cb   : > { %v4807_v19 = vpop.permute.xlu0 %4806 }
0x11cc   : > { %v4809_v16 = vsel %vm77_vm2, %v4804_v15, %v4807_v19 }
0x11cd   : > { %v4811_v17 = vmul.f32 %v4809_v16, %v4809_v16 }
0x11cf   : > { %v4812_v57 = vadd.f32 %v4811_v17, %v4810_v21 }
0x11d1   : > { %v4961_v26 = vmul.f32 %v8338_v1, %v4812_v57 }
0x11d3   : > { %v4962_v32 = vmul.f32 %v4961_v26, %v4809_v16 }
0x11d9   : > { %v4864_v18 = vpop.f32.mrf.mxu1 }
0x11e1   : > { %v4838_v20 = vpop.f32.mrf.mxu0  ;;  %v4888_v24 = vpop.f32.mrf.mxu2 }
0x11e2   : > { %v4865_v23 = vadd.f32 %v4864_v18, %v4838_v20  ;;  %v4958_v31 = vpop.f32.mrf.mxu1 }
0x11e3   : > { %v4912_v30 = vpop.f32.mrf.mxu3 }
0x11e4   : > { %v4889_v25 = vadd.f32 %v4888_v24, %v4865_v23 }
0x11e6   : > { %v4913_v27 = vadd.f32 %v4912_v30, %v4889_v25 }
0x11e9   : > { %v4936_v28 = vpop.f32.mrf.mxu0 }
0x11ea   : > { %v4937_v29 = vadd.f32 %v4936_v28, %v4913_v27 }
0x11ec   : > { %v4959_v34 = vadd.f32 %v4958_v31, %v4937_v29 }
0x11ee   : > { %v4963_v35 = vadd.f32 %v4962_v32, %v4959_v34 }
0x11f0   : > { %v4964_v36 = vmul.f32 -0.00017268391, %v4963_v35  ;;  %v4966_v37 = vmul.f32 -0.00020352032, %v4963_v35 }
0x11f2   : > { %v4967_v10 = vadd.f32 %v4966_v37, %v4801_v5  ;;  %v4965_v38 = vadd.f32 %v4964_v36, %v4799_v6 }
0x11f4   : > { %4972 = vrot.lane.b32.xlu2 %v4965_v38, %s8306_s28  ;;  %4969 = vrot.lane.b32.xlu1 %v4965_v38, %s8305_s27  ;;  %v4979_v43 = vsel %vm82_vm1, %v4965_v38, 0  ;;  %v4976_v50 = vmul.f32 %v4965_v38, %v4965_v38 }
0x11f5   : > { %v4998_v39 = vand.u32 4294901760, %v4979_v43 }
0x11f7   : > { %5029 = vmatmul.f32.vlgmr.msrb.gmra.mxu3 %v4998_v39  ;;  %v4999_v40 = vsub.f32 %v4979_v43, %v4998_v39 }
0x11f8   : > { %5237 = vmatpush.msrb.mxu3 %v8355_v3 }
0x11f9   : > { %5053 = vmatmul.f32.vlgmr.msra.gmra.mxu0 %v4999_v40  ;;  %v5000_v41 = vand.u32 4294901760, %v4999_v40 }
0x11fa   : > { %5263 = vmatpush.msra.mxu0 %v8369_v7 }
0x11fb   : > { %5077 = vmatmul.f32.vlgmr.msra.gmra.mxu1 %v5000_v41  ;;  %v5001_v42 = vsub.f32 %v4999_v40, %v5000_v41 }
0x11fc   : > { %5285 = vmatpush.msra.mxu1 %v8355_v3 }
0x11fd   : > { %v5002_v44 = vand.u32 4294901760, %v5001_v42 }
0x11ff   : > { %5003 = vmatmul.f32.vlgmr.msrb.gmra.mxu2 %v5002_v44  ;;  %5123 = vmatmul.f32.vlgmr.msra.gmra.mxu3 %v4998_v39 }
0x1200   : > { %5214 = vmatpush.msrb.mxu2 %v8361_v4  ;;  %5365 = vmatpush.msra.mxu3 %v8375_v11 }
0x1207   : > { %5101 = vmatmul.f32.vlgmr.msra.gmra.mxu2 %v4998_v39 }
0x1208   : > { %5335 = vmatpush.msra.mxu2 %v8355_v3 }
0x124e   : > { %v4973_v47 = vpop.permute.xlu2 %4972 }
0x1266   : > { %v4970_v45 = vpop.permute.xlu1 %4969 }
0x1267   : > { %v4975_v48 = vsel %vm77_vm2, %v4970_v45, %v4973_v47 }
0x1268   : > { %v4977_v22 = vmul.f32 %v4975_v48, %v4975_v48 }
0x126a   : > { %v4978_v53 = vadd.f32 %v4977_v22, %v4976_v50 }
0x126c   : > { %v5127_v58 = vmul.f32 %v8338_v1, %v4978_v53 }
0x126e   : > { %v5128_v61 = vmul.f32 %v5127_v58, %v4975_v48 }
0x1276   : > { %v5054_v52 = vpop.f32.mrf.mxu0 }
0x1278   : > { %v5078_v56 = vpop.f32.mrf.mxu1 }
0x127a   : > { %v5030_v49 = vpop.f32.mrf.mxu3 }
0x1282   : > { %v5004_v54 = vpop.f32.mrf.mxu2  ;;  %v5124_v2 = vpop.f32.mrf.mxu3 }
0x1283   : > { %v5031_v51 = vadd.f32 %v5030_v49, %v5004_v54 }
0x1285   : > { %v5055_v55 = vadd.f32 %v5054_v52, %v5031_v51 }
0x1287   : > { %v5079_v59 = vadd.f32 %v5078_v56, %v5055_v55 }
0x128a   : > { %v5102_v33 = vpop.f32.mrf.mxu2 }
0x128b   : > { %v5103_v60 = vadd.f32 %v5102_v33, %v5079_v59 }
0x128d   : > { %v5125_v62 = vadd.f32 %v5124_v2, %v5103_v60 }
0x128f   : > { %v5129_v63 = vadd.f32 %v5128_v61, %v5125_v62 }
0x1291   : > { %v5130_v5 = vmul.f32 8.2671955e-05, %v5129_v63 }
0x1293   : > { %v8809_v6 = vadd.f32 %v5130_v5, %v4967_v10 }
0x1295   : > { %5136 = vrot.lane.b32.xlu1 %v8809_v6, %s8306_s28  ;;  %5133 = vrot.lane.b32.xlu0 %v8809_v6, %s8305_s27  ;;  %v5143_v8 = vsel %vm82_vm1, %v8809_v6, 0  ;;  %v5140_v21 = vmul.f32 %v8809_v6, %v8809_v6 }
0x1296   : > { %v5162_v9 = vand.u32 4294901760, %v5143_v8 }
0x1298   : > { %5193 = vmatmul.f32.vlgmr.msrb.gmra.mxu1 %v5162_v9  ;;  %v5163_v12 = vsub.f32 %v5143_v8, %v5162_v9 }
0x1299   : > { %5411 = vmatpush.msrb.mxu1 %v8355_v3 }
0x129a   : > { %5217 = vmatmul.f32.vlgmr.msrb.gmra.mxu2 %v5163_v12  ;;  %v5164_v13 = vand.u32 4294901760, %v5163_v12 }
0x129b   : > { %5437 = vmatpush.msrb.mxu2 %v8369_v7 }
0x129c   : > { %5241 = vmatmul.f32.vlgmr.msrb.gmra.mxu3 %v5164_v13  ;;  %v5165_v46 = vsub.f32 %v5163_v12, %v5164_v13 }
0x129d   : > { %5459 = vmatpush.msrb.mxu3 %v8355_v3 }
0x129e   : > { %v5166_v14 = vand.u32 4294901760, %v5165_v46 }
0x12a0   : > { %5167 = vmatmul.f32.vlgmr.msrb.gmra.mxu0 %v5166_v14  ;;  %5287 = vmatmul.f32.vlgmr.msra.gmra.mxu1 %v5162_v9 }
0x12a1   : > { %5388 = vmatpush.msrb.mxu0 %v8361_v4  ;;  %5535 = vmatpush.msra.mxu1 %v8375_v11 }
0x12a8   : > { %5265 = vmatmul.f32.vlgmr.msra.gmra.mxu0 %v5162_v9 }
0x12a9   : > { %5505 = vmatpush.msra.mxu0 %v8355_v3 }
0x1307   : > { %v5137_v19 = vpop.permute.xlu1 %5136  ;;  %v5134_v15 = vpop.permute.xlu0 %5133 }
0x1308   : > { %v5139_v16 = vsel %vm77_vm2, %v5134_v15, %v5137_v19 }
0x1309   : > { %v5141_v17 = vmul.f32 %v5139_v16, %v5139_v16 }
0x130b   : > { %v5142_v57 = vadd.f32 %v5141_v17, %v5140_v21 }
0x130d   : > { %v5291_v26 = vmul.f32 %v8338_v1, %v5142_v57 }
0x130f   : > { %v5292_v32 = vmul.f32 %v5291_v26, %v5139_v16 }
0x1315   : > { %v5194_v18 = vpop.f32.mrf.mxu1 }
0x131d   : > { %v5168_v20 = vpop.f32.mrf.mxu0  ;;  %v5218_v24 = vpop.f32.mrf.mxu2 }
0x131e   : > { %v5195_v23 = vadd.f32 %v5194_v18, %v5168_v20  ;;  %v5288_v31 = vpop.f32.mrf.mxu1 }
0x131f   : > { %v5242_v30 = vpop.f32.mrf.mxu3 }
0x1320   : > { %v5219_v25 = vadd.f32 %v5218_v24, %v5195_v23 }
0x1322   : > { %v5243_v27 = vadd.f32 %v5242_v30, %v5219_v25 }
0x1325   : > { %v5266_v28 = vpop.f32.mrf.mxu0 }
0x1326   : > { %v5267_v29 = vadd.f32 %v5266_v28, %v5243_v27 }
0x1328   : > { %v5289_v34 = vadd.f32 %v5288_v31, %v5267_v29 }
0x132a   : > { %v8827_v35 = vadd.f32 %v5292_v32, %v5289_v34 }
0x132c   : > { %v5294_v36 = vmul.f32 0.00012626263, %v8827_v35  ;;  %v5296_v60 = vmul.f32 4.7348483e-05, %v8827_v35  ;;  %v5298_v2 = vmul.f32 0.000617284, %v8827_v35 }
0x132d   : > { %v5302_v63 = vmul.f32 0.001796891, %v8827_v35  ;;  %v5300_v5 = vmul.f32 0.0018640143, %v8827_v35 }
0x132e   : > { %v5295_v37 = vadd.f32 %v5294_v36, %v8809_v6  ;;  %v5297_v9 = vadd.f32 %v5296_v60, %v8809_v6  ;;  %v5299_v12 = vadd.f32 %v5298_v2, %v8809_v6 }
0x132f   : > { %v5303_v19 = vadd.f32 %v5302_v63, %v8809_v6  ;;  %v5301_v15 = vadd.f32 %v5300_v5, %v8809_v6 }
0x1330   : > { %5310 = vrot.lane.b32.xlu0 %v5295_v37, %s8306_s28  ;;  %5307 = vrot.lane.b32.xlu2 %v5295_v37, %s8305_s27  ;;  %v5317_v10 = vsel %vm82_vm1, %v5295_v37, 0  ;;  %v5314_v49 = vmul.f32 %v5295_v37, %v5295_v37 }
0x1331   : > { %v5336_v38 = vand.u32 4294901760, %v5317_v10 }
0x1333   : > { %5367 = vmatmul.f32.vlgmr.msra.gmra.mxu3 %v5336_v38  ;;  %v5337_v43 = vsub.f32 %v5317_v10, %v5336_v38 }
0x1334   : > { %5581 = vmatpush.msra.mxu3 %v8355_v3 }
0x1335   : > { %5391 = vmatmul.f32.vlgmr.msrb.gmra.mxu0 %v5337_v43  ;;  %v5338_v39 = vand.u32 4294901760, %v5337_v43 }
0x1336   : > { %5607 = vmatpush.msrb.mxu0 %v8369_v7 }
0x1337   : > { %5415 = vmatmul.f32.vlgmr.msrb.gmra.mxu1 %v5338_v39  ;;  %v5339_v40 = vsub.f32 %v5337_v43, %v5338_v39 }
0x1338   : > { %5629 = vmatpush.msrb.mxu1 %v8355_v3 }
0x1339   : > { %v5340_v41 = vand.u32 4294901760, %v5339_v40 }
0x133b   : > { %5341 = vmatmul.f32.vlgmr.msra.gmra.mxu2 %v5340_v41  ;;  %5461 = vmatmul.f32.vlgmr.msrb.gmra.mxu3 %v5336_v38 }
0x133c   : > { %5558 = vmatpush.msra.mxu2 %v8361_v4  ;;  %5705 = vmatpush.msrb.mxu3 %v8375_v11 }
0x1343   : > { %5439 = vmatmul.f32.vlgmr.msrb.gmra.mxu2 %v5336_v38 }
0x1344   : > { %5675 = vmatpush.msrb.mxu2 %v8355_v3 }
0x138a   : > { %v5308_v44 = vpop.permute.xlu2 %5307 }
0x13a2   : > { %v5311_v42 = vpop.permute.xlu0 %5310 }
0x13a3   : > { %v5313_v45 = vsel %vm77_vm2, %v5308_v44, %v5311_v42 }
0x13a4   : > { %v5315_v47 = vmul.f32 %v5313_v45, %v5313_v45 }
0x13a6   : > { %v5316_v51 = vadd.f32 %v5315_v47, %v5314_v49 }
0x13a8   : > { %v5465_v55 = vmul.f32 %v8338_v1, %v5316_v51 }
0x13aa   : > { %v5466_v61 = vmul.f32 %v5465_v55, %v5313_v45 }
0x13b2   : > { %v5392_v50 = vpop.f32.mrf.mxu0 }
0x13b4   : > { %v5416_v53 = vpop.f32.mrf.mxu1 }
0x13b6   : > { %v5368_v48 = vpop.f32.mrf.mxu3 }
0x13be   : > { %v5342_v22 = vpop.f32.mrf.mxu2  ;;  %v5462_v33 = vpop.f32.mrf.mxu3 }
0x13bf   : > { %v5369_v54 = vadd.f32 %v5368_v48, %v5342_v22  ;;  %v5304_v22 = vmul.f32 5.754156e-05, %v8827_v35 }
0x13c1   : > { %v5393_v52 = vadd.f32 %v5392_v50, %v5369_v54 }
0x13c3   : > { %v5417_v56 = vadd.f32 %v5416_v53, %v5393_v52  ;;  %v5305_v52 = vadd.f32 %v5304_v22, %v8809_v6 }
0x13c6   : > { %v5440_v58 = vpop.f32.mrf.mxu2 }
0x13c7   : > { %v5441_v59 = vadd.f32 %v5440_v58, %v5417_v56 }
0x13c9   : > { %v5463_v62 = vadd.f32 %v5462_v33, %v5441_v59 }
0x13cb   : > { %v5467_v8 = vadd.f32 %v5466_v61, %v5463_v62 }
0x13cd   : > { %v5474_v13 = vmul.f32 -0.006791399, %v5467_v8  ;;  %v5468_v46 = vmul.f32 0.00014204545, %v5467_v8  ;;  %v5470_v14 = vmul.f32 -0.0023569025, %v5467_v8 }
0x13ce   : > { %v5472_v16 = vmul.f32 -0.007320577, %v5467_v8 }
0x13cf   : > { %v5469_v17 = vadd.f32 %v5468_v46, %v5297_v9  ;;  %v5471_v18 = vadd.f32 %v5470_v14, %v5299_v12  ;;  %v5475_v20 = vadd.f32 %v5474_v13, %v5303_v19 }
0x13d0   : > { %v5473_v21 = vadd.f32 %v5472_v16, %v5301_v15 }
0x13d1   : > { %5480 = vrot.lane.b32.xlu2 %v5469_v17, %s8306_s28  ;;  %5477 = vrot.lane.b32.xlu1 %v5469_v17, %s8305_s27  ;;  %v5487_v23 = vsel %vm82_vm1, %v5469_v17, 0  ;;  %v5484_v36 = vmul.f32 %v5469_v17, %v5469_v17 }
0x13d2   : > { %v5506_v24 = vand.u32 4294901760, %v5487_v23 }
0x13d4   : > { %5537 = vmatmul.f32.vlgmr.msra.gmra.mxu1 %v5506_v24  ;;  %v5507_v57 = vsub.f32 %v5487_v23, %v5506_v24 }
0x13d5   : > { %5751 = vmatpush.msra.mxu1 %v8355_v3 }
0x13d6   : > { %5561 = vmatmul.f32.vlgmr.msra.gmra.mxu2 %v5507_v57  ;;  %v5508_v25 = vand.u32 4294901760, %v5507_v57 }
0x13d7   : > { %5777 = vmatpush.msra.mxu2 %v8369_v7 }
0x13d8   : > { %5585 = vmatmul.f32.vlgmr.msra.gmra.mxu3 %v5508_v25  ;;  %v5509_v30 = vsub.f32 %v5507_v57, %v5508_v25 }
0x13d9   : > { %5799 = vmatpush.msra.mxu3 %v8355_v3 }
0x13da   : > { %v5510_v26 = vand.u32 4294901760, %v5509_v30 }
0x13dc   : > { %5511 = vmatmul.f32.vlgmr.msra.gmra.mxu0 %v5510_v26  ;;  %5631 = vmatmul.f32.vlgmr.msrb.gmra.mxu1 %v5506_v24 }
0x13dd   : > { %5728 = vmatpush.msra.mxu0 %v8361_v4  ;;  %5873 = vmatpush.msrb.mxu1 %v8375_v11 }
0x13e4   : > { %5609 = vmatmul.f32.vlgmr.msrb.gmra.mxu0 %v5506_v24 }
0x13e5   : > { %5843 = vmatpush.msrb.mxu0 %v8355_v3 }
0x142b   : > { %v5481_v28 = vpop.permute.xlu2 %5480 }
0x1443   : > { %v5478_v27 = vpop.permute.xlu1 %5477 }
0x1444   : > { %v5483_v29 = vsel %vm77_vm2, %v5478_v27, %v5481_v28 }
0x1445   : > { %v5485_v31 = vmul.f32 %v5483_v29, %v5483_v29 }
0x1447   : > { %v5486_v38 = vadd.f32 %v5485_v31, %v5484_v36 }
0x1449   : > { %v5635_v40 = vmul.f32 %v8338_v1, %v5486_v38 }
0x144b   : > { %v5636_v47 = vmul.f32 %v5635_v40, %v5483_v29 }
0x1451   : > { %v5538_v32 = vpop.f32.mrf.mxu1 }
0x1459   : > { %v5512_v34 = vpop.f32.mrf.mxu0  ;;  %v5562_v10 = vpop.f32.mrf.mxu2 }
0x145a   : > { %v5539_v37 = vadd.f32 %v5538_v32, %v5512_v34  ;;  %v5632_v45 = vpop.f32.mrf.mxu1 }
0x145b   : > { %v5586_v39 = vpop.f32.mrf.mxu3 }
0x145c   : > { %v5563_v43 = vadd.f32 %v5562_v10, %v5539_v37 }
0x145e   : > { %v5587_v41 = vadd.f32 %v5586_v39, %v5563_v43 }
0x1461   : > { %v5610_v42 = vpop.f32.mrf.mxu0 }
0x1462   : > { %v5611_v44 = vadd.f32 %v5610_v42, %v5587_v41 }
0x1464   : > { %v5633_v48 = vadd.f32 %v5632_v45, %v5611_v44 }
0x1466   : > { %v5637_v49 = vadd.f32 %v5636_v47, %v5633_v48 }
0x1468   : > { %v5642_v54 = vmul.f32 0.0056227418, %v5637_v49  ;;  %v5644_v50 = vmul.f32 0.00028360877, %v5637_v49  ;;  %v5638_v51 = vmul.f32 0.002244669, %v5637_v49 }
0x1469   : > { %v5640_v53 = vmul.f32 0.0062013213, %v5637_v49 }
0x146a   : > { %v5639_v55 = vadd.f32 %v5638_v51, %v5471_v18  ;;  %v5645_v56 = vadd.f32 %v5644_v50, %v5305_v52  ;;  %v5643_v58 = vadd.f32 %v5642_v54, %v5475_v20 }
0x146b   : > { %v5641_v59 = vadd.f32 %v5640_v53, %v5473_v21 }
0x146c   : > { %5650 = vrot.lane.b32.xlu1 %v5639_v55, %s8306_s28  ;;  %5647 = vrot.lane.b32.xlu0 %v5639_v55, %s8305_s27  ;;  %v5657_v33 = vsel %vm82_vm1, %v5639_v55, 0  ;;  %v5654_v13 = vmul.f32 %v5639_v55, %v5639_v55 }
0x146d   : > { %v5676_v60 = vand.u32 4294901760, %v5657_v33 }
0x146f   : > { %5707 = vmatmul.f32.vlgmr.msrb.gmra.mxu3 %v5676_v60  ;;  %v5677_v35 = vsub.f32 %v5657_v33, %v5676_v60 }
0x1470   : > { %5919 = vmatpush.msrb.mxu3 %v8355_v3 }
0x1471   : > { %5731 = vmatmul.f32.vlgmr.msra.gmra.mxu0 %v5677_v35  ;;  %v5678_v2 = vand.u32 4294901760, %v5677_v35 }
0x1472   : > { %5945 = vmatpush.msra.mxu0 %v8369_v7 }
0x1473   : > { %5755 = vmatmul.f32.vlgmr.msra.gmra.mxu1 %v5678_v2  ;;  %v5679_v6 = vsub.f32 %v5677_v35, %v5678_v2 }
0x1474   : > { %5967 = vmatpush.msra.mxu1 %v8355_v3 }
0x1475   : > { %v5680_v61 = vand.u32 4294901760, %v5679_v6 }
0x1477   : > { %5681 = vmatmul.f32.vlgmr.msrb.gmra.mxu2 %v5680_v61  ;;  %5801 = vmatmul.f32.vlgmr.msra.gmra.mxu3 %v5676_v60 }
0x1478   : > { %5896 = vmatpush.msrb.mxu2 %v8361_v4  ;;  %6039 = vmatpush.msra.mxu3 %v8375_v11 }
0x147f   : > { %5779 = vmatmul.f32.vlgmr.msra.gmra.mxu2 %v5676_v60 }
0x1480   : > { %6009 = vmatpush.msra.mxu2 %v8355_v3 }
0x14de   : > { %v5651_v62 = vpop.permute.xlu1 %5650  ;;  %v5648_v63 = vpop.permute.xlu0 %5647 }
0x14df   : > { %v5653_v5 = vsel %vm77_vm2, %v5648_v63, %v5651_v62 }
0x14e0   : > { %v5655_v8 = vmul.f32 %v5653_v5, %v5653_v5 }
0x14e2   : > { %v5656_v19 = vadd.f32 %v5655_v8, %v5654_v13 }
0x14e4   : > { %v5805_v17 = vmul.f32 %v8338_v1, %v5656_v19 }
0x14e6   : > { %v5806_v24 = vmul.f32 %v5805_v17, %v5653_v5 }
0x14ee   : > { %v5732_v14 = vpop.f32.mrf.mxu0 }
0x14f0   : > { %v5756_v16 = vpop.f32.mrf.mxu1 }
0x14f2   : > { %v5708_v9 = vpop.f32.mrf.mxu3 }
0x14fa   : > { %v5682_v12 = vpop.f32.mrf.mxu2  ;;  %v5802_v23 = vpop.f32.mrf.mxu3 }
0x14fb   : > { %v5709_v46 = vadd.f32 %v5708_v9, %v5682_v12 }
0x14fd   : > { %v5733_v15 = vadd.f32 %v5732_v14, %v5709_v46 }
0x14ff   : > { %v5757_v18 = vadd.f32 %v5756_v16, %v5733_v15 }
0x1502   : > { %v5780_v20 = vpop.f32.mrf.mxu2 }
0x1503   : > { %v5781_v21 = vadd.f32 %v5780_v20, %v5757_v18 }
0x1505   : > { %v5803_v57 = vadd.f32 %v5802_v23, %v5781_v21 }
0x1507   : > { %v5807_v25 = vadd.f32 %v5806_v24, %v5803_v57 }
0x1509   : > { %v5808_v30 = vmul.f32 -0.00018359175, %v5807_v25  ;;  %v5810_v26 = vmul.f32 0.00017576331, %v5807_v25  ;;  %v5812_v27 = vmul.f32 0.00041101116, %v5807_v25 }
0x150b   : > { %v5809_v28 = vadd.f32 %v5808_v30, %v5641_v59  ;;  %v5813_v29 = vadd.f32 %v5812_v27, %v5645_v56  ;;  %v5811_v31 = vadd.f32 %v5810_v26, %v5643_v58 }
0x150d   : > { %5818 = vrot.lane.b32.xlu0 %v5809_v28, %s8306_s28  ;;  %5815 = vrot.lane.b32.xlu2 %v5809_v28, %s8305_s27  ;;  %v5825_v32 = vsel %vm82_vm1, %v5809_v28, 0  ;;  %v5822_v45 = vmul.f32 %v5809_v28, %v5809_v28 }
0x150e   : > { %v5844_v34 = vand.u32 4294901760, %v5825_v32 }
0x1510   : > { %5875 = vmatmul.f32.vlgmr.msrb.gmra.mxu1 %v5844_v34  ;;  %v5845_v36 = vsub.f32 %v5825_v32, %v5844_v34 }
0x1511   : > { %6085 = vmatpush.msrb.mxu1 %v8355_v3 }
0x1512   : > { %5899 = vmatmul.f32.vlgmr.msrb.gmra.mxu2 %v5845_v36  ;;  %v5846_v37 = vand.u32 4294901760, %v5845_v36 }
0x1513   : > { %6111 = vmatpush.msrb.mxu2 %v8369_v7 }
0x1514   : > { %5923 = vmatmul.f32.vlgmr.msrb.gmra.mxu3 %v5846_v37  ;;  %v5847_v10 = vsub.f32 %v5845_v36, %v5846_v37 }
0x1515   : > { %6133 = vmatpush.msrb.mxu3 %v8355_v3 }
0x1516   : > { %v5848_v38 = vand.u32 4294901760, %v5847_v10 }
0x1518   : > { %5849 = vmatmul.f32.vlgmr.msrb.gmra.mxu0 %v5848_v38  ;;  %5969 = vmatmul.f32.vlgmr.msra.gmra.mxu1 %v5844_v34 }
0x1519   : > { %6062 = vmatpush.msrb.mxu0 %v8361_v4  ;;  %6203 = vmatpush.msra.mxu1 %v8375_v11 }
0x1520   : > { %5947 = vmatmul.f32.vlgmr.msra.gmra.mxu0 %v5844_v34 }
0x1521   : > { %6173 = vmatpush.msra.mxu0 %v8355_v3 }
0x1567   : > { %v5816_v39 = vpop.permute.xlu2 %5815 }
0x157f   : > { %v5819_v43 = vpop.permute.xlu0 %5818 }
0x1580   : > { %v5821_v40 = vsel %vm77_vm2, %v5816_v39, %v5819_v43 }
0x1581   : > { %v5823_v41 = vmul.f32 %v5821_v40, %v5821_v40 }
0x1583   : > { %v5824_v22 = vadd.f32 %v5823_v41, %v5822_v45 }
0x1585   : > { %v5973_v50 = vmul.f32 %v8338_v1, %v5824_v22 }
0x1587   : > { %v5974_v56 = vmul.f32 %v5973_v50, %v5821_v40 }
0x158d   : > { %v5876_v42 = vpop.f32.mrf.mxu1 }
0x1595   : > { %v5850_v44 = vpop.f32.mrf.mxu0  ;;  %v5900_v48 = vpop.f32.mrf.mxu2 }
0x1596   : > { %v5877_v47 = vadd.f32 %v5876_v42, %v5850_v44  ;;  %v5970_v55 = vpop.f32.mrf.mxu1 }
0x1597   : > { %v5924_v54 = vpop.f32.mrf.mxu3 }
0x1598   : > { %v5901_v49 = vadd.f32 %v5900_v48, %v5877_v47 }
0x159a   : > { %v5925_v51 = vadd.f32 %v5924_v54, %v5901_v49 }
0x159d   : > { %v5948_v52 = vpop.f32.mrf.mxu0 }
0x159e   : > { %v5949_v53 = vadd.f32 %v5948_v52, %v5925_v51 }
0x15a0   : > { %v5971_v58 = vadd.f32 %v5970_v55, %v5949_v53 }
0x15a2   : > { %v5975_v59 = vadd.f32 %v5974_v56, %v5971_v58 }
0x15a4   : > { %v5976_v33 = vmul.f32 -0.00017268391, %v5975_v59  ;;  %v5978_v60 = vmul.f32 -0.00020352032, %v5975_v59 }
0x15a6   : > { %v5979_v35 = vadd.f32 %v5978_v60, %v5813_v29  ;;  %v5977_v2 = vadd.f32 %v5976_v33, %v5811_v31 }
0x15a8   : > { %5984 = vrot.lane.b32.xlu2 %v5977_v2, %s8306_s28  ;;  %5981 = vrot.lane.b32.xlu1 %v5977_v2, %s8305_s27  ;;  %v5991_v6 = vsel %vm82_vm1, %v5977_v2, 0  ;;  %v5988_v15 = vmul.f32 %v5977_v2, %v5977_v2 }
0x15a9   : > { %v6010_v61 = vand.u32 4294901760, %v5991_v6 }
0x15ab   : > { %6041 = vmatmul.f32.vlgmr.msra.gmra.mxu3 %v6010_v61  ;;  %v6011_v62 = vsub.f32 %v5991_v6, %v6010_v61 }
0x15ac   : > { %6249 = vmatpush.msra.mxu3 %v8355_v3 }
0x15ad   : > { %6065 = vmatmul.f32.vlgmr.msrb.gmra.mxu0 %v6011_v62  ;;  %v6012_v63 = vand.u32 4294901760, %v6011_v62 }
0x15ae   : > { %6275 = vmatpush.msrb.mxu0 %v8369_v7 }
0x15af   : > { %6089 = vmatmul.f32.vlgmr.msrb.gmra.mxu1 %v6012_v63  ;;  %v6013_v5 = vsub.f32 %v6011_v62, %v6012_v63 }
0x15b0   : > { %6297 = vmatpush.msrb.mxu1 %v8355_v3 }
0x15b1   : > { %v6014_v8 = vand.u32 4294901760, %v6013_v5 }
0x15b3   : > { %6015 = vmatmul.f32.vlgmr.msra.gmra.mxu2 %v6014_v8  ;;  %6135 = vmatmul.f32.vlgmr.msrb.gmra.mxu3 %v6010_v61 }
0x15b4   : > { %6226 = vmatpush.msra.mxu2 %v8361_v4  ;;  %6377 = vmatpush.msrb.mxu3 %v8375_v11 }
0x15bb   : > { %6113 = vmatmul.f32.vlgmr.msrb.gmra.mxu2 %v6010_v61 }
0x15bc   : > { %6347 = vmatpush.msrb.mxu2 %v8355_v3 }
0x1602   : > { %v5985_v12 = vpop.permute.xlu2 %5984 }
0x161a   : > { %v5982_v9 = vpop.permute.xlu1 %5981 }
0x161b   : > { %v5987_v13 = vsel %vm77_vm2, %v5982_v9, %v5985_v12 }
0x161c   : > { %v5989_v46 = vmul.f32 %v5987_v13, %v5987_v13 }
0x161e   : > { %v5990_v18 = vadd.f32 %v5989_v46, %v5988_v15 }
0x1620   : > { %v6139_v23 = vmul.f32 %v8338_v1, %v5990_v18 }
0x1622   : > { %v6140_v26 = vmul.f32 %v6139_v23, %v5987_v13 }
0x162a   : > { %v6066_v17 = vpop.f32.mrf.mxu0 }
0x162c   : > { %v6090_v21 = vpop.f32.mrf.mxu1 }
0x162e   : > { %v6042_v14 = vpop.f32.mrf.mxu3 }
0x1636   : > { %v6016_v19 = vpop.f32.mrf.mxu2  ;;  %v6136_v30 = vpop.f32.mrf.mxu3 }
0x1637   : > { %v6043_v16 = vadd.f32 %v6042_v14, %v6016_v19 }
0x1639   : > { %v6067_v20 = vadd.f32 %v6066_v17, %v6043_v16 }
0x163b   : > { %v6091_v24 = vadd.f32 %v6090_v21, %v6067_v20 }
0x163e   : > { %v6114_v57 = vpop.f32.mrf.mxu2 }
0x163f   : > { %v6115_v25 = vadd.f32 %v6114_v57, %v6091_v24 }
0x1641   : > { %v6137_v27 = vadd.f32 %v6136_v30, %v6115_v25 }
0x1643   : > { %v6141_v28 = vadd.f32 %v6140_v26, %v6137_v27 }
0x1645   : > { %v6142_v29 = vmul.f32 8.2671955e-05, %v6141_v28 }
0x1647   : > { %v8896_v31 = vadd.f32 %v6142_v29, %v5979_v35 }
0x1649   : > { %6148 = vrot.lane.b32.xlu1 %v8896_v31, %s8306_s28  ;;  %6145 = vrot.lane.b32.xlu0 %v8896_v31, %s8305_s27  ;;  %v6155_v32 = vsel %vm82_vm1, %v8896_v31, 0  ;;  %v6152_v45 = vmul.f32 %v8896_v31, %v8896_v31 }
0x164a   : > { %v6174_v34 = vand.u32 4294901760, %v6155_v32 }
0x164c   : > { %6205 = vmatmul.f32.vlgmr.msra.gmra.mxu1 %v6174_v34  ;;  %v6175_v36 = vsub.f32 %v6155_v32, %v6174_v34 }
0x164d   : > { %6423 = vmatpush.msra.mxu1 %v8355_v3 }
0x164e   : > { %6229 = vmatmul.f32.vlgmr.msra.gmra.mxu2 %v6175_v36  ;;  %v6176_v37 = vand.u32 4294901760, %v6175_v36 }
0x164f   : > { %6449 = vmatpush.msra.mxu2 %v8369_v7 }
0x1650   : > { %6253 = vmatmul.f32.vlgmr.msra.gmra.mxu3 %v6176_v37  ;;  %v6177_v10 = vsub.f32 %v6175_v36, %v6176_v37 }
0x1651   : > { %6471 = vmatpush.msra.mxu3 %v8355_v3 }
0x1652   : > { %v6178_v38 = vand.u32 4294901760, %v6177_v10 }
0x1654   : > { %6179 = vmatmul.f32.vlgmr.msra.gmra.mxu0 %v6178_v38  ;;  %6299 = vmatmul.f32.vlgmr.msrb.gmra.mxu1 %v6174_v34 }
0x1655   : > { %6400 = vmatpush.msra.mxu0 %v8361_v4  ;;  %6547 = vmatpush.msrb.mxu1 %v8375_v11 }
0x165c   : > { %6277 = vmatmul.f32.vlgmr.msrb.gmra.mxu0 %v6174_v34 }
0x165d   : > { %6517 = vmatpush.msrb.mxu0 %v8355_v3 }
0x16bb   : > { %v6149_v43 = vpop.permute.xlu1 %6148  ;;  %v6146_v39 = vpop.permute.xlu0 %6145 }
0x16bc   : > { %v6151_v40 = vsel %vm77_vm2, %v6146_v39, %v6149_v43 }
0x16bd   : > { %v6153_v41 = vmul.f32 %v6151_v40, %v6151_v40 }
0x16bf   : > { %v6154_v22 = vadd.f32 %v6153_v41, %v6152_v45 }
0x16c1   : > { %v6303_v50 = vmul.f32 %v8338_v1, %v6154_v22 }
0x16c3   : > { %v6304_v56 = vmul.f32 %v6303_v50, %v6151_v40 }
0x16c9   : > { %v6206_v42 = vpop.f32.mrf.mxu1 }
0x16d1   : > { %v6180_v44 = vpop.f32.mrf.mxu0  ;;  %v6230_v48 = vpop.f32.mrf.mxu2 }
0x16d2   : > { %v6207_v47 = vadd.f32 %v6206_v42, %v6180_v44  ;;  %v6300_v55 = vpop.f32.mrf.mxu1 }
0x16d3   : > { %v6254_v54 = vpop.f32.mrf.mxu3 }
0x16d4   : > { %v6231_v49 = vadd.f32 %v6230_v48, %v6207_v47 }
0x16d6   : > { %v6255_v51 = vadd.f32 %v6254_v54, %v6231_v49 }
0x16d9   : > { %v6278_v52 = vpop.f32.mrf.mxu0 }
0x16da   : > { %v6279_v53 = vadd.f32 %v6278_v52, %v6255_v51 }
0x16dc   : > { %v6301_v58 = vadd.f32 %v6300_v55, %v6279_v53 }
0x16de   : > { %v8914_v59 = vadd.f32 %v6304_v56, %v6301_v58 }
0x16e0   : > { %v6306_v33 = vmul.f32 0.00012626263, %v8914_v59  ;;  %v6308_v25 = vmul.f32 4.7348483e-05, %v8914_v59  ;;  %v6312_v30 = vmul.f32 0.0018640143, %v8914_v59 }
0x16e1   : > { %v6314_v28 = vmul.f32 0.001796891, %v8914_v59  ;;  %v6310_v29 = vmul.f32 0.000617284, %v8914_v59 }
0x16e2   : > { %v6307_v60 = vadd.f32 %v6306_v33, %v8896_v31  ;;  %v6309_v34 = vadd.f32 %v6308_v25, %v8896_v31  ;;  %v6313_v36 = vadd.f32 %v6312_v30, %v8896_v31 }
0x16e3   : > { %v6315_v43 = vadd.f32 %v6314_v28, %v8896_v31  ;;  %v6311_v39 = vadd.f32 %v6310_v29, %v8896_v31 }
0x16e4   : > { %6322 = vrot.lane.b32.xlu0 %v6307_v60, %s8306_s28  ;;  %6319 = vrot.lane.b32.xlu2 %v6307_v60, %s8305_s27  ;;  %v6329_v35 = vsel %vm82_vm1, %v6307_v60, 0  ;;  %v6326_v14 = vmul.f32 %v6307_v60, %v6307_v60 }
0x16e5   : > { %v6348_v2 = vand.u32 4294901760, %v6329_v35 }
0x16e7   : > { %6379 = vmatmul.f32.vlgmr.msrb.gmra.mxu3 %v6348_v2  ;;  %v6349_v6 = vsub.f32 %v6329_v35, %v6348_v2 }
0x16e8   : > { %6593 = vmatpush.msrb.mxu3 %v8355_v3 }
0x16e9   : > { %6403 = vmatmul.f32.vlgmr.msra.gmra.mxu0 %v6349_v6  ;;  %v6350_v61 = vand.u32 4294901760, %v6349_v6 }
0x16ea   : > { %6619 = vmatpush.msra.mxu0 %v8369_v7 }
0x16eb   : > { %6427 = vmatmul.f32.vlgmr.msra.gmra.mxu1 %v6350_v61  ;;  %v6351_v62 = vsub.f32 %v6349_v6, %v6350_v61 }
0x16ec   : > { %6641 = vmatpush.msra.mxu1 %v8355_v3 }
0x16ed   : > { %v6352_v63 = vand.u32 4294901760, %v6351_v62 }
0x16ef   : > { %6353 = vmatmul.f32.vlgmr.msrb.gmra.mxu2 %v6352_v63  ;;  %6473 = vmatmul.f32.vlgmr.msra.gmra.mxu3 %v6348_v2 }
0x16f0   : > { %6570 = vmatpush.msrb.mxu2 %v8361_v4  ;;  %6717 = vmatpush.msra.mxu3 %v8375_v11 }
0x16f7   : > { %6451 = vmatmul.f32.vlgmr.msra.gmra.mxu2 %v6348_v2 }
0x16f8   : > { %6687 = vmatpush.msra.mxu2 %v8355_v3 }
0x173e   : > { %v6320_v8 = vpop.permute.xlu2 %6319 }
0x1756   : > { %v6323_v5 = vpop.permute.xlu0 %6322 }
0x1757   : > { %v6325_v9 = vsel %vm77_vm2, %v6320_v8, %v6323_v5 }
0x1758   : > { %v6327_v12 = vmul.f32 %v6325_v9, %v6325_v9 }
0x175a   : > { %v6328_v16 = vadd.f32 %v6327_v12, %v6326_v14 }
0x175c   : > { %v6477_v20 = vmul.f32 %v8338_v1, %v6328_v16 }
0x175e   : > { %v6478_v26 = vmul.f32 %v6477_v20, %v6325_v9 }
0x1766   : > { %v6404_v15 = vpop.f32.mrf.mxu0 }
0x1768   : > { %v6428_v18 = vpop.f32.mrf.mxu1 }
0x176a   : > { %v6380_v13 = vpop.f32.mrf.mxu3 }
0x1772   : > { %v6354_v46 = vpop.f32.mrf.mxu2  ;;  %v6474_v57 = vpop.f32.mrf.mxu3 }
0x1773   : > { %v6381_v19 = vadd.f32 %v6380_v13, %v6354_v46  ;;  %v6316_v46 = vmul.f32 5.754156e-05, %v8914_v59 }
0x1775   : > { %v6405_v17 = vadd.f32 %v6404_v15, %v6381_v19 }
0x1777   : > { %v6429_v21 = vadd.f32 %v6428_v18, %v6405_v17  ;;  %v6317_v17 = vadd.f32 %v6316_v46, %v8896_v31 }
0x177a   : > { %v6452_v23 = vpop.f32.mrf.mxu2 }
0x177b   : > { %v6453_v24 = vadd.f32 %v6452_v23, %v6429_v21 }
0x177d   : > { %v6475_v27 = vadd.f32 %v6474_v57, %v6453_v24 }
0x177f   : > { %v6479_v32 = vadd.f32 %v6478_v26, %v6475_v27 }
0x1781   : > { %v6484_v37 = vmul.f32 -0.007320577, %v6479_v32  ;;  %v6486_v10 = vmul.f32 -0.006791399, %v6479_v32  ;;  %v6480_v38 = vmul.f32 0.00014204545, %v6479_v32 }
0x1782   : > { %v6482_v40 = vmul.f32 -0.0023569025, %v6479_v32 }
0x1783   : > { %v6481_v41 = vadd.f32 %v6480_v38, %v6309_v34  ;;  %v6485_v42 = vadd.f32 %v6484_v37, %v6313_v36  ;;  %v6487_v44 = vadd.f32 %v6486_v10, %v6315_v43 }
0x1784   : > { %v6483_v45 = vadd.f32 %v6482_v40, %v6311_v39 }
0x1785   : > { %6492 = vrot.lane.b32.xlu2 %v6481_v41, %s8306_s28  ;;  %6489 = vrot.lane.b32.xlu1 %v6481_v41, %s8305_s27  ;;  %v6499_v47 = vsel %vm82_vm1, %v6481_v41, 0  ;;  %v6496_v33 = vmul.f32 %v6481_v41, %v6481_v41 }
0x1786   : > { %v6518_v48 = vand.u32 4294901760, %v6499_v47 }
0x1788   : > { %6549 = vmatmul.f32.vlgmr.msrb.gmra.mxu1 %v6518_v48  ;;  %v6519_v22 = vsub.f32 %v6499_v47, %v6518_v48 }
0x1789   : > { %6763 = vmatpush.msrb.mxu1 %v8355_v3 }
0x178a   : > { %6573 = vmatmul.f32.vlgmr.msrb.gmra.mxu2 %v6519_v22  ;;  %v6520_v49 = vand.u32 4294901760, %v6519_v22 }
0x178b   : > { %6789 = vmatpush.msrb.mxu2 %v8369_v7 }
0x178c   : > { %6597 = vmatmul.f32.vlgmr.msrb.gmra.mxu3 %v6520_v49  ;;  %v6521_v54 = vsub.f32 %v6519_v22, %v6520_v49 }
0x178d   : > { %6811 = vmatpush.msrb.mxu3 %v8355_v3 }
0x178e   : > { %v6522_v50 = vand.u32 4294901760, %v6521_v54 }
0x1790   : > { %6523 = vmatmul.f32.vlgmr.msrb.gmra.mxu0 %v6522_v50  ;;  %6643 = vmatmul.f32.vlgmr.msra.gmra.mxu1 %v6518_v48 }
0x1791   : > { %6740 = vmatpush.msrb.mxu0 %v8361_v4  ;;  %6885 = vmatpush.msra.mxu1 %v8375_v11 }
0x1798   : > { %6621 = vmatmul.f32.vlgmr.msra.gmra.mxu0 %v6518_v48 }
0x1799   : > { %6855 = vmatpush.msra.mxu0 %v8355_v3 }
0x17df   : > { %v6493_v52 = vpop.permute.xlu2 %6492 }
0x17f7   : > { %v6490_v51 = vpop.permute.xlu1 %6489 }
0x17f8   : > { %v6495_v53 = vsel %vm77_vm2, %v6490_v51, %v6493_v52 }
0x17f9   : > { %v6497_v55 = vmul.f32 %v6495_v53, %v6495_v53 }
0x17fb   : > { %v6498_v2 = vadd.f32 %v6497_v55, %v6496_v33 }
0x17fd   : > { %v6647_v62 = vmul.f32 %v8338_v1, %v6498_v2 }
0x17ff   : > { %v6648_v12 = vmul.f32 %v6647_v62, %v6495_v53 }
0x1805   : > { %v6550_v56 = vpop.f32.mrf.mxu1 }
0x180d   : > { %v6524_v58 = vpop.f32.mrf.mxu0  ;;  %v6574_v35 = vpop.f32.mrf.mxu2 }
0x180e   : > { %v6551_v60 = vadd.f32 %v6550_v56, %v6524_v58  ;;  %v6644_v9 = vpop.f32.mrf.mxu1 }
0x180f   : > { %v6598_v61 = vpop.f32.mrf.mxu3 }
0x1810   : > { %v6575_v6 = vadd.f32 %v6574_v35, %v6551_v60 }
0x1812   : > { %v6599_v63 = vadd.f32 %v6598_v61, %v6575_v6 }
0x1815   : > { %v6622_v5 = vpop.f32.mrf.mxu0 }
0x1816   : > { %v6623_v8 = vadd.f32 %v6622_v5, %v6599_v63 }
0x1818   : > { %v6645_v13 = vadd.f32 %v6644_v9, %v6623_v8 }
0x181a   : > { %v6649_v14 = vadd.f32 %v6648_v12, %v6645_v13 }
0x181c   : > { %v6654_v19 = vmul.f32 0.0056227418, %v6649_v14  ;;  %v6656_v15 = vmul.f32 0.00028360877, %v6649_v14  ;;  %v6650_v16 = vmul.f32 0.002244669, %v6649_v14 }
0x181d   : > { %v6652_v18 = vmul.f32 0.0062013213, %v6649_v14 }
0x181e   : > { %v6651_v20 = vadd.f32 %v6650_v16, %v6483_v45  ;;  %v6657_v21 = vadd.f32 %v6656_v15, %v6317_v17  ;;  %v6655_v23 = vadd.f32 %v6654_v19, %v6487_v44 }
0x181f   : > { %v6653_v24 = vadd.f32 %v6652_v18, %v6485_v42 }
0x1820   : > { %6662 = vrot.lane.b32.xlu1 %v6651_v20, %s8306_s28  ;;  %6659 = vrot.lane.b32.xlu0 %v6651_v20, %s8305_s27  ;;  %v6669_v57 = vsel %vm82_vm1, %v6651_v20, 0  ;;  %v6666_v37 = vmul.f32 %v6651_v20, %v6651_v20 }
0x1821   : > { %v6688_v25 = vand.u32 4294901760, %v6669_v57 }
0x1823   : > { %6719 = vmatmul.f32.vlgmr.msra.gmra.mxu3 %v6688_v25  ;;  %v6689_v59 = vsub.f32 %v6669_v57, %v6688_v25 }
0x1824   : > { %6931 = vmatpush.msra.mxu3 %v8355_v3 }
0x1825   : > { %6743 = vmatmul.f32.vlgmr.msrb.gmra.mxu0 %v6689_v59  ;;  %v6690_v30 = vand.u32 4294901760, %v6689_v59 }
0x1826   : > { %6957 = vmatpush.msrb.mxu0 %v8369_v7 }
0x1827   : > { %6767 = vmatmul.f32.vlgmr.msrb.gmra.mxu1 %v6690_v30  ;;  %v6691_v31 = vsub.f32 %v6689_v59, %v6690_v30 }
0x1828   : > { %6979 = vmatpush.msrb.mxu1 %v8355_v3 }
0x1829   : > { %v6692_v26 = vand.u32 4294901760, %v6691_v31 }
0x182b   : > { %6693 = vmatmul.f32.vlgmr.msra.gmra.mxu2 %v6692_v26  ;;  %6813 = vmatmul.f32.vlgmr.msrb.gmra.mxu3 %v6688_v25 }
0x182c   : > { %6908 = vmatpush.msra.mxu2 %v8361_v4  ;;  %7051 = vmatpush.msrb.mxu3 %v8375_v11 }
0x1833   : > { %6791 = vmatmul.f32.vlgmr.msrb.gmra.mxu2 %v6688_v25 }
0x1834   : > { %7021 = vmatpush.msrb.mxu2 %v8355_v3 }
0x1892   : > { %v6663_v27 = vpop.permute.xlu1 %6662  ;;  %v6660_v28 = vpop.permute.xlu0 %6659 }
0x1893   : > { %v6665_v29 = vsel %vm77_vm2, %v6660_v28, %v6663_v27 }
0x1894   : > { %v6667_v32 = vmul.f32 %v6665_v29, %v6665_v29 }
0x1896   : > { %v6668_v43 = vadd.f32 %v6667_v32, %v6666_v37 }
0x1898   : > { %v6817_v41 = vmul.f32 %v8338_v1, %v6668_v43 }
0x189a   : > { %v6818_v48 = vmul.f32 %v6817_v41, %v6665_v29 }
0x18a2   : > { %v6744_v38 = vpop.f32.mrf.mxu0 }
0x18a4   : > { %v6768_v40 = vpop.f32.mrf.mxu1 }
0x18a6   : > { %v6720_v34 = vpop.f32.mrf.mxu3 }
0x18ae   : > { %v6694_v36 = vpop.f32.mrf.mxu2  ;;  %v6814_v47 = vpop.f32.mrf.mxu3 }
0x18af   : > { %v6721_v10 = vadd.f32 %v6720_v34, %v6694_v36 }
0x18b1   : > { %v6745_v39 = vadd.f32 %v6744_v38, %v6721_v10 }
0x18b3   : > { %v6769_v42 = vadd.f32 %v6768_v40, %v6745_v39 }
0x18b6   : > { %v6792_v44 = vpop.f32.mrf.mxu2 }
0x18b7   : > { %v6793_v45 = vadd.f32 %v6792_v44, %v6769_v42 }
0x18b9   : > { %v6815_v22 = vadd.f32 %v6814_v47, %v6793_v45 }
0x18bb   : > { %v6819_v49 = vadd.f32 %v6818_v48, %v6815_v22 }
0x18bd   : > { %v6820_v54 = vmul.f32 -0.00018359175, %v6819_v49  ;;  %v6822_v50 = vmul.f32 0.00017576331, %v6819_v49  ;;  %v6824_v51 = vmul.f32 0.00041101116, %v6819_v49 }
0x18bf   : > { %v6821_v52 = vadd.f32 %v6820_v54, %v6653_v24  ;;  %v6825_v53 = vadd.f32 %v6824_v51, %v6657_v21  ;;  %v6823_v55 = vadd.f32 %v6822_v50, %v6655_v23 }
0x18c1   : > { %6830 = vrot.lane.b32.xlu0 %v6821_v52, %s8306_s28  ;;  %6827 = vrot.lane.b32.xlu2 %v6821_v52, %s8305_s27  ;;  %v6837_v56 = vsel %vm82_vm1, %v6821_v52, 0  ;;  %v6834_v9 = vmul.f32 %v6821_v52, %v6821_v52 }
0x18c2   : > { %v6856_v58 = vand.u32 4294901760, %v6837_v56 }
0x18c4   : > { %6887 = vmatmul.f32.vlgmr.msra.gmra.mxu1 %v6856_v58  ;;  %v6857_v33 = vsub.f32 %v6837_v56, %v6856_v58 }
0x18c5   : > { %7097 = vmatpush.msra.mxu1 %v8355_v3 }
0x18c6   : > { %6911 = vmatmul.f32.vlgmr.msra.gmra.mxu2 %v6857_v33  ;;  %v6858_v60 = vand.u32 4294901760, %v6857_v33 }
0x18c7   : > { %7123 = vmatpush.msra.mxu2 %v8369_v7 }
0x18c8   : > { %6935 = vmatmul.f32.vlgmr.msra.gmra.mxu3 %v6858_v60  ;;  %v6859_v35 = vsub.f32 %v6857_v33, %v6858_v60 }
0x18c9   : > { %7145 = vmatpush.msra.mxu3 %v8355_v3 }
0x18ca   : > { %v6860_v2 = vand.u32 4294901760, %v6859_v35 }
0x18cc   : > { %6861 = vmatmul.f32.vlgmr.msra.gmra.mxu0 %v6860_v2  ;;  %6981 = vmatmul.f32.vlgmr.msrb.gmra.mxu1 %v6856_v58 }
0x18cd   : > { %7074 = vmatpush.msra.mxu0 %v8361_v4  ;;  %7215 = vmatpush.msrb.mxu1 %v8375_v11 }
0x18d4   : > { %6959 = vmatmul.f32.vlgmr.msrb.gmra.mxu0 %v6856_v58 }
0x18d5   : > { %7185 = vmatpush.msrb.mxu0 %v8355_v3 }
0x191b   : > { %v6828_v61 = vpop.permute.xlu2 %6827 }
0x1933   : > { %v6831_v6 = vpop.permute.xlu0 %6830 }
0x1934   : > { %v6833_v62 = vsel %vm77_vm2, %v6828_v61, %v6831_v6 }
0x1935   : > { %v6835_v63 = vmul.f32 %v6833_v62, %v6833_v62 }
0x1937   : > { %v6836_v46 = vadd.f32 %v6835_v63, %v6834_v9 }
0x1939   : > { %v6985_v15 = vmul.f32 %v8338_v1, %v6836_v46 }
0x193b   : > { %v6986_v21 = vmul.f32 %v6985_v15, %v6833_v62 }
0x1941   : > { %v6888_v5 = vpop.f32.mrf.mxu1 }
0x1949   : > { %v6862_v8 = vpop.f32.mrf.mxu0  ;;  %v6912_v13 = vpop.f32.mrf.mxu2 }
0x194a   : > { %v6889_v12 = vadd.f32 %v6888_v5, %v6862_v8  ;;  %v6982_v20 = vpop.f32.mrf.mxu1 }
0x194b   : > { %v6936_v19 = vpop.f32.mrf.mxu3 }
0x194c   : > { %v6913_v14 = vadd.f32 %v6912_v13, %v6889_v12 }
0x194e   : > { %v6937_v16 = vadd.f32 %v6936_v19, %v6913_v14 }
0x1951   : > { %v6960_v17 = vpop.f32.mrf.mxu0 }
0x1952   : > { %v6961_v18 = vadd.f32 %v6960_v17, %v6937_v16 }
0x1954   : > { %v6983_v23 = vadd.f32 %v6982_v20, %v6961_v18 }
0x1956   : > { %v6987_v24 = vadd.f32 %v6986_v21, %v6983_v23 }
0x1958   : > { %v6988_v57 = vmul.f32 -0.00017268391, %v6987_v24  ;;  %v6990_v25 = vmul.f32 -0.00020352032, %v6987_v24 }
0x195a   : > { %v6991_v59 = vadd.f32 %v6990_v25, %v6825_v53  ;;  %v6989_v30 = vadd.f32 %v6988_v57, %v6823_v55 }
0x195c   : > { %6996 = vrot.lane.b32.xlu2 %v6989_v30, %s8306_s28  ;;  %6993 = vrot.lane.b32.xlu1 %v6989_v30, %s8305_s27  ;;  %v7003_v31 = vsel %vm82_vm1, %v6989_v30, 0  ;;  %v7000_v39 = vmul.f32 %v6989_v30, %v6989_v30 }
0x195d   : > { %v7022_v26 = vand.u32 4294901760, %v7003_v31 }
0x195f   : > { %7053 = vmatmul.f32.vlgmr.msrb.gmra.mxu3 %v7022_v26  ;;  %v7023_v27 = vsub.f32 %v7003_v31, %v7022_v26 }
0x1960   : > { %7261 = vmatpush.msrb.mxu3 %v8355_v3 }
0x1961   : > { %7077 = vmatmul.f32.vlgmr.msra.gmra.mxu0 %v7023_v27  ;;  %v7024_v28 = vand.u32 4294901760, %v7023_v27 }
0x1962   : > { %7287 = vmatpush.msra.mxu0 %v8369_v7 }
0x1963   : > { %7101 = vmatmul.f32.vlgmr.msra.gmra.mxu1 %v7024_v28  ;;  %v7025_v29 = vsub.f32 %v7023_v27, %v7024_v28 }
0x1964   : > { %7309 = vmatpush.msra.mxu1 %v8355_v3 }
0x1965   : > { %v7026_v32 = vand.u32 4294901760, %v7025_v29 }
0x1967   : > { %7027 = vmatmul.f32.vlgmr.msrb.gmra.mxu2 %v7026_v32  ;;  %7147 = vmatmul.f32.vlgmr.msra.gmra.mxu3 %v7022_v26 }
0x1968   : > { %7238 = vmatpush.msrb.mxu2 %v8361_v4  ;;  %7389 = vmatpush.msra.mxu3 %v8375_v11 }
0x196f   : > { %7125 = vmatmul.f32.vlgmr.msra.gmra.mxu2 %v7022_v26 }
0x1970   : > { %7359 = vmatpush.msra.mxu2 %v8355_v3 }
0x19b6   : > { %v6997_v36 = vpop.permute.xlu2 %6996 }
0x19ce   : > { %v6994_v34 = vpop.permute.xlu1 %6993 }
0x19cf   : > { %v6999_v37 = vsel %vm77_vm2, %v6994_v34, %v6997_v36 }
0x19d0   : > { %v7001_v10 = vmul.f32 %v6999_v37, %v6999_v37 }
0x19d2   : > { %v7002_v42 = vadd.f32 %v7001_v10, %v7000_v39 }
0x19d4   : > { %v7151_v47 = vmul.f32 %v8338_v1, %v7002_v42 }
0x19d6   : > { %v7152_v50 = vmul.f32 %v7151_v47, %v6999_v37 }
0x19de   : > { %v7078_v41 = vpop.f32.mrf.mxu0 }
0x19e0   : > { %v7102_v45 = vpop.f32.mrf.mxu1 }
0x19e2   : > { %v7054_v38 = vpop.f32.mrf.mxu3 }
0x19ea   : > { %v7028_v43 = vpop.f32.mrf.mxu2  ;;  %v7148_v54 = vpop.f32.mrf.mxu3 }
0x19eb   : > { %v7055_v40 = vadd.f32 %v7054_v38, %v7028_v43 }
0x19ed   : > { %v7079_v44 = vadd.f32 %v7078_v41, %v7055_v40 }
0x19ef   : > { %v7103_v48 = vadd.f32 %v7102_v45, %v7079_v44 }
0x19f2   : > { %v7126_v22 = vpop.f32.mrf.mxu2 }
0x19f3   : > { %v7127_v49 = vadd.f32 %v7126_v22, %v7103_v48 }
0x19f5   : > { %v7149_v51 = vadd.f32 %v7148_v54, %v7127_v49 }
0x19f7   : > { %v7153_v52 = vadd.f32 %v7152_v50, %v7149_v51 }
0x19f9   : > { %v7154_v53 = vmul.f32 8.2671955e-05, %v7153_v52 }
0x19fb   : > { %v8983_v55 = vadd.f32 %v7154_v53, %v6991_v59 }
0x19fd   : > { %7160 = vrot.lane.b32.xlu1 %v8983_v55, %s8306_s28  ;;  %7157 = vrot.lane.b32.xlu0 %v8983_v55, %s8305_s27  ;;  %v7167_v56 = vsel %vm82_vm1, %v8983_v55, 0  ;;  %v7164_v9 = vmul.f32 %v8983_v55, %v8983_v55 }
0x19fe   : > { %v7186_v58 = vand.u32 4294901760, %v7167_v56 }
0x1a00   : > { %7217 = vmatmul.f32.vlgmr.msrb.gmra.mxu1 %v7186_v58  ;;  %v7187_v33 = vsub.f32 %v7167_v56, %v7186_v58 }
0x1a01   : > { %7435 = vmatpush.msrb.mxu1 %v8355_v3 }
0x1a02   : > { %7241 = vmatmul.f32.vlgmr.msrb.gmra.mxu2 %v7187_v33  ;;  %v7188_v60 = vand.u32 4294901760, %v7187_v33 }
0x1a03   : > { %7461 = vmatpush.msrb.mxu2 %v8369_v7 }
0x1a04   : > { %7265 = vmatmul.f32.vlgmr.msrb.gmra.mxu3 %v7188_v60  ;;  %v7189_v35 = vsub.f32 %v7187_v33, %v7188_v60 }
0x1a05   : > { %7483 = vmatpush.msrb.mxu3 %v8355_v3 }
0x1a06   : > { %v7190_v2 = vand.u32 4294901760, %v7189_v35 }
0x1a08   : > { %7191 = vmatmul.f32.vlgmr.msrb.gmra.mxu0 %v7190_v2  ;;  %7311 = vmatmul.f32.vlgmr.msra.gmra.mxu1 %v7186_v58 }
0x1a09   : > { %7412 = vmatpush.msrb.mxu0 %v8361_v4  ;;  %7559 = vmatpush.msra.mxu1 %v8375_v11 }
0x1a10   : > { %7289 = vmatmul.f32.vlgmr.msra.gmra.mxu0 %v7186_v58 }
0x1a11   : > { %7529 = vmatpush.msra.mxu0 %v8355_v3 }
0x1a6f   : > { %v7161_v6 = vpop.permute.xlu1 %7160  ;;  %v7158_v61 = vpop.permute.xlu0 %7157 }
0x1a70   : > { %v7163_v62 = vsel %vm77_vm2, %v7158_v61, %v7161_v6 }
0x1a71   : > { %v7165_v63 = vmul.f32 %v7163_v62, %v7163_v62 }
0x1a73   : > { %v7166_v46 = vadd.f32 %v7165_v63, %v7164_v9 }
0x1a75   : > { %v7315_v15 = vmul.f32 %v8338_v1, %v7166_v46 }
0x1a77   : > { %v7316_v21 = vmul.f32 %v7315_v15, %v7163_v62 }
0x1a7d   : > { %v7218_v5 = vpop.f32.mrf.mxu1 }
0x1a85   : > { %v7192_v8 = vpop.f32.mrf.mxu0  ;;  %v7242_v13 = vpop.f32.mrf.mxu2 }
0x1a86   : > { %v7219_v12 = vadd.f32 %v7218_v5, %v7192_v8  ;;  %v7312_v20 = vpop.f32.mrf.mxu1 }
0x1a87   : > { %v7266_v19 = vpop.f32.mrf.mxu3 }
0x1a88   : > { %v7243_v14 = vadd.f32 %v7242_v13, %v7219_v12 }
0x1a8a   : > { %v7267_v16 = vadd.f32 %v7266_v19, %v7243_v14 }
0x1a8d   : > { %v7290_v17 = vpop.f32.mrf.mxu0 }
0x1a8e   : > { %v7291_v18 = vadd.f32 %v7290_v17, %v7267_v16 }
0x1a90   : > { %v7313_v23 = vadd.f32 %v7312_v20, %v7291_v18 }
0x1a92   : > { %v9001_v24 = vadd.f32 %v7316_v21, %v7313_v23 }
0x1a94   : > { %v7318_v57 = vmul.f32 0.00012626263, %v9001_v24  ;;  %v7320_v49 = vmul.f32 4.7348483e-05, %v9001_v24  ;;  %v7324_v54 = vmul.f32 0.0018640143, %v9001_v24 }
0x1a95   : > { %v7326_v52 = vmul.f32 0.001796891, %v9001_v24  ;;  %v7322_v53 = vmul.f32 0.000617284, %v9001_v24 }
0x1a96   : > { %v7319_v25 = vadd.f32 %v7318_v57, %v8983_v55  ;;  %v7321_v58 = vadd.f32 %v7320_v49, %v8983_v55  ;;  %v7325_v33 = vadd.f32 %v7324_v54, %v8983_v55 }
0x1a97   : > { %v7327_v6 = vadd.f32 %v7326_v52, %v8983_v55  ;;  %v7323_v61 = vadd.f32 %v7322_v53, %v8983_v55 }
0x1a98   : > { %7334 = vrot.lane.b32.xlu0 %v7319_v25, %s8306_s28  ;;  %7331 = vrot.lane.b32.xlu2 %v7319_v25, %s8305_s27  ;;  %v7341_v59 = vsel %vm82_vm1, %v7319_v25, 0  ;;  %v7338_v38 = vmul.f32 %v7319_v25, %v7319_v25 }
0x1a99   : > { %v7360_v30 = vand.u32 4294901760, %v7341_v59 }
0x1a9b   : > { %7391 = vmatmul.f32.vlgmr.msra.gmra.mxu3 %v7360_v30  ;;  %v7361_v31 = vsub.f32 %v7341_v59, %v7360_v30 }
0x1a9c   : > { %7605 = vmatpush.msra.mxu3 %v8355_v3 }
0x1a9d   : > { %7415 = vmatmul.f32.vlgmr.msrb.gmra.mxu0 %v7361_v31  ;;  %v7362_v26 = vand.u32 4294901760, %v7361_v31 }
0x1a9e   : > { %7631 = vmatpush.msrb.mxu0 %v8369_v7 }
0x1a9f   : > { %7439 = vmatmul.f32.vlgmr.msrb.gmra.mxu1 %v7362_v26  ;;  %v7363_v27 = vsub.f32 %v7361_v31, %v7362_v26 }
0x1aa0   : > { %7653 = vmatpush.msrb.mxu1 %v8355_v3 }
0x1aa1   : > { %v7364_v28 = vand.u32 4294901760, %v7363_v27 }
0x1aa3   : > { %7365 = vmatmul.f32.vlgmr.msra.gmra.mxu2 %v7364_v28  ;;  %7485 = vmatmul.f32.vlgmr.msrb.gmra.mxu3 %v7360_v30 }
0x1aa4   : > { %7582 = vmatpush.msra.mxu2 %v8361_v4  ;;  %7729 = vmatpush.msrb.mxu3 %v8375_v11 }
0x1aab   : > { %7463 = vmatmul.f32.vlgmr.msrb.gmra.mxu2 %v7360_v30 }
0x1aac   : > { %7699 = vmatpush.msrb.mxu2 %v8355_v3 }
0x1af2   : > { %v7332_v32 = vpop.permute.xlu2 %7331 }
0x1b0a   : > { %v7335_v29 = vpop.permute.xlu0 %7334 }
0x1b0b   : > { %v7337_v34 = vsel %vm77_vm2, %v7332_v32, %v7335_v29 }
0x1b0c   : > { %v7339_v36 = vmul.f32 %v7337_v34, %v7337_v34 }
0x1b0e   : > { %v7340_v40 = vadd.f32 %v7339_v36, %v7338_v38 }
0x1b10   : > { %v7489_v44 = vmul.f32 %v8338_v1, %v7340_v40 }
0x1b12   : > { %v7490_v50 = vmul.f32 %v7489_v44, %v7337_v34 }
0x1b1a   : > { %v7416_v39 = vpop.f32.mrf.mxu0 }
0x1b1c   : > { %v7440_v42 = vpop.f32.mrf.mxu1 }
0x1b1e   : > { %v7392_v37 = vpop.f32.mrf.mxu3 }
0x1b26   : > { %v7366_v10 = vpop.f32.mrf.mxu2  ;;  %v7486_v22 = vpop.f32.mrf.mxu3 }
0x1b27   : > { %v7393_v43 = vadd.f32 %v7392_v37, %v7366_v10  ;;  %v7328_v10 = vmul.f32 5.754156e-05, %v9001_v24 }
0x1b29   : > { %v7417_v41 = vadd.f32 %v7416_v39, %v7393_v43 }
0x1b2b   : > { %v7441_v45 = vadd.f32 %v7440_v42, %v7417_v41  ;;  %v7329_v41 = vadd.f32 %v7328_v10, %v8983_v55 }
0x1b2e   : > { %v7464_v47 = vpop.f32.mrf.mxu2 }
0x1b2f   : > { %v7465_v48 = vadd.f32 %v7464_v47, %v7441_v45 }
0x1b31   : > { %v7487_v51 = vadd.f32 %v7486_v22, %v7465_v48 }
0x1b33   : > { %v7491_v56 = vadd.f32 %v7490_v50, %v7487_v51 }
0x1b35   : > { %v7496_v60 = vmul.f32 -0.007320577, %v7491_v56  ;;  %v7498_v35 = vmul.f32 -0.006791399, %v7491_v56  ;;  %v7492_v2 = vmul.f32 0.00014204545, %v7491_v56 }
0x1b36   : > { %v7494_v62 = vmul.f32 -0.0023569025, %v7491_v56 }
0x1b37   : > { %v7493_v63 = vadd.f32 %v7492_v2, %v7321_v58  ;;  %v7497_v5 = vadd.f32 %v7496_v60, %v7325_v33  ;;  %v7499_v8 = vadd.f32 %v7498_v35, %v7327_v6 }
0x1b38   : > { %v7495_v9 = vadd.f32 %v7494_v62, %v7323_v61 }
0x1b39   : > { %7504 = vrot.lane.b32.xlu2 %v7493_v63, %s8306_s28  ;;  %7501 = vrot.lane.b32.xlu1 %v7493_v63, %s8305_s27  ;;  %v7511_v12 = vsel %vm82_vm1, %v7493_v63, 0  ;;  %v7508_v57 = vmul.f32 %v7493_v63, %v7493_v63 }
0x1b3a   : > { %v7530_v13 = vand.u32 4294901760, %v7511_v12 }
0x1b3c   : > { %7561 = vmatmul.f32.vlgmr.msra.gmra.mxu1 %v7530_v13  ;;  %v7531_v46 = vsub.f32 %v7511_v12, %v7530_v13 }
0x1b3d   : > { %7775 = vmatpush.msra.mxu1 %v8355_v3 }
0x1b3e   : > { %7585 = vmatmul.f32.vlgmr.msra.gmra.mxu2 %v7531_v46  ;;  %v7532_v14 = vand.u32 4294901760, %v7531_v46 }
0x1b3f   : > { %7801 = vmatpush.msra.mxu2 %v8369_v7 }
0x1b40   : > { %7609 = vmatmul.f32.vlgmr.msra.gmra.mxu3 %v7532_v14  ;;  %v7533_v19 = vsub.f32 %v7531_v46, %v7532_v14 }
0x1b41   : > { %7823 = vmatpush.msra.mxu3 %v8355_v3 }
0x1b42   : > { %v7534_v15 = vand.u32 4294901760, %v7533_v19 }
0x1b44   : > { %7535 = vmatmul.f32.vlgmr.msra.gmra.mxu0 %v7534_v15  ;;  %7655 = vmatmul.f32.vlgmr.msrb.gmra.mxu1 %v7530_v13 }
0x1b45   : > { %7752 = vmatpush.msra.mxu0 %v8361_v4  ;;  %7897 = vmatpush.msrb.mxu1 %v8375_v11 }
0x1b4c   : > { %7633 = vmatmul.f32.vlgmr.msrb.gmra.mxu0 %v7530_v13 }
0x1b4d   : > { %7867 = vmatpush.msrb.mxu0 %v8355_v3 }
0x1b93   : > { %v7505_v17 = vpop.permute.xlu2 %7504 }
0x1bab   : > { %v7502_v16 = vpop.permute.xlu1 %7501 }
0x1bac   : > { %v7507_v18 = vsel %vm77_vm2, %v7502_v16, %v7505_v17 }
0x1bad   : > { %v7509_v20 = vmul.f32 %v7507_v18, %v7507_v18 }
0x1baf   : > { %v7510_v30 = vadd.f32 %v7509_v20, %v7508_v57 }
0x1bb1   : > { %v7659_v27 = vmul.f32 %v8338_v1, %v7510_v30 }
0x1bb3   : > { %v7660_v36 = vmul.f32 %v7659_v27, %v7507_v18 }
0x1bb9   : > { %v7562_v21 = vpop.f32.mrf.mxu1 }
0x1bc1   : > { %v7536_v23 = vpop.f32.mrf.mxu0  ;;  %v7586_v59 = vpop.f32.mrf.mxu2 }
0x1bc2   : > { %v7563_v25 = vadd.f32 %v7562_v21, %v7536_v23  ;;  %v7656_v34 = vpop.f32.mrf.mxu1 }
0x1bc3   : > { %v7610_v26 = vpop.f32.mrf.mxu3 }
0x1bc4   : > { %v7587_v31 = vadd.f32 %v7586_v59, %v7563_v25 }
0x1bc6   : > { %v7611_v28 = vadd.f32 %v7610_v26, %v7587_v31 }
0x1bc9   : > { %v7634_v29 = vpop.f32.mrf.mxu0 }
0x1bca   : > { %v7635_v32 = vadd.f32 %v7634_v29, %v7611_v28 }
0x1bcc   : > { %v7657_v37 = vadd.f32 %v7656_v34, %v7635_v32 }
0x1bce   : > { %v7661_v38 = vadd.f32 %v7660_v36, %v7657_v37 }
0x1bd0   : > { %v7666_v43 = vmul.f32 0.0056227418, %v7661_v38  ;;  %v7668_v39 = vmul.f32 0.00028360877, %v7661_v38  ;;  %v7662_v40 = vmul.f32 0.002244669, %v7661_v38 }
0x1bd1   : > { %v7664_v42 = vmul.f32 0.0062013213, %v7661_v38 }
0x1bd2   : > { %v7663_v44 = vadd.f32 %v7662_v40, %v7495_v9  ;;  %v7669_v45 = vadd.f32 %v7668_v39, %v7329_v41  ;;  %v7667_v47 = vadd.f32 %v7666_v43, %v7499_v8 }
0x1bd3   : > { %v7665_v48 = vadd.f32 %v7664_v42, %v7497_v5 }
0x1bd4   : > { %7674 = vrot.lane.b32.xlu1 %v7663_v44, %s8306_s28  ;;  %7671 = vrot.lane.b32.xlu0 %v7663_v44, %s8305_s27  ;;  %v7681_v22 = vsel %vm82_vm1, %v7663_v44, 0  ;;  %v7678_v60 = vmul.f32 %v7663_v44, %v7663_v44 }
0x1bd5   : > { %v7700_v49 = vand.u32 4294901760, %v7681_v22 }
0x1bd7   : > { %7731 = vmatmul.f32.vlgmr.msrb.gmra.mxu3 %v7700_v49  ;;  %v7701_v24 = vsub.f32 %v7681_v22, %v7700_v49 }
0x1bd8   : > { %7943 = vmatpush.msrb.mxu3 %v8355_v3 }
0x1bd9   : > { %7755 = vmatmul.f32.vlgmr.msra.gmra.mxu0 %v7701_v24  ;;  %v7702_v54 = vand.u32 4294901760, %v7701_v24 }
0x1bda   : > { %7969 = vmatpush.msra.mxu0 %v8369_v7 }
0x1bdb   : > { %7779 = vmatmul.f32.vlgmr.msra.gmra.mxu1 %v7702_v54  ;;  %v7703_v55 = vsub.f32 %v7701_v24, %v7702_v54 }
0x1bdc   : > { %7991 = vmatpush.msra.mxu1 %v8355_v3 }
0x1bdd   : > { %v7704_v50 = vand.u32 4294901760, %v7703_v55 }
0x1bdf   : > { %7705 = vmatmul.f32.vlgmr.msrb.gmra.mxu2 %v7704_v50  ;;  %7825 = vmatmul.f32.vlgmr.msra.gmra.mxu3 %v7700_v49 }
0x1be0   : > { %7920 = vmatpush.msrb.mxu2 %v8361_v4  ;;  %8063 = vmatpush.msra.mxu3 %v8375_v11 }
0x1be7   : > { %7803 = vmatmul.f32.vlgmr.msra.gmra.mxu2 %v7700_v49 }
0x1be8   : > { %8033 = vmatpush.msra.mxu2 %v8355_v3 }
0x1c46   : > { %v7675_v51 = vpop.permute.xlu1 %7674  ;;  %v7672_v52 = vpop.permute.xlu0 %7671 }
0x1c47   : > { %v7677_v53 = vsel %vm77_vm2, %v7672_v52, %v7675_v51 }
0x1c48   : > { %v7679_v56 = vmul.f32 %v7677_v53, %v7677_v53 }
0x1c4a   : > { %v7680_v6 = vadd.f32 %v7679_v56, %v7678_v60 }
0x1c4c   : > { %v7829_v63 = vmul.f32 %v8338_v1, %v7680_v6 }
0x1c4e   : > { %v7830_v12 = vmul.f32 %v7829_v63, %v7677_v53 }
0x1c56   : > { %v7756_v2 = vpop.f32.mrf.mxu0 }
0x1c58   : > { %v7780_v62 = vpop.f32.mrf.mxu1 }
0x1c5a   : > { %v7732_v58 = vpop.f32.mrf.mxu3 }
0x1c62   : > { %v7706_v33 = vpop.f32.mrf.mxu2  ;;  %v7826_v9 = vpop.f32.mrf.mxu3 }
0x1c63   : > { %v7733_v35 = vadd.f32 %v7732_v58, %v7706_v33 }
0x1c65   : > { %v7757_v61 = vadd.f32 %v7756_v2, %v7733_v35 }
0x1c67   : > { %v7781_v5 = vadd.f32 %v7780_v62, %v7757_v61 }
0x1c6a   : > { %v7804_v11 = vpop.f32.mrf.mxu2 }
0x1c6b   : > { %v7805_v8 = vadd.f32 %v7804_v11, %v7781_v5 }
0x1c6d   : > { %v7827_v13 = vadd.f32 %v7826_v9, %v7805_v8 }
0x1c6f   : > { %v7831_v46 = vadd.f32 %v7830_v12, %v7827_v13 }
0x1c71   : > { %v7832_v14 = vmul.f32 -0.00018359175, %v7831_v46  ;;  %v7834_v19 = vmul.f32 0.00017576331, %v7831_v46  ;;  %v7836_v15 = vmul.f32 0.00041101116, %v7831_v46 }
0x1c73   : > { %v7833_v16 = vadd.f32 %v7832_v14, %v7665_v48  ;;  %v7837_v17 = vadd.f32 %v7836_v15, %v7669_v45  ;;  %v7835_v18 = vadd.f32 %v7834_v19, %v7667_v47 }
0x1c75   : > { %7842 = vrot.lane.b32.xlu0 %v7833_v16, %s8306_s28  ;;  %7839 = vrot.lane.b32.xlu2 %v7833_v16, %s8305_s27  ;;  %v7849_v20 = vsel %vm82_vm1, %v7833_v16, 0  ;;  %v7846_v32 = vmul.f32 %v7833_v16, %v7833_v16 }
0x1c76   : > { %v7868_v21 = vand.u32 4294901760, %v7849_v20 }
0x1c78   : > { %7899 = vmatmul.f32.vlgmr.msrb.gmra.mxu1 %v7868_v21  ;;  %v7869_v23 = vsub.f32 %v7849_v20, %v7868_v21 }
0x1c79   : > { %8109 = vmatpush.msrb.mxu1 %v8355_v3 }
0x1c7a   : > { %7923 = vmatmul.f32.vlgmr.msrb.gmra.mxu2 %v7869_v23  ;;  %v7870_v57 = vand.u32 4294901760, %v7869_v23 }
0x1c7b   : > { %8135 = vmatpush.msrb.mxu2 %v8369_v7 }
0x1c7c   : > { %7947 = vmatmul.f32.vlgmr.msrb.gmra.mxu3 %v7870_v57  ;;  %v7871_v25 = vsub.f32 %v7869_v23, %v7870_v57 }
0x1c7d   : > { %8157 = vmatpush.msrb.mxu3 %v8355_v3 }
0x1c7e   : > { %v7872_v59 = vand.u32 4294901760, %v7871_v25 }
0x1c80   : > { %7873 = vmatmul.f32.vlgmr.msrb.gmra.mxu0 %v7872_v59  ;;  %7993 = vmatmul.f32.vlgmr.msra.gmra.mxu1 %v7868_v21 }
0x1c81   : > { %8086 = vmatpush.msrb.mxu0 %v8361_v4 }
0x1c88   : > { %7971 = vmatmul.f32.vlgmr.msra.gmra.mxu0 %v7868_v21 }
0x1ccf   : > { %v7840_v31 = vpop.permute.xlu2 %7839 }
0x1ce7   : > { %v7843_v30 = vpop.permute.xlu0 %7842 }
0x1ce8   : > { %v7845_v26 = vsel %vm77_vm2, %v7840_v31, %v7843_v30 }
0x1ce9   : > { %v7847_v27 = vmul.f32 %v7845_v26, %v7845_v26 }
0x1ceb   : > { %v7848_v36 = vadd.f32 %v7847_v27, %v7846_v32 }
0x1ced   : > { %v7997_v3 = vmul.f32 %v8338_v1, %v7848_v36 }
0x1cef   : > { %v7998_v40 = vmul.f32 %v7997_v3, %v7845_v26 }
0x1cf5   : > { %v7900_v28 = vpop.f32.mrf.mxu1 }
0x1cfd   : > { %v7874_v29 = vpop.f32.mrf.mxu0  ;;  %v7924_v7 = vpop.f32.mrf.mxu2 }
0x1cfe   : > { %v7901_v34 = vadd.f32 %v7900_v28, %v7874_v29  ;;  %v7994_v4 = vpop.f32.mrf.mxu1 }
0x1cff   : > { %v7948_v10 = vpop.f32.mrf.mxu3 }
0x1d00   : > { %v7925_v37 = vadd.f32 %v7924_v7, %v7901_v34 }
0x1d02   : > { %v7949_v38 = vadd.f32 %v7948_v10, %v7925_v37 }
0x1d05   : > { %v7972_v43 = vpop.f32.mrf.mxu0 }
0x1d06   : > { %v7973_v39 = vadd.f32 %v7972_v43, %v7949_v38 }
0x1d08   : > { %v7995_v41 = vadd.f32 %v7994_v4, %v7973_v39 }
0x1d0a   : > { %v7999_v42 = vadd.f32 %v7998_v40, %v7995_v41 }
0x1d0c   : > { %v8000_v44 = vmul.f32 -0.00017268391, %v7999_v42  ;;  %v8002_v45 = vmul.f32 -0.00020352032, %v7999_v42 }
0x1d0e   : > { %v8003_v47 = vadd.f32 %v8002_v45, %v7837_v17  ;;  %v8001_v48 = vadd.f32 %v8000_v44, %v7835_v18 }
0x1d10   : > { %8008 = vrot.lane.b32.xlu2 %v8001_v48, %s8306_s28  ;;  %8005 = vrot.lane.b32.xlu1 %v8001_v48, %s8305_s27  ;;  %v8015_v22 = vsel %vm82_vm1, %v8001_v48, 0  ;;  %v8012_v60 = vmul.f32 %v8001_v48, %v8001_v48 }
0x1d11   : > { %v8034_v49 = vand.u32 4294901760, %v8015_v22 }
0x1d13   : > { %8065 = vmatmul.f32.vlgmr.msra.gmra.mxu3 %v8034_v49  ;;  %v8035_v24 = vsub.f32 %v8015_v22, %v8034_v49 }
0x1d15   : > { %8089 = vmatmul.f32.vlgmr.msrb.gmra.mxu0 %v8035_v24  ;;  %v8036_v54 = vand.u32 4294901760, %v8035_v24 }
0x1d17   : > { %8113 = vmatmul.f32.vlgmr.msrb.gmra.mxu1 %v8036_v54  ;;  %v8037_v55 = vsub.f32 %v8035_v24, %v8036_v54 }
0x1d19   : > { %v8038_v50 = vand.u32 4294901760, %v8037_v55 }
0x1d1b   : > { %8039 = vmatmul.f32.vlgmr.msra.gmra.mxu2 %v8038_v50  ;;  %8159 = vmatmul.f32.vlgmr.msrb.gmra.mxu3 %v8034_v49 }
0x1d23   : > { %8137 = vmatmul.f32.vlgmr.msrb.gmra.mxu2 %v8034_v49 }
0x1d6a   : > { %v8009_v52 = vpop.permute.xlu2 %8008 }
0x1d82   : > { %v8006_v51 = vpop.permute.xlu1 %8005 }
0x1d83   : > { %v8011_v53 = vsel %vm77_vm2, %v8006_v51, %v8009_v52 }
0x1d84   : > { %v8013_v56 = vmul.f32 %v8011_v53, %v8011_v53 }
0x1d86   : > { %v8014_v6 = vadd.f32 %v8013_v56, %v8012_v60 }
0x1d88   : > { %v8163_v63 = vmul.f32 %v8338_v1, %v8014_v6 }
0x1d8a   : > { %v8164_v12 = vmul.f32 %v8163_v63, %v8011_v53 }
0x1d92   : > { %v8090_v2 = vpop.f32.mrf.mxu0 }
0x1d94   : > { %v8114_v62 = vpop.f32.mrf.mxu1 }
0x1d96   : > { %v8066_v58 = vpop.f32.mrf.mxu3 }
0x1d9e   : > { %v8040_v33 = vpop.f32.mrf.mxu2  ;;  %v8160_v9 = vpop.f32.mrf.mxu3 }
0x1d9f   : > { %v8067_v35 = vadd.f32 %v8066_v58, %v8040_v33 }
0x1da1   : > { %v8091_v61 = vadd.f32 %v8090_v2, %v8067_v35 }
0x1da3   : > { %v8115_v5 = vadd.f32 %v8114_v62, %v8091_v61 }
0x1da6   : > { %v8138_v11 = vpop.f32.mrf.mxu2 }
0x1da7   : > { %v8139_v8 = vadd.f32 %v8138_v11, %v8115_v5 }
0x1da9   : > { %v8161_v13 = vadd.f32 %v8160_v9, %v8139_v8 }
0x1dab   : > { %v8165_v46 = vadd.f32 %v8164_v12, %v8161_v13 }
0x1dad   : > { %v8166_v14 = vmul.f32 8.2671955e-05, %v8165_v46  ;;  %67 = sbr.rel (!%p65_p0) target bundleno = 15 (0xf), region = 52 }
0x1daf   : > { %v8167_v2 = vadd.f32 %v8166_v14, %v8003_v47  }
0x1db1   : > { %8170 = vst.msk [vmem:[%s8169_s5] sm:$0x3] %vm61_vm0, %v8167_v2 }
0x1db2   :  { %8175 = vsyncpa [#allocation3], 1 }
0x1db3   :  { %8176 = vsyncpa [#allocation5], 1 }

</bundles_post_ra>
